<compile_context>
chip_gen: v5e
topology: v5e:2x2
jax: 0.10.0
libtpu: 0.0.40
codegen_flags: <defaults>
</compile_context>

<pallas_src>
import jax
import jax.numpy as jnp
from jax import lax
from jax.experimental import pallas as pl
from jax.experimental.pallas import tpu as pltpu


# ----------------------------------------------------------------------------
# Fused kernel: conv1..conv4 (+tanh) -> [max || mean] pool -> lin1 -> tanh
#               -> lin2 -> log_softmax
# ----------------------------------------------------------------------------
def gat_fused_kernel(x_ref, adj_ref, w1_ref, wr_ref,
                     asrc_ref, adst_ref, bconv_ref,
                     memb_gn_ref, memb_ng_ref, invcnt_ref,
                     wl1_ref, bl1_ref, wl2_ref, bl2_ref,
                     out_ref):
    # adj is stored bf16 (0/1 exact); cast once to f32, reused by all 4 layers
    # (keeps the per-layer N^2 elementwise math fully f32 — friendly to v5e).
    adj = adj_ref[...].astype(jnp.float32)                         # (N, N)

    def gat_layer(h_in_f32, w_bf16, layer):
        # Big matmul on the MXU: bf16 inputs, f32 accumulation. Weights arrive
        # pre-cast; only the activation needs one cast.
        h = jnp.dot(h_in_f32.astype(jnp.bfloat16), w_bf16,
                    preferred_element_type=jnp.float32)            # (N, C) f32
        # One shared bf16 copy of h feeds BOTH MXU consumers below.
        h_bf16 = h.astype(jnp.bfloat16)

        att_s = asrc_ref[layer]                                    # (1, C) bf16
        att_d = adst_ref[layer]                                    # (1, C) f32
        bias = bconv_ref[layer]                                    # (1, C) f32

        # a_dst[i] = <h[i], att_dst>  — VPU/XLU f32 reduction (keeps MXU free).
        a_dst = jnp.sum(h * att_d, axis=1, keepdims=True)          # (N, 1)
        # a_src[j] = <h[j], att_src> as a ROW vector. Single M=1 bf16 MXU dot
        # gives the (1, N) orientation directly (no cross-lane transpose).
        a_src = lax.dot_general(att_s, h_bf16, (((1,), (1,)), ((), ())),
                                preferred_element_type=jnp.float32)  # (1, N)

        # e[i, j] = LeakyReLU(a_dst[i] + a_src[j], 0.2)   (edge j -> i)
        e = a_dst + a_src                                          # (N, N)
        e = jnp.maximum(e, 0.2 * e)                                # mul+max, no select

        # Masked softmax over sources j WITHOUT a -inf select:
        # max over unmasked e >= masked max, so exp(e - m) <= 1 and the shift
        # cancels in the normalization; the 0/1 adj multiply does the masking.
        # add_self_loops guarantees every row has at least one edge; the
        # rowsum clamp guards against f32 exp underflow for extreme logits.
        m = jnp.max(e, axis=1, keepdims=True)                      # (N, 1)
        p = jnp.exp(e - m) * adj                                   # (N, N)
        rowsum = jnp.maximum(jnp.sum(p, axis=1, keepdims=True), 1e-30)

        # Aggregate with UNnormalized p on the MXU (bf16), then scale rows by
        # an approx reciprocal on the (otherwise idle) EUP slot.
        acc = jnp.dot(p.astype(jnp.bfloat16), h_bf16,
                      preferred_element_type=jnp.float32)          # (N, C)
        out = acc * pl.reciprocal(rowsum, approx=True) + bias
        return jnp.tanh(out)                                       # fused .tanh()

    # conv1 (F_IN -> HID), then conv2..conv4 (HID -> HID); h stays in VMEM.
    h = gat_layer(x_ref[...], w1_ref[...], 0)
    for l in range(3):
        h = gat_layer(h, wr_ref[l], l + 1)

    # ------------------------- readout head ---------------------------------
    h_bf16 = h.astype(jnp.bfloat16)                                # (N, C)

    # global_mean_pool: bf16 MXU matmul (memb is exactly 0/1 in bf16),
    # f32 accumulation, host-precomputed 1/counts.
    sum_pool = jnp.dot(memb_gn_ref[...], h_bf16,
                       preferred_element_type=jnp.float32)         # (G, C)
    mean_pool = sum_pool * invcnt_ref[...]                         # (G, C)

    # global_max_pool (static unrolled loop; G is tiny & static). Compare the
    # bf16 membership column directly — no (N, G) f32 temporary.
    # Every graph has >= 1 node, so the -1e30 fill never survives the max.
    G = memb_ng_ref.shape[1]
    maxes = []
    for g in range(G):
        col = memb_ng_ref[:, g:g + 1]                              # (N, 1) bf16
        masked = jnp.where(col > 0, h, -1e30)
        maxes.append(jnp.max(masked, axis=0, keepdims=True))       # (1, C)
    max_pool = jnp.concatenate(maxes, axis=0)                      # (G, C)

    pooled = jnp.concatenate([max_pool, mean_pool], axis=1)        # (G, 2C)

    # Head linears: bf16 MXU, f32 accumulate, f32 biases & activations.
    h1 = jnp.tanh(jnp.dot(pooled.astype(jnp.bfloat16), wl1_ref[...],
                          preferred_element_type=jnp.float32) + bl1_ref[...])
    logits = jnp.dot(h1.astype(jnp.bfloat16), wl2_ref[...],
                     preferred_element_type=jnp.float32) + bl2_ref[...]  # (G, K)

    mlog = jnp.max(logits, axis=1, keepdims=True)
    z = logits - mlog
    lse = jnp.log(jnp.sum(jnp.exp(z), axis=1, keepdims=True))
    out_ref[...] = z - lse                                         # log_softmax


def gat_forward(x, adj_bf16, w1_bf16, w_rest_bf16, att_src_bf16, att_dst, bias_c,
                memb_gn_bf16, memb_ng_bf16, inv_counts, wl1_bf16, bl1, wl2_bf16, bl2):
    g = memb_gn_bf16.shape[0]
    k = wl2_bf16.shape[1]
    vmem = pl.BlockSpec(memory_space=pltpu.MemorySpace.VMEM)
    return pl.pallas_call(
        gat_fused_kernel,
        out_shape=jax.ShapeDtypeStruct((g, k), jnp.float32),
        in_specs=[vmem] * 14,
        out_specs=vmem,
        compiler_params=pltpu.CompilerParams(
            # Whole problem (<1 MiB) fits easily; 32 MiB is safe on v5e/v6e/v7x.
            vmem_limit_bytes=32 * 1024 * 1024,
        ),
    )(x, adj_bf16, w1_bf16, w_rest_bf16, att_src_bf16, att_dst, bias_c,
      memb_gn_bf16, memb_ng_bf16, inv_counts, wl1_bf16, bl1, wl2_bf16, bl2)


# ----------------------------------------------------------------------------
# Pure-JAX references
#   matched=True  : mirrors the kernel's bf16 matmuls / unmasked-max softmax
#                   (tight regression check; only approx-reciprocal & op-order
#                   differences remain)
#   matched=False : plain f32, -inf mask, jax.nn.softmax (semantic check)
# ----------------------------------------------------------------------------
def _bf16_dot(a, b):
    return jnp.dot(a.astype(jnp.bfloat16), b.astype(jnp.bfloat16),
                   preferred_element_type=jnp.float32)


def gatconv_ref(h_in, w, att_s, att_d, b, adj, matched):
    h = _bf16_dot(h_in, w) if matched else h_in @ w
    a_dst = jnp.sum(h * att_d, axis=1, keepdims=True)              # (N, 1)
    if matched:
        a_src = _bf16_dot(att_s, h.T)                              # (1, N)
        e = a_dst + a_src
        e = jnp.maximum(e, 0.2 * e)
        m = jnp.max(e, axis=1, keepdims=True)
        p = jnp.exp(e - m) * adj
        rowsum = jnp.maximum(jnp.sum(p, axis=1, keepdims=True), 1e-30)
        out = _bf16_dot(p, h) / rowsum
    else:
        a_src = jnp.sum(h * att_s, axis=1)[None, :]                # (1, N)
        e = a_dst + a_src
        e = jnp.where(e > 0, e, 0.2 * e)
        e = jnp.where(adj > 0, e, -jnp.inf)
        alpha = jax.nn.softmax(e, axis=1)
        out = alpha @ h
    return jnp.tanh(out + b)


def readout_ref(h, memb_gn, memb_ng, counts, wl1, bl1, wl2, bl2, matched):
    if matched:
        mean_pool = _bf16_dot(memb_gn, h) * (1.0 / counts)
    else:
        mean_pool = (memb_gn @ h) / counts
    max_pool = jnp.max(jnp.where(memb_ng.T[:, :, None] > 0, h[None], -jnp.inf),
                       axis=1)
    pooled = jnp.concatenate([max_pool, mean_pool], axis=1)
    if matched:
        h1 = jnp.tanh(_bf16_dot(pooled, wl1) + bl1)
        logits = _bf16_dot(h1, wl2) + bl2
    else:
        h1 = jnp.tanh(pooled @ wl1 + bl1)
        logits = h1 @ wl2 + bl2
    return jax.nn.log_softmax(logits, axis=1)


def gat_ref(x, adj, convs, memb_gn, memb_ng, counts, wl1, bl1, wl2, bl2, matched):
    h = x
    for (w, a_s, a_d, b) in convs:
        h = gatconv_ref(h, w, a_s, a_d, b, adj, matched)
    return readout_ref(h, memb_gn, memb_ng, counts, wl1, bl1, wl2, bl2, matched)


# ----------------------------------------------------------------------------
if __name__ == "__main__":
    # Small synthetic problem consistent with the module's forward.
    N = 128           # total nodes (lane-friendly)
    G = 2             # graphs in the batch (batch_index)
    NPG = N // G      # nodes per graph
    F_IN = 16         # dataset.num_features
    HID = 128         # hidden_channels (small stand-in for 512)
    K = 8             # dataset.num_classes

    key = jax.random.PRNGKey(0)
    keys = jax.random.split(key, 16)

    # Node features
    x0 = jax.random.normal(keys[0], (N, F_IN), dtype=jnp.float32)

    # Block-diagonal random adjacency (edges only inside each graph) + self loops
    adj = jnp.zeros((N, N), dtype=jnp.float32)
    for g in range(G):
        blk = (jax.random.uniform(keys[1 + g], (NPG, NPG)) < 0.15).astype(jnp.float32)
        adj = adj.at[g * NPG:(g + 1) * NPG, g * NPG:(g + 1) * NPG].set(blk)
    adj = jnp.maximum(adj, jnp.eye(N, dtype=jnp.float32))   # add_self_loops=True
    adj_bf16 = adj.astype(jnp.bfloat16)                     # 0/1 is exact in bf16

    # batch_index -> one-hot membership matrices and graph sizes
    batch_index = jnp.repeat(jnp.arange(G), NPG)
    memb_gn = jax.nn.one_hot(batch_index, G, dtype=jnp.float32).T    # (G, N)
    memb_ng = memb_gn.T                                              # (N, G)
    counts = jnp.sum(memb_gn, axis=1, keepdims=True)                 # (G, 1)
    inv_counts = 1.0 / counts                                        # host-side recip
    memb_gn_bf16 = memb_gn.astype(jnp.bfloat16)
    memb_ng_bf16 = memb_ng.astype(jnp.bfloat16)

    # Deterministic parameter init (shapes follow GAT.__init__ with heads=1)
    def conv_params(k, fin, c):
        k0, k1, k2, k3 = jax.random.split(k, 4)
        w = jax.random.normal(k0, (fin, c), dtype=jnp.float32) * (1.0 / jnp.sqrt(fin))
        a_s = jax.random.normal(k1, (1, c), dtype=jnp.float32) * 0.1
        a_d = jax.random.normal(k2, (1, c), dtype=jnp.float32) * 0.1
        b = jax.random.normal(k3, (1, c), dtype=jnp.float32) * 0.01
        return w, a_s, a_d, b

    convs = [conv_params(keys[4 + i], F_IN if i == 0 else HID, HID) for i in range(4)]
    w1_conv = convs[0][0]                                            # (F_IN, HID)
    w_rest = jnp.stack([convs[i][0] for i in range(1, 4)], axis=0)   # (3, HID, HID)
    att_src = jnp.stack([c[1] for c in convs], axis=0)               # (4, 1, HID)
    att_dst = jnp.stack([c[2] for c in convs], axis=0)               # (4, 1, HID)
    bias_c = jnp.stack([c[3] for c in convs], axis=0)                # (4, 1, HID)

    wl1 = jax.random.normal(keys[8], (2 * HID, HID), dtype=jnp.float32) * (1.0 / jnp.sqrt(2 * HID))
    bl1 = jax.random.normal(keys[9], (1, HID), dtype=jnp.float32) * 0.01
    wl2 = jax.random.normal(keys[10], (HID, K), dtype=jnp.float32) * (1.0 / jnp.sqrt(HID))
    bl2 = jax.random.normal(keys[11], (1, K), dtype=jnp.float32) * 0.01

    # Host-side bf16 pre-casts of everything that only feeds MXU matmuls.
    w1_bf16 = w1_conv.astype(jnp.bfloat16)
    w_rest_bf16 = w_rest.astype(jnp.bfloat16)
    att_src_bf16 = att_src.astype(jnp.bfloat16)
    wl1_bf16 = wl1.astype(jnp.bfloat16)
    wl2_bf16 = wl2.astype(jnp.bfloat16)

    # --- Pallas fused forward pass (single kernel launch) ---
    out = gat_forward(x0, adj_bf16, w1_bf16, w_rest_bf16, att_src_bf16, att_dst,
                      bias_c, memb_gn_bf16, memb_ng_bf16, inv_counts,
                      wl1_bf16, bl1, wl2_bf16, bl2)
    out = jax.block_until_ready(out)

    # --- Reference checks ---
    ref_matched = gat_ref(x0, adj, convs, memb_gn, memb_ng, counts,
                          wl1, bl1, wl2, bl2, matched=True)
    ref_f32 = gat_ref(x0, adj, convs, memb_gn, memb_ng, counts,
                      wl1, bl1, wl2, bl2, matched=False)

    assert out.shape == (G, K)
    assert bool(jnp.all(jnp.isfinite(out)))

    err_matched = float(jnp.max(jnp.abs(out - ref_matched)))
    err_f32 = float(jnp.max(jnp.abs(out - ref_f32)))
    # Matched-precision check: residual error is approx-reciprocal (~2^-12 rel,
    # 4 layers) + f32 reduction-order differences -> 2e-2 is a tight guard.
    assert err_matched < 2e-2, f"matched-precision mismatch: {err_matched}"
    # Semantic f32 check: bf16 MXU matmuls legitimately differ from f32 math.
    assert err_f32 < 1e-1, f"f32 semantic mismatch: {err_f32}"

    print("KERNEL_OK")
</pallas_src>

<mosaic_0001>
module attributes {stable_mosaic.version = 11 : i64} {
  func.func @gat_fused_kernel(%arg0: memref<128x16xf32, #tpu.memory_space<vmem>>, %arg1: memref<128x128xbf16, #tpu.memory_space<vmem>>, %arg2: memref<16x128xbf16, #tpu.memory_space<vmem>>, %arg3: memref<3x128x128xbf16, #tpu.memory_space<vmem>>, %arg4: memref<4x1x128xbf16, #tpu.memory_space<vmem>>, %arg5: memref<4x1x128xf32, #tpu.memory_space<vmem>>, %arg6: memref<4x1x128xf32, #tpu.memory_space<vmem>>, %arg7: memref<2x128xbf16, #tpu.memory_space<vmem>>, %arg8: memref<128x2xbf16, #tpu.memory_space<vmem>>, %arg9: memref<2x1xf32, #tpu.memory_space<vmem>>, %arg10: memref<256x128xbf16, #tpu.memory_space<vmem>>, %arg11: memref<1x128xf32, #tpu.memory_space<vmem>>, %arg12: memref<128x8xbf16, #tpu.memory_space<vmem>>, %arg13: memref<1x8xf32, #tpu.memory_space<vmem>>, %arg14: memref<2x8xf32, #tpu.memory_space<vmem>>) attributes {dimension_semantics = [], scalar_prefetch = 0 : i64, scratch_operands = 0 : i64, tpu.core_type = #tpu.core_type<tc>} {
    %c0 = arith.constant 0 : index
    %c0_0 = arith.constant 0 : index
    %0 = vector.load %arg1[%c0, %c0_0] : memref<128x128xbf16, #tpu.memory_space<vmem>>, vector<128x128xbf16>
    %1 = arith.extf %0 : vector<128x128xbf16> to vector<128x128xf32>
    %c0_1 = arith.constant 0 : index
    %c0_2 = arith.constant 0 : index
    %2 = vector.load %arg0[%c0_1, %c0_2] : memref<128x16xf32, #tpu.memory_space<vmem>>, vector<128x16xf32>
    %c0_3 = arith.constant 0 : index
    %c0_4 = arith.constant 0 : index
    %3 = vector.load %arg2[%c0_3, %c0_4] : memref<16x128xbf16, #tpu.memory_space<vmem>>, vector<16x128xbf16>
    %4 = arith.truncf %2 : vector<128x16xf32> to vector<128x16xbf16>
    %cst = arith.constant dense<0.000000e+00> : vector<128x128xf32>
    %5 = tpu.matmul %4, %3, %cst {dimension_numbers = #tpu.dot_dimension_numbers<[1], [0], [0], [1], [0, 0, 1, 1], [], []>} : vector<128x16xbf16>, vector<16x128xbf16>, vector<128x128xf32> -> vector<128x128xf32>
    %6 = arith.truncf %5 : vector<128x128xf32> to vector<128x128xbf16>
    %c0_5 = arith.constant 0 : index
    %c0_6 = arith.constant 0 : index
    %c0_7 = arith.constant 0 : index
    %7 = vector.load %arg4[%c0_5, %c0_6, %c0_7] : memref<4x1x128xbf16, #tpu.memory_space<vmem>>, vector<1x1x128xbf16>
    %8 = vector.shape_cast %7 : vector<1x1x128xbf16> to vector<1x128xbf16>
    %c0_8 = arith.constant 0 : index
    %c0_9 = arith.constant 0 : index
    %c0_10 = arith.constant 0 : index
    %9 = vector.load %arg5[%c0_8, %c0_9, %c0_10] : memref<4x1x128xf32, #tpu.memory_space<vmem>>, vector<1x1x128xf32>
    %10 = vector.shape_cast %9 : vector<1x1x128xf32> to vector<1x128xf32>
    %c0_11 = arith.constant 0 : index
    %c0_12 = arith.constant 0 : index
    %c0_13 = arith.constant 0 : index
    %11 = vector.load %arg6[%c0_11, %c0_12, %c0_13] : memref<4x1x128xf32, #tpu.memory_space<vmem>>, vector<1x1x128xf32>
    %12 = vector.shape_cast %11 : vector<1x1x128xf32> to vector<1x128xf32>
    %13 = vector.broadcast %10 : vector<1x128xf32> to vector<128x128xf32>
    %14 = arith.mulf %5, %13 : vector<128x128xf32>
    %cst_14 = arith.constant dense<0.000000e+00> : vector<128xf32>
    %15 = vector.multi_reduction <add>, %14, %cst_14 [1] : vector<128x128xf32> to vector<128xf32>
    %16 = vector.shape_cast %15 : vector<128xf32> to vector<128x1xf32>
    %cst_15 = arith.constant dense<0.000000e+00> : vector<1x128xf32>
    %17 = tpu.matmul %8, %6, %cst_15 {dimension_numbers = #tpu.dot_dimension_numbers<[1], [1], [0], [0], [0, 0, 1, 0], [], []>} : vector<1x128xbf16>, vector<128x128xbf16>, vector<1x128xf32> -> vector<1x128xf32>
    %18 = vector.broadcast %16 : vector<128x1xf32> to vector<128x128xf32>
    %19 = vector.broadcast %17 : vector<1x128xf32> to vector<128x128xf32>
    %20 = arith.addf %18, %19 : vector<128x128xf32>
    %cst_16 = arith.constant 2.000000e-01 : f32
    %21 = vector.broadcast %cst_16 : f32 to vector<128x128xf32>
    %22 = arith.mulf %21, %20 : vector<128x128xf32>
    %23 = arith.maximumf %20, %22 : vector<128x128xf32>
    %cst_17 = arith.constant dense<0xFF800000> : vector<128xf32>
    %24 = vector.multi_reduction <maximumf>, %23, %cst_17 [1] : vector<128x128xf32> to vector<128xf32>
    %25 = vector.shape_cast %24 : vector<128xf32> to vector<128x1xf32>
    %26 = vector.broadcast %25 : vector<128x1xf32> to vector<128x128xf32>
    %27 = arith.subf %23, %26 : vector<128x128xf32>
    %28 = math.exp %27 : vector<128x128xf32>
    %29 = arith.mulf %28, %1 : vector<128x128xf32>
    %cst_18 = arith.constant dense<0.000000e+00> : vector<128xf32>
    %30 = vector.multi_reduction <add>, %29, %cst_18 [1] : vector<128x128xf32> to vector<128xf32>
    %31 = vector.shape_cast %30 : vector<128xf32> to vector<128x1xf32>
    %cst_19 = arith.constant 1.000000e-30 : f32
    %32 = vector.broadcast %cst_19 : f32 to vector<128x1xf32>
    %33 = arith.maximumf %31, %32 : vector<128x1xf32>
    %34 = arith.truncf %29 : vector<128x128xf32> to vector<128x128xbf16>
    %cst_20 = arith.constant dense<0.000000e+00> : vector<128x128xf32>
    %35 = tpu.matmul %34, %6, %cst_20 {dimension_numbers = #tpu.dot_dimension_numbers<[1], [0], [0], [1], [0, 0, 1, 1], [], []>} : vector<128x128xbf16>, vector<128x128xbf16>, vector<128x128xf32> -> vector<128x128xf32>
    %36 = tpu.reciprocal %33 {approx = true} : vector<128x1xf32> -> vector<128x1xf32>
    %37 = vector.broadcast %36 : vector<128x1xf32> to vector<128x128xf32>
    %38 = arith.mulf %35, %37 : vector<128x128xf32>
    %39 = vector.broadcast %12 : vector<1x128xf32> to vector<128x128xf32>
    %40 = arith.addf %38, %39 : vector<128x128xf32>
    %41 = math.tanh %40 : vector<128x128xf32>
    %c0_21 = arith.constant 0 : index
    %c0_22 = arith.constant 0 : index
    %c0_23 = arith.constant 0 : index
    %42 = vector.load %arg3[%c0_21, %c0_22, %c0_23] : memref<3x128x128xbf16, #tpu.memory_space<vmem>>, vector<1x128x128xbf16>
    %43 = vector.shape_cast %42 : vector<1x128x128xbf16> to vector<128x128xbf16>
    %44 = arith.truncf %41 : vector<128x128xf32> to vector<128x128xbf16>
    %cst_24 = arith.constant dense<0.000000e+00> : vector<128x128xf32>
    %45 = tpu.matmul %44, %43, %cst_24 {dimension_numbers = #tpu.dot_dimension_numbers<[1], [0], [0], [1], [0, 0, 1, 1], [], []>} : vector<128x128xbf16>, vector<128x128xbf16>, vector<128x128xf32> -> vector<128x128xf32>
    %46 = arith.truncf %45 : vector<128x128xf32> to vector<128x128xbf16>
    %c1 = arith.constant 1 : index
    %c0_25 = arith.constant 0 : index
    %c0_26 = arith.constant 0 : index
    %47 = vector.load %arg4[%c1, %c0_25, %c0_26] : memref<4x1x128xbf16, #tpu.memory_space<vmem>>, vector<1x1x128xbf16>
    %48 = vector.shape_cast %47 : vector<1x1x128xbf16> to vector<1x128xbf16>
    %c1_27 = arith.constant 1 : index
    %c0_28 = arith.constant 0 : index
    %c0_29 = arith.constant 0 : index
    %49 = vector.load %arg5[%c1_27, %c0_28, %c0_29] : memref<4x1x128xf32, #tpu.memory_space<vmem>>, vector<1x1x128xf32>
    %50 = vector.shape_cast %49 : vector<1x1x128xf32> to vector<1x128xf32>
    %c1_30 = arith.constant 1 : index
    %c0_31 = arith.constant 0 : index
    %c0_32 = arith.constant 0 : index
    %51 = vector.load %arg6[%c1_30, %c0_31, %c0_32] : memref<4x1x128xf32, #tpu.memory_space<vmem>>, vector<1x1x128xf32>
    %52 = vector.shape_cast %51 : vector<1x1x128xf32> to vector<1x128xf32>
    %53 = vector.broadcast %50 : vector<1x128xf32> to vector<128x128xf32>
    %54 = arith.mulf %45, %53 : vector<128x128xf32>
    %cst_33 = arith.constant dense<0.000000e+00> : vector<128xf32>
    %55 = vector.multi_reduction <add>, %54, %cst_33 [1] : vector<128x128xf32> to vector<128xf32>
    %56 = vector.shape_cast %55 : vector<128xf32> to vector<128x1xf32>
    %cst_34 = arith.constant dense<0.000000e+00> : vector<1x128xf32>
    %57 = tpu.matmul %48, %46, %cst_34 {dimension_numbers = #tpu.dot_dimension_numbers<[1], [1], [0], [0], [0, 0, 1, 0], [], []>} : vector<1x128xbf16>, vector<128x128xbf16>, vector<1x128xf32> -> vector<1x128xf32>
    %58 = vector.broadcast %56 : vector<128x1xf32> to vector<128x128xf32>
    %59 = vector.broadcast %57 : vector<1x128xf32> to vector<128x128xf32>
    %60 = arith.addf %58, %59 : vector<128x128xf32>
    %cst_35 = arith.constant 2.000000e-01 : f32
    %61 = vector.broadcast %cst_35 : f32 to vector<128x128xf32>
    %62 = arith.mulf %61, %60 : vector<128x128xf32>
    %63 = arith.maximumf %60, %62 : vector<128x128xf32>
    %cst_36 = arith.constant dense<0xFF800000> : vector<128xf32>
    %64 = vector.multi_reduction <maximumf>, %63, %cst_36 [1] : vector<128x128xf32> to vector<128xf32>
    %65 = vector.shape_cast %64 : vector<128xf32> to vector<128x1xf32>
    %66 = vector.broadcast %65 : vector<128x1xf32> to vector<128x128xf32>
    %67 = arith.subf %63, %66 : vector<128x128xf32>
    %68 = math.exp %67 : vector<128x128xf32>
    %69 = arith.mulf %68, %1 : vector<128x128xf32>
    %cst_37 = arith.constant dense<0.000000e+00> : vector<128xf32>
    %70 = vector.multi_reduction <add>, %69, %cst_37 [1] : vector<128x128xf32> to vector<128xf32>
    %71 = vector.shape_cast %70 : vector<128xf32> to vector<128x1xf32>
    %cst_38 = arith.constant 1.000000e-30 : f32
    %72 = vector.broadcast %cst_38 : f32 to vector<128x1xf32>
    %73 = arith.maximumf %71, %72 : vector<128x1xf32>
    %74 = arith.truncf %69 : vector<128x128xf32> to vector<128x128xbf16>
    %cst_39 = arith.constant dense<0.000000e+00> : vector<128x128xf32>
    %75 = tpu.matmul %74, %46, %cst_39 {dimension_numbers = #tpu.dot_dimension_numbers<[1], [0], [0], [1], [0, 0, 1, 1], [], []>} : vector<128x128xbf16>, vector<128x128xbf16>, vector<128x128xf32> -> vector<128x128xf32>
    %76 = tpu.reciprocal %73 {approx = true} : vector<128x1xf32> -> vector<128x1xf32>
    %77 = vector.broadcast %76 : vector<128x1xf32> to vector<128x128xf32>
    %78 = arith.mulf %75, %77 : vector<128x128xf32>
    %79 = vector.broadcast %52 : vector<1x128xf32> to vector<128x128xf32>
    %80 = arith.addf %78, %79 : vector<128x128xf32>
    %81 = math.tanh %80 : vector<128x128xf32>
    %c1_40 = arith.constant 1 : index
    %c0_41 = arith.constant 0 : index
    %c0_42 = arith.constant 0 : index
    %82 = vector.load %arg3[%c1_40, %c0_41, %c0_42] : memref<3x128x128xbf16, #tpu.memory_space<vmem>>, vector<1x128x128xbf16>
    %83 = vector.shape_cast %82 : vector<1x128x128xbf16> to vector<128x128xbf16>
    %84 = arith.truncf %81 : vector<128x128xf32> to vector<128x128xbf16>
    %cst_43 = arith.constant dense<0.000000e+00> : vector<128x128xf32>
    %85 = tpu.matmul %84, %83, %cst_43 {dimension_numbers = #tpu.dot_dimension_numbers<[1], [0], [0], [1], [0, 0, 1, 1], [], []>} : vector<128x128xbf16>, vector<128x128xbf16>, vector<128x128xf32> -> vector<128x128xf32>
    %86 = arith.truncf %85 : vector<128x128xf32> to vector<128x128xbf16>
    %c2 = arith.constant 2 : index
    %c0_44 = arith.constant 0 : index
    %c0_45 = arith.constant 0 : index
    %87 = vector.load %arg4[%c2, %c0_44, %c0_45] : memref<4x1x128xbf16, #tpu.memory_space<vmem>>, vector<1x1x128xbf16>
    %88 = vector.shape_cast %87 : vector<1x1x128xbf16> to vector<1x128xbf16>
    %c2_46 = arith.constant 2 : index
    %c0_47 = arith.constant 0 : index
    %c0_48 = arith.constant 0 : index
    %89 = vector.load %arg5[%c2_46, %c0_47, %c0_48] : memref<4x1x128xf32, #tpu.memory_space<vmem>>, vector<1x1x128xf32>
    %90 = vector.shape_cast %89 : vector<1x1x128xf32> to vector<1x128xf32>
    %c2_49 = arith.constant 2 : index
    %c0_50 = arith.constant 0 : index
    %c0_51 = arith.constant 0 : index
    %91 = vector.load %arg6[%c2_49, %c0_50, %c0_51] : memref<4x1x128xf32, #tpu.memory_space<vmem>>, vector<1x1x128xf32>
    %92 = vector.shape_cast %91 : vector<1x1x128xf32> to vector<1x128xf32>
    %93 = vector.broadcast %90 : vector<1x128xf32> to vector<128x128xf32>
    %94 = arith.mulf %85, %93 : vector<128x128xf32>
    %cst_52 = arith.constant dense<0.000000e+00> : vector<128xf32>
    %95 = vector.multi_reduction <add>, %94, %cst_52 [1] : vector<128x128xf32> to vector<128xf32>
    %96 = vector.shape_cast %95 : vector<128xf32> to vector<128x1xf32>
    %cst_53 = arith.constant dense<0.000000e+00> : vector<1x128xf32>
    %97 = tpu.matmul %88, %86, %cst_53 {dimension_numbers = #tpu.dot_dimension_numbers<[1], [1], [0], [0], [0, 0, 1, 0], [], []>} : vector<1x128xbf16>, vector<128x128xbf16>, vector<1x128xf32> -> vector<1x128xf32>
    %98 = vector.broadcast %96 : vector<128x1xf32> to vector<128x128xf32>
    %99 = vector.broadcast %97 : vector<1x128xf32> to vector<128x128xf32>
    %100 = arith.addf %98, %99 : vector<128x128xf32>
    %cst_54 = arith.constant 2.000000e-01 : f32
    %101 = vector.broadcast %cst_54 : f32 to vector<128x128xf32>
    %102 = arith.mulf %101, %100 : vector<128x128xf32>
    %103 = arith.maximumf %100, %102 : vector<128x128xf32>
    %cst_55 = arith.constant dense<0xFF800000> : vector<128xf32>
    %104 = vector.multi_reduction <maximumf>, %103, %cst_55 [1] : vector<128x128xf32> to vector<128xf32>
    %105 = vector.shape_cast %104 : vector<128xf32> to vector<128x1xf32>
    %106 = vector.broadcast %105 : vector<128x1xf32> to vector<128x128xf32>
    %107 = arith.subf %103, %106 : vector<128x128xf32>
    %108 = math.exp %107 : vector<128x128xf32>
    %109 = arith.mulf %108, %1 : vector<128x128xf32>
    %cst_56 = arith.constant dense<0.000000e+00> : vector<128xf32>
    %110 = vector.multi_reduction <add>, %109, %cst_56 [1] : vector<128x128xf32> to vector<128xf32>
    %111 = vector.shape_cast %110 : vector<128xf32> to vector<128x1xf32>
    %cst_57 = arith.constant 1.000000e-30 : f32
    %112 = vector.broadcast %cst_57 : f32 to vector<128x1xf32>
    %113 = arith.maximumf %111, %112 : vector<128x1xf32>
    %114 = arith.truncf %109 : vector<128x128xf32> to vector<128x128xbf16>
    %cst_58 = arith.constant dense<0.000000e+00> : vector<128x128xf32>
    %115 = tpu.matmul %114, %86, %cst_58 {dimension_numbers = #tpu.dot_dimension_numbers<[1], [0], [0], [1], [0, 0, 1, 1], [], []>} : vector<128x128xbf16>, vector<128x128xbf16>, vector<128x128xf32> -> vector<128x128xf32>
    %116 = tpu.reciprocal %113 {approx = true} : vector<128x1xf32> -> vector<128x1xf32>
    %117 = vector.broadcast %116 : vector<128x1xf32> to vector<128x128xf32>
    %118 = arith.mulf %115, %117 : vector<128x128xf32>
    %119 = vector.broadcast %92 : vector<1x128xf32> to vector<128x128xf32>
    %120 = arith.addf %118, %119 : vector<128x128xf32>
    %121 = math.tanh %120 : vector<128x128xf32>
    %c2_59 = arith.constant 2 : index
    %c0_60 = arith.constant 0 : index
    %c0_61 = arith.constant 0 : index
    %122 = vector.load %arg3[%c2_59, %c0_60, %c0_61] : memref<3x128x128xbf16, #tpu.memory_space<vmem>>, vector<1x128x128xbf16>
    %123 = vector.shape_cast %122 : vector<1x128x128xbf16> to vector<128x128xbf16>
    %124 = arith.truncf %121 : vector<128x128xf32> to vector<128x128xbf16>
    %cst_62 = arith.constant dense<0.000000e+00> : vector<128x128xf32>
    %125 = tpu.matmul %124, %123, %cst_62 {dimension_numbers = #tpu.dot_dimension_numbers<[1], [0], [0], [1], [0, 0, 1, 1], [], []>} : vector<128x128xbf16>, vector<128x128xbf16>, vector<128x128xf32> -> vector<128x128xf32>
    %126 = arith.truncf %125 : vector<128x128xf32> to vector<128x128xbf16>
    %c3 = arith.constant 3 : index
    %c0_63 = arith.constant 0 : index
    %c0_64 = arith.constant 0 : index
    %127 = vector.load %arg4[%c3, %c0_63, %c0_64] : memref<4x1x128xbf16, #tpu.memory_space<vmem>>, vector<1x1x128xbf16>
    %128 = vector.shape_cast %127 : vector<1x1x128xbf16> to vector<1x128xbf16>
    %c3_65 = arith.constant 3 : index
    %c0_66 = arith.constant 0 : index
    %c0_67 = arith.constant 0 : index
    %129 = vector.load %arg5[%c3_65, %c0_66, %c0_67] : memref<4x1x128xf32, #tpu.memory_space<vmem>>, vector<1x1x128xf32>
    %130 = vector.shape_cast %129 : vector<1x1x128xf32> to vector<1x128xf32>
    %c3_68 = arith.constant 3 : index
    %c0_69 = arith.constant 0 : index
    %c0_70 = arith.constant 0 : index
    %131 = vector.load %arg6[%c3_68, %c0_69, %c0_70] : memref<4x1x128xf32, #tpu.memory_space<vmem>>, vector<1x1x128xf32>
    %132 = vector.shape_cast %131 : vector<1x1x128xf32> to vector<1x128xf32>
    %133 = vector.broadcast %130 : vector<1x128xf32> to vector<128x128xf32>
    %134 = arith.mulf %125, %133 : vector<128x128xf32>
    %cst_71 = arith.constant dense<0.000000e+00> : vector<128xf32>
    %135 = vector.multi_reduction <add>, %134, %cst_71 [1] : vector<128x128xf32> to vector<128xf32>
    %136 = vector.shape_cast %135 : vector<128xf32> to vector<128x1xf32>
    %cst_72 = arith.constant dense<0.000000e+00> : vector<1x128xf32>
    %137 = tpu.matmul %128, %126, %cst_72 {dimension_numbers = #tpu.dot_dimension_numbers<[1], [1], [0], [0], [0, 0, 1, 0], [], []>} : vector<1x128xbf16>, vector<128x128xbf16>, vector<1x128xf32> -> vector<1x128xf32>
    %138 = vector.broadcast %136 : vector<128x1xf32> to vector<128x128xf32>
    %139 = vector.broadcast %137 : vector<1x128xf32> to vector<128x128xf32>
    %140 = arith.addf %138, %139 : vector<128x128xf32>
    %cst_73 = arith.constant 2.000000e-01 : f32
    %141 = vector.broadcast %cst_73 : f32 to vector<128x128xf32>
    %142 = arith.mulf %141, %140 : vector<128x128xf32>
    %143 = arith.maximumf %140, %142 : vector<128x128xf32>
    %cst_74 = arith.constant dense<0xFF800000> : vector<128xf32>
    %144 = vector.multi_reduction <maximumf>, %143, %cst_74 [1] : vector<128x128xf32> to vector<128xf32>
    %145 = vector.shape_cast %144 : vector<128xf32> to vector<128x1xf32>
    %146 = vector.broadcast %145 : vector<128x1xf32> to vector<128x128xf32>
    %147 = arith.subf %143, %146 : vector<128x128xf32>
    %148 = math.exp %147 : vector<128x128xf32>
    %149 = arith.mulf %148, %1 : vector<128x128xf32>
    %cst_75 = arith.constant dense<0.000000e+00> : vector<128xf32>
    %150 = vector.multi_reduction <add>, %149, %cst_75 [1] : vector<128x128xf32> to vector<128xf32>
    %151 = vector.shape_cast %150 : vector<128xf32> to vector<128x1xf32>
    %cst_76 = arith.constant 1.000000e-30 : f32
    %152 = vector.broadcast %cst_76 : f32 to vector<128x1xf32>
    %153 = arith.maximumf %151, %152 : vector<128x1xf32>
    %154 = arith.truncf %149 : vector<128x128xf32> to vector<128x128xbf16>
    %cst_77 = arith.constant dense<0.000000e+00> : vector<128x128xf32>
    %155 = tpu.matmul %154, %126, %cst_77 {dimension_numbers = #tpu.dot_dimension_numbers<[1], [0], [0], [1], [0, 0, 1, 1], [], []>} : vector<128x128xbf16>, vector<128x128xbf16>, vector<128x128xf32> -> vector<128x128xf32>
    %156 = tpu.reciprocal %153 {approx = true} : vector<128x1xf32> -> vector<128x1xf32>
    %157 = vector.broadcast %156 : vector<128x1xf32> to vector<128x128xf32>
    %158 = arith.mulf %155, %157 : vector<128x128xf32>
    %159 = vector.broadcast %132 : vector<1x128xf32> to vector<128x128xf32>
    %160 = arith.addf %158, %159 : vector<128x128xf32>
    %161 = math.tanh %160 : vector<128x128xf32>
    %162 = arith.truncf %161 : vector<128x128xf32> to vector<128x128xbf16>
    %c0_78 = arith.constant 0 : index
    %c0_79 = arith.constant 0 : index
    %163 = vector.load %arg7[%c0_78, %c0_79] : memref<2x128xbf16, #tpu.memory_space<vmem>>, vector<2x128xbf16>
    %cst_80 = arith.constant dense<0.000000e+00> : vector<2x128xf32>
    %164 = tpu.matmul %163, %162, %cst_80 {dimension_numbers = #tpu.dot_dimension_numbers<[1], [0], [0], [1], [0, 0, 1, 1], [], []>} : vector<2x128xbf16>, vector<128x128xbf16>, vector<2x128xf32> -> vector<2x128xf32>
    %c0_81 = arith.constant 0 : index
    %c0_82 = arith.constant 0 : index
    %165 = vector.load %arg9[%c0_81, %c0_82] : memref<2x1xf32, #tpu.memory_space<vmem>>, vector<2x1xf32>
    %166 = vector.broadcast %165 : vector<2x1xf32> to vector<2x128xf32>
    %167 = arith.mulf %164, %166 : vector<2x128xf32>
    %c0_83 = arith.constant 0 : index
    %c0_84 = arith.constant 0 : index
    %168 = vector.load %arg8[%c0_83, %c0_84] : memref<128x2xbf16, #tpu.memory_space<vmem>>, vector<128x1xbf16>
    %cst_85 = arith.constant 0.000000e+00 : bf16
    %169 = vector.broadcast %cst_85 : bf16 to vector<128x1xbf16>
    %170 = arith.cmpf ogt, %168, %169 : vector<128x1xbf16>
    %cst_86 = arith.constant -1.000000e+30 : f32
    %171 = vector.shape_cast %170 : vector<128x1xi1> to vector<128x1xi1>
    %172 = vector.broadcast %171 : vector<128x1xi1> to vector<128x128xi1>
    %173 = vector.broadcast %cst_86 : f32 to vector<128x128xf32>
    %174 = arith.select %172, %161, %173 : vector<128x128xi1>, vector<128x128xf32>
    %cst_87 = arith.constant dense<0xFF800000> : vector<128xf32>
    %175 = vector.multi_reduction <maximumf>, %174, %cst_87 [0] : vector<128x128xf32> to vector<128xf32>
    %176 = vector.shape_cast %175 : vector<128xf32> to vector<1x128xf32>
    %c0_88 = arith.constant 0 : index
    %c1_89 = arith.constant 1 : index
    %177 = vector.load %arg8[%c0_88, %c1_89] : memref<128x2xbf16, #tpu.memory_space<vmem>>, vector<128x1xbf16>
    %cst_90 = arith.constant 0.000000e+00 : bf16
    %178 = vector.broadcast %cst_90 : bf16 to vector<128x1xbf16>
    %179 = arith.cmpf ogt, %177, %178 : vector<128x1xbf16>
    %cst_91 = arith.constant -1.000000e+30 : f32
    %180 = vector.shape_cast %179 : vector<128x1xi1> to vector<128x1xi1>
    %181 = vector.broadcast %180 : vector<128x1xi1> to vector<128x128xi1>
    %182 = vector.broadcast %cst_91 : f32 to vector<128x128xf32>
    %183 = arith.select %181, %161, %182 : vector<128x128xi1>, vector<128x128xf32>
    %cst_92 = arith.constant dense<0xFF800000> : vector<128xf32>
    %184 = vector.multi_reduction <maximumf>, %183, %cst_92 [0] : vector<128x128xf32> to vector<128xf32>
    %185 = vector.shape_cast %184 : vector<128xf32> to vector<1x128xf32>
    %186 = tpu.concatenate %176, %185 in 0 : vector<1x128xf32>, vector<1x128xf32> -> vector<2x128xf32>
    %187 = tpu.concatenate %186, %167 in 1 : vector<2x128xf32>, vector<2x128xf32> -> vector<2x256xf32>
    %188 = arith.truncf %187 : vector<2x256xf32> to vector<2x256xbf16>
    %c0_93 = arith.constant 0 : index
    %c0_94 = arith.constant 0 : index
    %189 = vector.load %arg10[%c0_93, %c0_94] : memref<256x128xbf16, #tpu.memory_space<vmem>>, vector<256x128xbf16>
    %cst_95 = arith.constant dense<0.000000e+00> : vector<2x128xf32>
    %190 = tpu.matmul %188, %189, %cst_95 {dimension_numbers = #tpu.dot_dimension_numbers<[1], [0], [0], [1], [0, 0, 1, 1], [], []>} : vector<2x256xbf16>, vector<256x128xbf16>, vector<2x128xf32> -> vector<2x128xf32>
    %c0_96 = arith.constant 0 : index
    %c0_97 = arith.constant 0 : index
    %191 = vector.load %arg11[%c0_96, %c0_97] : memref<1x128xf32, #tpu.memory_space<vmem>>, vector<1x128xf32>
    %192 = vector.broadcast %191 : vector<1x128xf32> to vector<2x128xf32>
    %193 = arith.addf %190, %192 : vector<2x128xf32>
    %194 = math.tanh %193 : vector<2x128xf32>
    %195 = arith.truncf %194 : vector<2x128xf32> to vector<2x128xbf16>
    %c0_98 = arith.constant 0 : index
    %c0_99 = arith.constant 0 : index
    %196 = vector.load %arg12[%c0_98, %c0_99] : memref<128x8xbf16, #tpu.memory_space<vmem>>, vector<128x8xbf16>
    %cst_100 = arith.constant dense<0.000000e+00> : vector<2x8xf32>
    %197 = tpu.matmul %195, %196, %cst_100 {dimension_numbers = #tpu.dot_dimension_numbers<[1], [0], [0], [1], [0, 0, 1, 1], [], []>} : vector<2x128xbf16>, vector<128x8xbf16>, vector<2x8xf32> -> vector<2x8xf32>
    %c0_101 = arith.constant 0 : index
    %c0_102 = arith.constant 0 : index
    %198 = vector.load %arg13[%c0_101, %c0_102] : memref<1x8xf32, #tpu.memory_space<vmem>>, vector<1x8xf32>
    %199 = vector.broadcast %198 : vector<1x8xf32> to vector<2x8xf32>
    %200 = arith.addf %197, %199 : vector<2x8xf32>
    %cst_103 = arith.constant dense<0xFF800000> : vector<2xf32>
    %201 = vector.multi_reduction <maximumf>, %200, %cst_103 [1] : vector<2x8xf32> to vector<2xf32>
    %202 = vector.shape_cast %201 : vector<2xf32> to vector<2x1xf32>
    %203 = vector.broadcast %202 : vector<2x1xf32> to vector<2x8xf32>
    %204 = arith.subf %200, %203 : vector<2x8xf32>
    %205 = math.exp %204 : vector<2x8xf32>
    %cst_104 = arith.constant dense<0.000000e+00> : vector<2xf32>
    %206 = vector.multi_reduction <add>, %205, %cst_104 [1] : vector<2x8xf32> to vector<2xf32>
    %207 = vector.shape_cast %206 : vector<2xf32> to vector<2x1xf32>
    %208 = math.log %207 : vector<2x1xf32>
    %209 = vector.broadcast %208 : vector<2x1xf32> to vector<2x8xf32>
    %210 = arith.subf %204, %209 : vector<2x8xf32>
    %c0_105 = arith.constant 0 : index
    %c0_106 = arith.constant 0 : index
    %211 = vector.load %arg14[%c0_105, %c0_106] : memref<2x8xf32, #tpu.memory_space<vmem>>, vector<2x8xf32>
    tpu.vector_store %arg14[%c0_105, %c0_106], %210 {strides = array<i32>} : memref<2x8xf32, #tpu.memory_space<vmem>>, vector<2x8xf32>,
    return
  }
}

</mosaic_0001>

<bundles_post_ra>
// kernel: tpu_custom_call.1
= control target key start
LH: loop header
LB: loop body
LE: loop exit
PB: predicated region body
PF: predicated region fallthrough
CT: control target
= control target key end

     0   :  { %19 = vsyncpa [#allocation3], 0  ;;  %s4937_s0 = inlined_call_operand.vmem [shape: f32[128,16], index: 0, kind: input, shape index: {}]   ;;  %s4938_s1 = inlined_call_operand.vmem [shape: bf16[128,128], index: 1, kind: input, shape index: {}]   ;;  %s4939_s2 = inlined_call_operand.hbm [shape: bf16[16,128], index: 2, kind: input, shape index: {}]   ;;  %s4940_s3 = inlined_call_operand.vmem [shape: bf16[3,128,128], index: 3, kind: input, shape index: {}]   ;;  %s4941_s4 = inlined_call_operand.vmem [shape: bf16[4,1,128], index: 4, kind: input, shape index: {}]   ;;  %s4942_s5 = inlined_call_operand.vmem [shape: f32[4,1,128], index: 5, kind: input, shape index: {}]   ;;  %s4943_s6 = inlined_call_operand.hbm [shape: f32[4,1,128], index: 6, kind: input, shape index: {}]   ;;  %s4944_s7 = inlined_call_operand.vmem [shape: bf16[2,128], index: 7, kind: input, shape index: {}]   ;;  %s4945_s8 = inlined_call_operand.vmem [shape: bf16[128,2], index: 8, kind: input, shape index: {}]   ;;  %s4946_s9 = inlined_call_operand.vmem [shape: f32[2,1], index: 9, kind: input, shape index: {}]   ;;  %s4947_s10 = inlined_call_operand.hbm [shape: bf16[256,128], index: 10, kind: input, shape index: {}]   ;;  %s4948_s11 = inlined_call_operand.vmem [shape: f32[1,128], index: 11, kind: input, shape index: {}]   ;;  %s4949_s12 = inlined_call_operand.vmem [shape: bf16[128,8], index: 12, kind: input, shape index: {}]   ;;  %s4950_s13 = inlined_call_operand.vmem [shape: f32[1,8], index: 13, kind: input, shape index: {}]   ;;  %s4951_s14 = inlined_call_operand.hbm [shape: f32[2,8], index: 14, kind: output, shape index: {}]  }
   0x1   :  { %20 = vsyncpa [#allocation6], 0  ;;  %s49_s15 = sshll.u32 %s4943_s6, 4  ;;  %s50_s15 = int_to_ptr.hbm [resolvable:$true] %s49_s15 }
   0x2   :  { %21 = vsyncpa [#allocation4], 0  ;;  %s3644_s16 = smov [#allocation5]   ;;  %s30_s20 = sshll.u32 %s4939_s2, 4  ;;  %s31_s20 = int_to_ptr.hbm [resolvable:$true] %s30_s20 }
   0x3   :  { %s51_s17 = sshll.u32 %s3644_s16, 4  ;;  %s3645_s21 = smov 16   ;;  %s52_s17 = int_to_ptr.vmem [resolvable:$true] %s51_s17 }
   0x4   :  { %s3646_s22 = smov 1   ;;  %s3647_s23 = smov [#allocation2]  }
   0x5   :  { %57 = dma.hbm_to_vmem [thread:$0]  %s50_s15, 64, %s52_s17, [#allocation6], %s3645_s21, %s3645_s21, %s3646_s22  }
   0x6   :  { %s32_s24 = sshll.u32 %s3647_s23, 4  ;;  %s3648_s25 = smov 64   ;;  %s33_s24 = int_to_ptr.vmem [resolvable:$true] %s32_s24 }
   0x7   :  { %s3649_s26 = smov 4   ;;  %s68_s28 = sshll.u32 %s4947_s10, 4  ;;  %s69_s28 = int_to_ptr.hbm [resolvable:$true] %s68_s28 }
   0x8   :  { %38 = dma.hbm_to_vmem [thread:$0]  %s31_s20, 128, %s33_s24, [#allocation3], %s3648_s25, %s3648_s25, %s3649_s26  }
   0x9   :  { %s3650_s29 = smov [#allocation7]  }
   0xa   :  { %s70_s30 = sshll.u32 %s3650_s29, 4  ;;  %s71_s30 = int_to_ptr.vmem [resolvable:$true] %s70_s30 }
   0xb   :  { %76 = dma.hbm_to_vmem [thread:$0]  %s69_s28, 2048, %s71_s30, [#allocation6], %s3648_s25, %s3648_s25, %s3649_s26  }
   0xc   :  { %3638 = dma.done.wait [#allocation3], 128  }
   0xd   :  { %3639 = vsyncadd [#allocation3], 4294967168 }
   0xe   :  { %3640 = dma.done.wait [#allocation6], 2112  }
   0xf   :  { %3641 = vsyncadd [#allocation6], 4294965184  ;;  %v2990_v0 = vld [vmem:[#allocation2] sm:$0xff]  ;;  %v129_v2 = vld [vmem:[%s4937_s0 + $0x8] sm:$0xff]  ;;  %vm160_vm0 = vcmask 130048   ;;  %s2737_s15 = sshll.u32 %s4951_s14, 4  ;;  %s2738_s15 = int_to_ptr.hbm [resolvable:$true] %s2737_s15 }
  0x10   :  { %v128_v1 = vld [vmem:[%s4937_s0] sm:$0xff]  ;;  %192 = vmatpush.bf16.msra.mxu0 %v2990_v0  ;;  %v130_v4 = vld [vmem:[%s4937_s0 + $0x10] sm:$0xff]  ;;  %v131_v5 = vld [vmem:[%s4937_s0 + $0x18] sm:$0xff] }
  0x11   :  { %v146_v3 = vpack.c.bf16 %v129_v2, %v128_v1  ;;  %v147_v6 = vpack.c.bf16 %v131_v5, %v130_v4  ;;  %v132_v7 = vld [vmem:[%s4937_s0 + $0x20] sm:$0xff]  ;;  %v133_v8 = vld [vmem:[%s4937_s0 + $0x28] sm:$0xff]  ;;  %v134_v10 = vld [vmem:[%s4937_s0 + $0x30] sm:$0xff] }
  0x12   :  { %v148_v9 = vpack.c.bf16 %v133_v8, %v132_v7  ;;  %v135_v11 = vld [vmem:[%s4937_s0 + $0x38] sm:$0xff]  ;;  %v136_v13 = vld [vmem:[%s4937_s0 + $0x40] sm:$0xff]  ;;  %v137_v14 = vld [vmem:[%s4937_s0 + $0x48] sm:$0xff] }
  0x13   :  { %2752 = vmatmul.msk.bf16.vlgmr.msra.gmra.mxu0 %vm160_vm0, %v146_v3  ;;  %v149_v12 = vpack.c.bf16 %v135_v11, %v134_v10  ;;  %v150_v15 = vpack.c.bf16 %v137_v14, %v136_v13  ;;  %v138_v16 = vld [vmem:[%s4937_s0 + $0x50] sm:$0xff]  ;;  %v139_v17 = vld [vmem:[%s4937_s0 + $0x58] sm:$0xff]  ;;  %v140_v19 = vld [vmem:[%s4937_s0 + $0x60] sm:$0xff] }
  0x14   :  { %v151_v18 = vpack.c.bf16 %v139_v17, %v138_v16  ;;  %v141_v20 = vld [vmem:[%s4937_s0 + $0x68] sm:$0xff]  ;;  %v142_v22 = vld [vmem:[%s4937_s0 + $0x70] sm:$0xff]  ;;  %v143_v23 = vld [vmem:[%s4937_s0 + $0x78] sm:$0xff] }
  0x15   :  { %v152_v21 = vpack.c.bf16 %v141_v20, %v140_v19  ;;  %v153_v24 = vpack.c.bf16 %v143_v23, %v142_v22  ;;  %v3797_v25 = vld [vmem:[%s4942_s5] ss:$0 sm:$0xff] }
  0x16   :  { %v242_v57 = vld [vmem:[%s4941_s4] sm:$0x1] }
  0x23   :  { %2753 = vmatmul.msk.bf16.gmra.mxu0 %vm160_vm0, %v147_v6 }
  0x33   :  { %2754 = vmatmul.msk.bf16.gmra.mxu0 %vm160_vm0, %v148_v9 }
  0x43   :  { %2755 = vmatmul.msk.bf16.gmra.mxu0 %vm160_vm0, %v149_v12 }
  0x53   :  { %2756 = vmatmul.msk.bf16.gmra.mxu0 %vm160_vm0, %v150_v15 }
  0x63   :  { %2757 = vmatmul.msk.bf16.gmra.mxu0 %vm160_vm0, %v151_v18 }
  0x73   :  { %2758 = vmatmul.msk.bf16.gmra.mxu0 %vm160_vm0, %v152_v21 }
  0x83   :  { %2759 = vmatmul.msk.bf16.gmra.mxu0 %vm160_vm0, %v153_v24 }
  0x90   :  { %v194_v26 = vpop.f32.mrf.mxu0 }
  0x91   :  { %v248_v27 = vmul.f32 %v3797_v25, %v194_v26 }
  0x93   :  { %264 = vadd.xlane.f32.xlu0 %v248_v27 }
  0x98   :  { %v196_v28 = vpop.f32.mrf.mxu0 }
  0x99   :  { %v249_v29 = vmul.f32 %v3797_v25, %v196_v28  ;;  %v234_v56 = vpack.c.bf16 %v196_v28, %v194_v26 }
  0x9b   :  { %266 = vadd.xlane.f32.xlu0 %v249_v29 }
  0xa0   :  { %v199_v30 = vpop.f32.mrf.mxu0 }
  0xa1   :  { %v250_v31 = vmul.f32 %v3797_v25, %v199_v30 }
  0xa3   :  { %268 = vadd.xlane.f32.xlu1 %v250_v31 }
  0xa8   :  { %v201_v32 = vpop.f32.mrf.mxu0 }
  0xa9   :  { %v251_v33 = vmul.f32 %v3797_v25, %v201_v32  ;;  %v235_v55 = vpack.c.bf16 %v201_v32, %v199_v30 }
  0xab   :  { %270 = vadd.xlane.f32.xlu1 %v251_v33 }
  0xb0   :  { %v204_v34 = vpop.f32.mrf.mxu0 }
  0xb1   :  { %v252_v35 = vmul.f32 %v3797_v25, %v204_v34 }
  0xb3   :  { %272 = vadd.xlane.f32.xlu2 %v252_v35 }
  0xb8   :  { %v206_v36 = vpop.f32.mrf.mxu0 }
  0xb9   :  { %v253_v37 = vmul.f32 %v3797_v25, %v206_v36  ;;  %v236_v54 = vpack.c.bf16 %v206_v36, %v204_v34 }
  0xbb   :  { %274 = vadd.xlane.f32.xlu2 %v253_v37 }
  0xc0   :  { %v209_v38 = vpop.f32.mrf.mxu0 }
  0xc1   :  { %v254_v39 = vmul.f32 %v3797_v25, %v209_v38 }
  0xc3   :  { %276 = vadd.xlane.f32.xlu2 %v254_v39 }
  0xc8   :  { %v211_v40 = vpop.f32.mrf.mxu0 }
  0xc9   :  { %v237_v53 = vpack.c.bf16 %v211_v40, %v209_v38  ;;  %v255_v17 = vmul.f32 %v3797_v25, %v211_v40 }
  0xd0   :  { %v3806_v41 = vpop.f32.mrf.mxu0 }
  0xd1   :  { %v256_v21 = vmul.f32 %v3797_v25, %v3806_v41 }
  0xd8   :  { %v3808_v42 = vpop.f32.mrf.mxu0 }
  0xd9   :  { %v238_v52 = vpack.c.bf16 %v3808_v42, %v3806_v41  ;;  %v257_v20 = vmul.f32 %v3797_v25, %v3808_v42  ;;  %v3040_v41 = vld [vmem:[%s4938_s1] sm:$0xff]  }
  0xe0   :  { %v3810_v43 = vpop.f32.mrf.mxu0 }
  0xe1   :  { %v258_v27 = vmul.f32 %v3797_v25, %v3810_v43 }
  0xe8   :  { %v221_v44 = vpop.f32.mrf.mxu0 }
  0xe9   :  { %v239_v51 = vpack.c.bf16 %v221_v44, %v3810_v43  ;;  %v259_v19 = vmul.f32 %v3797_v25, %v221_v44 }
  0xf0   :  { %v3812_v45 = vpop.f32.mrf.mxu0 }
  0xf1   :  { %v260_v26 = vmul.f32 %v3797_v25, %v3812_v45 }
  0xf8   :  { %v3814_v46 = vpop.f32.mrf.mxu0 }
  0xf9   :  { %v240_v50 = vpack.c.bf16 %v3814_v46, %v3812_v45  ;;  %v261_v32 = vmul.f32 %v3797_v25, %v3814_v46  ;;  %v3868_v45 = vunpack.c.h.bf16 %v3040_v41 }
 0x100   :  { %v3816_v47 = vpop.f32.mrf.mxu0 }
 0x101   :  { %v262_v33 = vmul.f32 %v3797_v25, %v3816_v47 }
 0x106   :  { %v265_v58 = vpop.xlane.xlu0 %264 }
 0x108   :  { %v3818_v48 = vpop.f32.mrf.mxu0 }
 0x109   :  { %v241_v49 = vpack.c.bf16 %v3818_v48, %v3816_v47  ;;  %v3871_v47 = vunpack.c.l.bf16 %v3040_v41 }
 0x10b   :  { %296 = vmatpush.bf16.xpose.msrb.mxu0 %v241_v49  ;;  %510 = vmatpush.bf16.msra.mxu2 %v241_v49 }
 0x10e   :  { %v267_v62 = vpop.xlane.xlu0 %266 }
 0x10f   :  { %511 = vmatpush.bf16.msra.mxu2 %v240_v50 }
 0x113   :  { %297 = vmatpush.bf16.xpose.msrb.mxu0 %v240_v50  ;;  %512 = vmatpush.bf16.msra.mxu2 %v239_v51 }
 0x116   :  { %v269_v59 = vpop.xlane.xlu1 %268 }
 0x117   :  { %513 = vmatpush.bf16.msra.mxu2 %v238_v52 }
 0x11b   :  { %298 = vmatpush.bf16.xpose.msrb.mxu0 %v239_v51  ;;  %514 = vmatpush.bf16.msra.mxu2 %v237_v53 }
 0x11e   :  { %v271_v63 = vpop.xlane.xlu1 %270 }
 0x11f   :  { %515 = vmatpush.bf16.msra.mxu2 %v236_v54 }
 0x123   :  { %299 = vmatpush.bf16.xpose.msrb.mxu0 %v238_v52  ;;  %516 = vmatpush.bf16.msra.mxu2 %v235_v55 }
 0x126   :  { %v273_v3 = vpop.xlane.xlu2 %272 }
 0x127   :  { %517 = vmatpush.bf16.msra.mxu2 %v234_v56 }
 0x12b   :  { %300 = vmatpush.bf16.xpose.msrb.mxu0 %v237_v53 }
 0x12e   :  { %v275_v18 = vpop.xlane.xlu2 %274 }
 0x133   :  { %301 = vmatpush.bf16.xpose.msrb.mxu0 %v236_v54 }
 0x136   :  { %v277_v24 = vpop.xlane.xlu2 %276 }
 0x13b   :  { %302 = vmatpush.bf16.xpose.msrb.mxu0 %v235_v55 }
 0x143   :  { %303 = vmatpush.bf16.xpose.msrb.mxu0 %v234_v56 }
 0x14a   :  { %304 = vmatmul.bf16.vlgmr.msrb.gmra.mxu0 %v242_v57 }
 0x1c7   :  { %v305_v60 = vpop.f32.mrf.mxu0 }
 0x1c8   :  { %v3830_v61 = vperm.slane %v305_v60, 0 }
 0x1ca   :  { %v313_v0 = vadd.f32 %v3830_v61, %v271_v63  ;;  %v311_v1 = vadd.f32 %v3830_v61, %v267_v62  ;;  %v310_v2 = vadd.f32 %v3830_v61, %v265_v58  ;;  %v314_v7 = vadd.f32 %v3830_v61, %v273_v3 }
 0x1cb   :  { %v312_v11 = vadd.f32 %v3830_v61, %v269_v59  ;;  %v315_v22 = vadd.f32 %v3830_v61, %v275_v18  ;;  %v316_v29 = vadd.f32 %v3830_v61, %v277_v24 }
 0x1cc   :  { %v329_v4 = vmul.f32 0.2, %v313_v0  ;;  %v327_v5 = vmul.f32 0.2, %v311_v1  ;;  %v326_v6 = vmul.f32 0.2, %v310_v2 }
 0x1cd   :  { %v330_v13 = vmul.f32 0.2, %v314_v7  ;;  %v328_v14 = vmul.f32 0.2, %v312_v11  ;;  %v331_v23 = vmul.f32 0.2, %v315_v22 }
 0x1ce   :  { %v3836_v8 = vmax.f32 %v313_v0, %v329_v4  ;;  %v343_v9 = vmax.f32 %v311_v1, %v327_v5  ;;  %v342_v10 = vmax.f32 %v310_v2, %v326_v6  ;;  %v332_v30 = vmul.f32 0.2, %v316_v29 }
 0x1cf   :  { %v307_v12 = vpop.f32.mrf.mxu0  ;;  %v3840_v15 = vmax.f32 %v314_v7, %v330_v13  ;;  %v344_v16 = vmax.f32 %v312_v11, %v328_v14  ;;  %v3854_v28 = vmax.f32 %v315_v22, %v331_v23 }
 0x1d0   :  { %364 = vmax.xlane.f32.xlu2 %v3836_v8  ;;  %360 = vmax.xlane.f32.xlu1 %v343_v9  ;;  %v3858_v31 = vmax.f32 %v316_v29, %v332_v30 }
 0x1d1   :  { %358 = vmax.xlane.f32.xlu0 %v342_v10 }
 0x1d8   :  { %366 = vmax.xlane.f32.xlu2 %v3840_v15  ;;  %362 = vmax.xlane.f32.xlu1 %v344_v16 }
 0x1d9   :  { %278 = vadd.xlane.f32.xlu0 %v255_v17 }
 0x1e0   :  { %286 = vadd.xlane.f32.xlu2 %v259_v19  ;;  %282 = vadd.xlane.f32.xlu1 %v257_v20 }
 0x1e1   :  { %280 = vadd.xlane.f32.xlu0 %v256_v21 }
 0x1e8   :  { %288 = vadd.xlane.f32.xlu2 %v260_v26  ;;  %284 = vadd.xlane.f32.xlu1 %v258_v27  ;;  %v263_v26 = vmul.f32 %v3797_v25, %v3818_v48  ;;  %v3104_v25 = vld [vmem:[%s4938_s1 + $0x10] sm:$0xff]  }
 0x1e9   :  { %368 = vmax.xlane.f32.xlu0 %v3854_v28  ;;  %v3924_v48 = vunpack.c.h.bf16 %v3104_v25 }
 0x1f1   :  { %370 = vmax.xlane.f32.xlu0 %v3858_v31 }
 0x1f9   :  { %290 = vadd.xlane.f32.xlu0 %v261_v32 }
 0x201   :  { %292 = vadd.xlane.f32.xlu0 %v262_v33 }
 0x243   :  { %v365_v34 = vpop.xlane.xlu2 %364  ;;  %v361_v35 = vpop.xlane.xlu1 %360 }
 0x244   :  { %v391_v36 = vsub.f32 %v343_v9, %v361_v35  ;;  %v359_v37 = vpop.xlane.xlu0 %358  ;;  %v393_v53 = vsub.f32 %v3836_v8, %v365_v34  ;;  %v3103_v9 = vld [vmem:[%s4938_s1 + $0x8] sm:$0xff]  }
 0x245   :  { %v390_v38 = vsub.f32 %v342_v10, %v359_v37  ;;  %v3900_v11 = vunpack.c.l.bf16 %v3103_v9  ;;  %v3927_v37 = vunpack.c.l.bf16 %v3104_v25 }
 0x246   :  { %v408_v39 = vmul.f32 1.442695, %v391_v36  ;;  %v412_v62 = vmul.f32 1.442695, %v393_v53  ;;  %v3105_v53 = vld [vmem:[%s4938_s1 + $0x18] sm:$0xff]  }
 0x247   :  { %v406_v40 = vmul.f32 1.442695, %v390_v38 }
 0x248   :  { %3152 = vpow2.f32 %v408_v39 }
 0x249   :  { %3154 = vpow2.f32 %v406_v40 }
 0x24b   :  { %v367_v42 = vpop.xlane.xlu2 %366  ;;  %v363_v43 = vpop.xlane.xlu1 %362 }
 0x24c   :  { %v279_v44 = vpop.xlane.xlu0 %278  ;;  %v392_v49 = vsub.f32 %v344_v16, %v363_v43  ;;  %v3903_v16 = vunpack.c.h.bf16 %v3103_v9  ;;  %v394_v22 = vsub.f32 %v3840_v15, %v367_v42  ;;  %v3106_v9 = vld [vmem:[%s4938_s1 + $0x20] sm:$0xff]  }
 0x24d   :  { %v317_v46 = vadd.f32 %v3830_v61, %v279_v44 }
 0x24e   :  { %v3153_v50 = vpop.eup %3152  ;;  %v410_v57 = vmul.f32 1.442695, %v392_v49  ;;  %v414_v30 = vmul.f32 1.442695, %v394_v22 }
 0x24f   :  { %v333_v51 = vmul.f32 0.2, %v317_v46  ;;  %v3155_v52 = vpop.eup %3154  ;;  %v3875_v54 = vmul.f32 %v3153_v50, %v3868_v45 }
 0x250   :  { %v3880_v56 = vmul.f32 %v3155_v52, %v3871_v47  ;;  %3156 = vpow2.f32 %v410_v57  ;;  %v3947_v57 = vunpack.c.l.bf16 %v3105_v53 }
 0x251   :  { %v3877_v55 = vmax.f32 %v317_v46, %v333_v51  ;;  %3158 = vpow2.f32 %v412_v62 }
 0x252   :  { %v502_v60 = vpack.c.bf16 %v3875_v54, %v3880_v56 }
 0x253   :  { %372 = vmax.xlane.f32.xlu1 %v3877_v55  ;;  %v287_v58 = vpop.xlane.xlu2 %286  ;;  %v283_v59 = vpop.xlane.xlu1 %282 }
 0x254   :  { %v321_v63 = vadd.f32 %v3830_v61, %v287_v58  ;;  %v319_v0 = vadd.f32 %v3830_v61, %v283_v59  ;;  %v281_v1 = vpop.xlane.xlu0 %280  ;;  %518 = vmatmul.bf16.vlgmr.msra.gmra.mxu2 %v502_v60 }
 0x255   :  { %v318_v2 = vadd.f32 %v3830_v61, %v281_v1  ;;  %v3955_v1 = vunpack.c.h.bf16 %v3105_v53 }
 0x256   :  { %v335_v3 = vmul.f32 0.2, %v319_v0  ;;  %v337_v4 = vmul.f32 0.2, %v321_v63  ;;  %v3157_v12 = vpop.eup %3156 }
 0x257   :  { %v334_v5 = vmul.f32 0.2, %v318_v2  ;;  %v3159_v17 = vpop.eup %3158  ;;  %v3907_v21 = vmul.f32 %v3157_v12, %v3900_v11 }
 0x258   :  { %v3888_v6 = vmax.f32 %v319_v0, %v335_v3  ;;  %v3890_v7 = vmax.f32 %v321_v63, %v337_v4  ;;  %v441_v27 = vmul.f32 %v3159_v17, %v3903_v16  ;;  %v2998_v63 = vld [vmem:[%s4940_s3 + $0x38] sm:$0xff] }
 0x259   :  { %v3892_v8 = vmax.f32 %v318_v2, %v334_v5  ;;  %698 = vmatpush.bf16.msra.mxu3 %v2998_v63 }
 0x25a   :  { %376 = vmax.xlane.f32.xlu2 %v3888_v6  ;;  %380 = vmax.xlane.f32.xlu0 %v3890_v7 }
 0x25b   :  { %374 = vmax.xlane.f32.xlu1 %v3892_v8  ;;  %v285_v10 = vpop.xlane.xlu1 %284  ;;  %v289_v18 = vpop.xlane.xlu2 %288 }
 0x25c   :  { %v320_v13 = vadd.f32 %v3830_v61, %v285_v10  ;;  %v369_v14 = vpop.xlane.xlu0 %368  ;;  %v322_v24 = vadd.f32 %v3830_v61, %v289_v18 }
 0x25d   :  { %v395_v19 = vsub.f32 %v3854_v28, %v369_v14  ;;  %v503_v28 = vpack.c.bf16 %v441_v27, %v3907_v21 }
 0x25e   :  { %v336_v20 = vmul.f32 0.2, %v320_v13  ;;  %v338_v33 = vmul.f32 0.2, %v322_v24 }
 0x25f   :  { %v416_v29 = vmul.f32 1.442695, %v395_v19 }
 0x260   :  { %v3910_v23 = vmax.f32 %v320_v13, %v336_v20  ;;  %v3918_v15 = vmax.f32 %v322_v24, %v338_v33  ;;  %v2996_v13 = vld [vmem:[%s4940_s3 + $0x28] sm:$0xff] }
 0x261   :  { %3160 = vpow2.f32 %v416_v29 }
 0x262   :  { %378 = vmax.xlane.f32.xlu2 %v3910_v23  ;;  %3162 = vpow2.f32 %v414_v30  ;;  %v2994_v30 = vld [vmem:[%s4940_s3 + $0x18] sm:$0xff] }
 0x263   :  { %294 = vadd.xlane.f32.xlu1 %v263_v26  ;;  %v2995_v26 = vld [vmem:[%s4940_s3 + $0x20] sm:$0xff] }
 0x264   :  { %v371_v32 = vpop.xlane.xlu0 %370  ;;  %523 = vmatmul.bf16.gmra.mxu2 %v503_v28 }
 0x265   :  { %v396_v50 = vsub.f32 %v3858_v31, %v371_v32 }
 0x267   :  { %v3161_v34 = vpop.eup %3160  ;;  %v418_v52 = vmul.f32 1.442695, %v396_v50 }
 0x268   :  { %v3163_v38 = vpop.eup %3162  ;;  %v3930_v40 = vmul.f32 %v3161_v34, %v3924_v48 }
 0x269   :  { %v442_v42 = vmul.f32 %v3163_v38, %v3927_v37  ;;  %3164 = vpow2.f32 %v418_v52  ;;  %v2991_v52 = vld [vmem:[%s4940_s3] sm:$0xff] }
 0x26b   :  { %382 = vmax.xlane.f32.xlu1 %v3918_v15  ;;  %v504_v43 = vpack.c.bf16 %v3930_v40, %v442_v42 }
 0x26c   :  { %v291_v35 = vpop.xlane.xlu0 %290 }
 0x26d   :  { %v323_v36 = vadd.f32 %v3830_v61, %v291_v35 }
 0x26f   :  { %v339_v39 = vmul.f32 0.2, %v323_v36  ;;  %v3165_v58 = vpop.eup %3164 }
 0x270   :  { %v444_v31 = vmul.f32 %v3165_v58, %v3947_v57 }
 0x271   :  { %v3932_v41 = vmax.f32 %v323_v36, %v339_v39 }
 0x273   :  { %384 = vmax.xlane.f32.xlu2 %v3932_v41 }
 0x274   :  { %v293_v44 = vpop.xlane.xlu0 %292  ;;  %528 = vmatmul.bf16.gmra.mxu2 %v504_v43  ;;  %v3108_v43 = vld [vmem:[%s4938_s1 + $0x30] sm:$0xff]  }
 0x275   :  { %v324_v46 = vadd.f32 %v3830_v61, %v293_v44 }
 0x277   :  { %v340_v49 = vmul.f32 0.2, %v324_v46 }
 0x279   :  { %v3939_v51 = vmax.f32 %v324_v46, %v340_v49  ;;  %v4003_v49 = vunpack.c.l.bf16 %v3108_v43 }
 0x27b   :  { %386 = vmax.xlane.f32.xlu0 %v3939_v51  ;;  %454 = vadd.xlane.f32.xlu2 %v3880_v56 }
 0x283   :  { %456 = vadd.xlane.f32.xlu0 %v3875_v54  ;;  %460 = vadd.xlane.f32.xlu2 %v441_v27 }
 0x28b   :  { %462 = vadd.xlane.f32.xlu0 %v442_v42  ;;  %466 = vadd.xlane.f32.xlu2 %v444_v31  ;;  %v2993_v42 = vld [vmem:[%s4940_s3 + $0x10] sm:$0xff] }
 0x2c6   :  { %v373_v59 = vpop.xlane.xlu1 %372 }
 0x2c7   :  { %v397_v60 = vsub.f32 %v3877_v55, %v373_v59  ;;  %v2997_v55 = vld [vmem:[%s4940_s3 + $0x30] sm:$0xff] }
 0x2c8   :  { %699 = vmatpush.bf16.msra.mxu3 %v2997_v55 }
 0x2c9   :  { %v420_v56 = vmul.f32 1.442695, %v397_v60  ;;  %v4011_v60 = vunpack.c.h.bf16 %v3108_v43 }
 0x2cb   :  { %3166 = vpow2.f32 %v420_v56 }
 0x2cc   :  { %700 = vmatpush.bf16.msra.mxu3 %v2996_v13 }
 0x2cd   :  { %v377_v62 = vpop.xlane.xlu2 %376  ;;  %v381_v32 = vpop.xlane.xlu0 %380 }
 0x2ce   :  { %v399_v54 = vsub.f32 %v3888_v6, %v377_v62  ;;  %v375_v0 = vpop.xlane.xlu1 %374  ;;  %v401_v36 = vsub.f32 %v3890_v7, %v381_v32  ;;  %v2992_v7 = vld [vmem:[%s4940_s3 + $0x8] sm:$0xff] }
 0x2cf   :  { %v398_v2 = vsub.f32 %v3892_v8, %v375_v0  ;;  %v3965_v8 = vunpack.c.h.bf16 %v3106_v9 }
 0x2d0   :  { %v424_v3 = vmul.f32 1.442695, %v399_v54  ;;  %701 = vmatpush.bf16.msra.mxu3 %v2995_v26  ;;  %v428_v44 = vmul.f32 1.442695, %v401_v36 }
 0x2d1   :  { %v3167_v4 = vpop.eup %3166  ;;  %v422_v6 = vmul.f32 1.442695, %v398_v2 }
 0x2d2   :  { %3168 = vpow2.f32 %v424_v3  ;;  %v445_v5 = vmul.f32 %v3167_v4, %v3955_v1 }
 0x2d3   :  { %3170 = vpow2.f32 %v422_v6 }
 0x2d4   :  { %468 = vadd.xlane.f32.xlu0 %v445_v5  ;;  %v505_v10 = vpack.c.bf16 %v445_v5, %v444_v31  ;;  %702 = vmatpush.bf16.msra.mxu3 %v2994_v30 }
 0x2d5   :  { %v379_v12 = vpop.xlane.xlu2 %378 }
 0x2d6   :  { %v400_v14 = vsub.f32 %v3910_v23, %v379_v12  ;;  %v295_v17 = vpop.xlane.xlu1 %294  ;;  %533 = vmatmul.bf16.gmra.mxu2 %v505_v10  ;;  %v3107_v23 = vld [vmem:[%s4938_s1 + $0x28] sm:$0xff]  }
 0x2d7   :  { %v325_v18 = vadd.f32 %v3830_v61, %v295_v17  ;;  %v3981_v61 = vunpack.c.l.bf16 %v3106_v9  ;;  %v3984_v28 = vunpack.c.l.bf16 %v3107_v23  ;;  %v519_v4 = vpop.f32.mrf.mxu2  ;;  %v4018_v10 = vld [vmem:[#allocation5] ss:$0 sm:$0xff] }
 0x2d8   :  { %v3169_v19 = vpop.eup %3168  ;;  %v426_v20 = vmul.f32 1.442695, %v400_v14  ;;  %703 = vmatpush.bf16.msra.mxu3 %v2993_v42 }
 0x2d9   :  { %v447_v22 = vmul.f32 %v3169_v19, %v3965_v8  ;;  %v341_v24 = vmul.f32 0.2, %v325_v18  ;;  %v3171_v29 = vpop.eup %3170 }
 0x2da   :  { %3172 = vpow2.f32 %v426_v20  ;;  %v446_v35 = vmul.f32 %v3171_v29, %v3981_v61 }
 0x2db   :  { %472 = vadd.xlane.f32.xlu2 %v447_v22  ;;  %v3976_v27 = vmax.f32 %v325_v18, %v341_v24 }
 0x2dc   :  { %704 = vmatpush.bf16.msra.mxu3 %v2992_v7 }
 0x2dd   :  { %388 = vmax.xlane.f32.xlu1 %v3976_v27 }
 0x2de   :  { %v383_v33 = vpop.xlane.xlu1 %382 }
 0x2df   :  { %v402_v25 = vsub.f32 %v3918_v15, %v383_v33  ;;  %v506_v15 = vpack.c.bf16 %v447_v22, %v446_v35  ;;  %v521_v13 = vpop.f32.mrf.mxu2 }
 0x2e0   :  { %v3173_v34 = vpop.eup %3172  ;;  %705 = vmatpush.bf16.msra.mxu3 %v2991_v52 }
 0x2e1   :  { %v430_v38 = vmul.f32 1.442695, %v402_v25  ;;  %v448_v39 = vmul.f32 %v3173_v34, %v3984_v28 }
 0x2e3   :  { %3174 = vpow2.f32 %v430_v38  ;;  %474 = vadd.xlane.f32.xlu0 %v448_v39 }
 0x2e4   :  { %3176 = vpow2.f32 %v428_v44 }
 0x2e5   :  { %458 = vadd.xlane.f32.xlu1 %v3907_v21 }
 0x2e6   :  { %v385_v46 = vpop.xlane.xlu2 %384  ;;  %538 = vmatmul.bf16.gmra.mxu2 %v506_v15 }
 0x2e7   :  { %v403_v50 = vsub.f32 %v3932_v41, %v385_v46  ;;  %v4013_v41 = vunpack.c.h.bf16 %v3107_v23  ;;  %v524_v30 = vpop.f32.mrf.mxu2 }
 0x2e9   :  { %v3175_v53 = vpop.eup %3174  ;;  %v432_v58 = vmul.f32 1.442695, %v403_v50 }
 0x2ea   :  { %v450_v21 = vmul.f32 %v3175_v53, %v4003_v49  ;;  %v3177_v56 = vpop.eup %3176 }
 0x2eb   :  { %3178 = vpow2.f32 %v432_v58  ;;  %v449_v2 = vmul.f32 %v3177_v56, %v4013_v41 }
 0x2ec   :  { %478 = vadd.xlane.f32.xlu2 %v450_v21 }
 0x2ed   :  { %464 = vadd.xlane.f32.xlu1 %v3930_v40  ;;  %v507_v3 = vpack.c.bf16 %v449_v2, %v448_v39 }
 0x2ee   :  { %v387_v31 = vpop.xlane.xlu0 %386  ;;  %v455_v59 = vpop.xlane.xlu2 %454 }
 0x2ef   :  { %v486_v62 = vmax.f32 %v455_v59, 1e-30  ;;  %v404_v54 = vsub.f32 %v3939_v51, %v387_v31  ;;  %v3109_v51 = vld [vmem:[%s4938_s1 + $0x38] sm:$0xff]   ;;  %v526_v32 = vpop.f32.mrf.mxu2 }
 0x2f0   :  { %v4023_v14 = vunpack.c.l.bf16 %v3109_v51  ;;  %v4029_v42 = vunpack.c.h.bf16 %v3109_v51 }
 0x2f1   :  { %v3179_v63 = vpop.eup %3178  ;;  %3180 = vrcp.f32 %v486_v62  ;;  %v434_v40 = vmul.f32 1.442695, %v404_v54 }
 0x2f2   :  { %v451_v0 = vmul.f32 %v3179_v63, %v4011_v60 }
 0x2f4   :  { %480 = vadd.xlane.f32.xlu0 %v451_v0  ;;  %v508_v24 = vpack.c.bf16 %v451_v0, %v450_v21 }
 0x2f5   :  { %470 = vadd.xlane.f32.xlu1 %v446_v35 }
 0x2f6   :  { %v457_v55 = vpop.xlane.xlu0 %456  ;;  %543 = vmatmul.bf16.gmra.mxu2 %v507_v3  ;;  %v461_v33 = vpop.xlane.xlu2 %460 }
 0x2f7   :  { %v487_v5 = vmax.f32 %v457_v55, 1e-30  ;;  %v3181_v9 = vpop.eup %3180  ;;  %v489_v25 = vmax.f32 %v461_v33, 1e-30  ;;  %v529_v36 = vpop.f32.mrf.mxu2 }
 0x2f8   :  { %v575_v6 = vmul.f32 %v3181_v9, %v519_v4 }
 0x2f9   :  { %3182 = vrcp.f32 %v487_v5 }
 0x2fa   :  { %3184 = vpow2.f32 %v434_v40  ;;  %v594_v17 = vadd.f32 %v4018_v10, %v575_v6 }
 0x2fc   :  { %3186 = vtanh.f32 %v594_v17 }
 0x2fd   :  { %476 = vadd.xlane.f32.xlu1 %v449_v2 }
 0x2fe   :  { %v463_v52 = vpop.xlane.xlu0 %462  ;;  %v467_v6 = vpop.xlane.xlu2 %466 }
 0x2ff   :  { %v3183_v12 = vpop.eup %3182  ;;  %v531_v7 = vpop.f32.mrf.mxu2  ;;  %v490_v21 = vmax.f32 %v463_v52, 1e-30  ;;  %v492_v17 = vmax.f32 %v467_v6, 1e-30 }
 0x300   :  { %v3185_v18 = vpop.eup %3184  ;;  %v576_v19 = vmul.f32 %v3183_v12, %v521_v13 }
 0x301   :  { %v452_v22 = vmul.f32 %v3185_v18, %v4023_v14 }
 0x302   :  { %v595_v20 = vadd.f32 %v4018_v10, %v576_v19  ;;  %v3187_v26 = vpop.eup %3186 }
 0x304   :  { %3188 = vtanh.f32 %v595_v20 }
 0x305   :  { %482 = vadd.xlane.f32.xlu1 %v452_v22  ;;  %3190 = vrcp.f32 %v489_v25 }
 0x306   :  { %548 = vmatmul.bf16.gmra.mxu2 %v508_v24 }
 0x30a   :  { %v3189_v23 = vpop.eup %3188 }
 0x30b   :  { %v642_v29 = vpack.c.bf16 %v3189_v23, %v3187_v26  ;;  %v3191_v15 = vpop.eup %3190 }
 0x30c   :  { %v578_v50 = vmul.f32 %v3191_v15, %v526_v32 }
 0x30d   :  { %706 = vmatmul.bf16.vlgmr.msra.gmra.mxu3 %v642_v29 }
 0x30e   :  { %v597_v56 = vadd.f32 %v4018_v10, %v578_v50  ;;  %v4041_v50 = vld [vmem:[%s4942_s5 + $0x1] ss:$0 sm:$0xff] }
 0x347   :  { %v469_v9 = vpop.xlane.xlu0 %468 }
 0x348   :  { %v493_v12 = vmax.f32 %v469_v9, 1e-30 }
 0x350   :  { %v389_v34 = vpop.xlane.xlu1 %388 }
 0x351   :  { %v405_v35 = vsub.f32 %v3976_v27, %v389_v34 }
 0x353   :  { %v436_v38 = vmul.f32 1.442695, %v405_v35 }
 0x355   :  { %3192 = vpow2.f32 %v436_v38 }
 0x358   :  { %v459_v39 = vpop.xlane.xlu1 %458 }
 0x359   :  { %v488_v43 = vmax.f32 %v459_v39, 1e-30  ;;  %v534_v62 = vpop.f32.mrf.mxu2 }
 0x35b   :  { %v3193_v44 = vpop.eup %3192  ;;  %3194 = vrcp.f32 %v488_v43 }
 0x35c   :  { %v453_v46 = vmul.f32 %v3193_v44, %v4029_v42 }
 0x35e   :  { %484 = vadd.xlane.f32.xlu2 %v453_v46  ;;  %v509_v53 = vpack.c.bf16 %v453_v46, %v452_v22 }
 0x360   :  { %v465_v58 = vpop.xlane.xlu1 %464  ;;  %553 = vmatmul.bf16.gmra.mxu2 %v509_v53 }
 0x361   :  { %v3195_v27 = vpop.eup %3194  ;;  %v491_v31 = vmax.f32 %v465_v58, 1e-30  ;;  %v536_v40 = vpop.f32.mrf.mxu2 }
 0x362   :  { %v577_v59 = vmul.f32 %v3195_v27, %v524_v30  ;;  %v473_v30 = vpop.xlane.xlu2 %472 }
 0x363   :  { %3196 = vrcp.f32 %v491_v31  ;;  %v495_v34 = vmax.f32 %v473_v30, 1e-30 }
 0x364   :  { %v596_v63 = vadd.f32 %v4018_v10, %v577_v59  ;;  %3198 = vrcp.f32 %v490_v21  ;;  %v475_v21 = vpop.xlane.xlu0 %474 }
 0x365   :  { %3200 = vtanh.f32 %v597_v56 }
 0x366   :  { %3202 = vtanh.f32 %v596_v63 }
 0x368   :  { %v471_v22 = vpop.xlane.xlu1 %470 }
 0x369   :  { %v3197_v54 = vpop.eup %3196  ;;  %v539_v18 = vpop.f32.mrf.mxu2  ;;  %v494_v33 = vmax.f32 %v471_v22, 1e-30 }
 0x36a   :  { %v3199_v0 = vpop.eup %3198  ;;  %v580_v4 = vmul.f32 %v3197_v54, %v531_v7 }
 0x36b   :  { %v3201_v2 = vpop.eup %3200  ;;  %v579_v5 = vmul.f32 %v3199_v0, %v529_v36 }
 0x36c   :  { %v3203_v3 = vpop.eup %3202  ;;  %v599_v51 = vadd.f32 %v4018_v10, %v580_v4  ;;  %v481_v9 = vpop.xlane.xlu0 %480 }
 0x36d   :  { %v643_v55 = vpack.c.bf16 %v3201_v2, %v3203_v3  ;;  %v598_v13 = vadd.f32 %v4018_v10, %v579_v5 }
 0x36e   :  { %3204 = vtanh.f32 %v599_v51 }
 0x36f   :  { %711 = vmatmul.bf16.gmra.mxu3 %v643_v55  ;;  %3206 = vrcp.f32 %v493_v12  ;;  %v479_v12 = vpop.xlane.xlu2 %478 }
 0x370   :  { %3208 = vtanh.f32 %v598_v13  ;;  %v477_v53 = vpop.xlane.xlu1 %476 }
 0x371   :  { %3210 = vrcp.f32 %v492_v17  ;;  %v541_v35 = vpop.f32.mrf.mxu2  ;;  %v497_v56 = vmax.f32 %v477_v53, 1e-30  ;;  %v499_v17 = vmax.f32 %v481_v9, 1e-30 }
 0x372   :  { %3212 = vrcp.f32 %v494_v33 }
 0x374   :  { %v3205_v19 = vpop.eup %3204 }
 0x375   :  { %v3207_v20 = vpop.eup %3206 }
 0x376   :  { %v3209_v24 = vpop.eup %3208  ;;  %v582_v26 = vmul.f32 %v3207_v20, %v536_v40 }
 0x377   :  { %v3211_v23 = vpop.eup %3210  ;;  %v644_v29 = vpack.c.bf16 %v3205_v19, %v3209_v24  ;;  %v498_v19 = vmax.f32 %v479_v12, 1e-30 }
 0x378   :  { %v581_v32 = vmul.f32 %v3211_v23, %v534_v62  ;;  %v601_v25 = vadd.f32 %v4018_v10, %v582_v26  ;;  %v3213_v38 = vpop.eup %3212  ;;  %v496_v62 = vmax.f32 %v475_v21, 1e-30 }
 0x379   :  { %v583_v15 = vmul.f32 %v3213_v38, %v539_v18  ;;  %v544_v44 = vpop.f32.mrf.mxu2  ;;  %v483_v38 = vpop.xlane.xlu1 %482 }
 0x37a   :  { %v600_v36 = vadd.f32 %v4018_v10, %v581_v32  ;;  %3214 = vtanh.f32 %v601_v25 }
 0x37b   :  { %3216 = vrcp.f32 %v495_v34  ;;  %v602_v58 = vadd.f32 %v4018_v10, %v583_v15 }
 0x37c   :  { %3218 = vtanh.f32 %v600_v36 }
 0x37d   :  { %3220 = vtanh.f32 %v602_v58 }
 0x37f   :  { %716 = vmatmul.bf16.gmra.mxu3 %v644_v29 }
 0x380   :  { %v3215_v39 = vpop.eup %3214 }
 0x381   :  { %v3217_v43 = vpop.eup %3216  ;;  %v546_v63 = vpop.f32.mrf.mxu2 }
 0x382   :  { %v3219_v7 = vpop.eup %3218  ;;  %v584_v46 = vmul.f32 %v3217_v43, %v541_v35 }
 0x383   :  { %v645_v52 = vpack.c.bf16 %v3215_v39, %v3219_v7  ;;  %v3221_v2 = vpop.eup %3220  ;;  %v500_v39 = vmax.f32 %v483_v38, 1e-30 }
 0x384   :  { %v603_v31 = vadd.f32 %v4018_v10, %v584_v46 }
 0x386   :  { %3222 = vtanh.f32 %v603_v31 }
 0x387   :  { %3224 = vrcp.f32 %v497_v56 }
 0x388   :  { %3226 = vrcp.f32 %v496_v62 }
 0x389   :  { %v549_v51 = vpop.f32.mrf.mxu2 }
 0x38c   :  { %v3223_v3 = vpop.eup %3222 }
 0x38d   :  { %v3225_v4 = vpop.eup %3224  ;;  %v646_v5 = vpack.c.bf16 %v3223_v3, %v3221_v2 }
 0x38e   :  { %v586_v40 = vmul.f32 %v3225_v4, %v546_v63  ;;  %v3227_v55 = vpop.eup %3226 }
 0x38f   :  { %721 = vmatmul.bf16.gmra.mxu3 %v645_v52  ;;  %v585_v6 = vmul.f32 %v3227_v55, %v544_v44 }
 0x390   :  { %v4044_v27 = vpop.f32.mrf.mxu3  ;;  %v605_v13 = vadd.f32 %v4018_v10, %v586_v40 }
 0x391   :  { %v764_v59 = vmul.f32 %v4041_v50, %v4044_v27  ;;  %v604_v18 = vadd.f32 %v4018_v10, %v585_v6  ;;  %v551_v20 = vpop.f32.mrf.mxu2 }
 0x392   :  { %3228 = vtanh.f32 %v605_v13 }
 0x393   :  { %780 = vadd.xlane.f32.xlu0 %v764_v59  ;;  %3230 = vrcp.f32 %v499_v17 }
 0x394   :  { %3232 = vtanh.f32 %v604_v18 }
 0x395   :  { %3234 = vrcp.f32 %v498_v19 }
 0x398   :  { %v4049_v54 = vpop.f32.mrf.mxu3  ;;  %v3229_v22 = vpop.eup %3228 }
 0x399   :  { %v765_v0 = vmul.f32 %v4041_v50, %v4049_v54  ;;  %v3231_v24 = vpop.eup %3230 }
 0x39a   :  { %v3233_v26 = vpop.eup %3232  ;;  %v588_v23 = vmul.f32 %v3231_v24, %v551_v20 }
 0x39b   :  { %782 = vadd.xlane.f32.xlu1 %v765_v0  ;;  %v3235_v29 = vpop.eup %3234  ;;  %v647_v30 = vpack.c.bf16 %v3229_v22, %v3233_v26 }
 0x39c   :  { %v587_v32 = vmul.f32 %v3235_v29, %v549_v51  ;;  %v607_v33 = vadd.f32 %v4018_v10, %v588_v23 }
 0x39e   :  { %v606_v25 = vadd.f32 %v4018_v10, %v587_v32  ;;  %3236 = vtanh.f32 %v607_v33 }
 0x39f   :  { %726 = vmatmul.bf16.gmra.mxu3 %v646_v5 }
 0x3a0   :  { %3238 = vtanh.f32 %v606_v25  ;;  %v747_v25 = vpack.c.bf16 %v4049_v54, %v4044_v27 }
 0x3a1   :  { %3240 = vrcp.f32 %v500_v39 }
 0x3a4   :  { %v3237_v34 = vpop.eup %3236 }
 0x3a6   :  { %v3239_v35 = vpop.eup %3238 }
 0x3a7   :  { %v648_v36 = vpack.c.bf16 %v3237_v34, %v3239_v35  ;;  %v3241_v7 = vpop.eup %3240  ;;  %v2792_v34 = vld [vmem:[%s4941_s4 + $0x1] sm:$0x1] }
 0x3af   :  { %731 = vmatmul.bf16.gmra.mxu3 %v647_v30 }
 0x3bf   :  { %736 = vmatmul.bf16.gmra.mxu3 %v648_v36 }
 0x3d1   :  { %v485_v43 = vpop.xlane.xlu2 %484 }
 0x3d2   :  { %v501_v15 = vmax.f32 %v485_v43, 1e-30 }
 0x3d4   :  { %3242 = vrcp.f32 %v501_v15 }
 0x3da   :  { %v3243_v52 = vpop.eup %3242 }
 0x3e3   :  { %v554_v44 = vpop.f32.mrf.mxu2 }
 0x3e4   :  { %v589_v46 = vmul.f32 %v3241_v7, %v554_v44 }
 0x3e6   :  { %v608_v53 = vadd.f32 %v4018_v10, %v589_v46 }
 0x3e8   :  { %3244 = vtanh.f32 %v608_v53 }
 0x3eb   :  { %v556_v58 = vpop.f32.mrf.mxu2 }
 0x3ec   :  { %v590_v21 = vmul.f32 %v3243_v52, %v556_v58 }
 0x3ee   :  { %v609_v31 = vadd.f32 %v4018_v10, %v590_v21  ;;  %v3245_v62 = vpop.eup %3244 }
 0x3f0   :  { %3246 = vtanh.f32 %v609_v31 }
 0x3f2   :  { %v712_v59 = vpop.f32.mrf.mxu3 }
 0x3f3   :  { %v766_v56 = vmul.f32 %v4041_v50, %v712_v59 }
 0x3f5   :  { %784 = vadd.xlane.f32.xlu2 %v766_v56 }
 0x3f6   :  { %v3247_v63 = vpop.eup %3246 }
 0x3f7   :  { %v649_v0 = vpack.c.bf16 %v3247_v63, %v3245_v62 }
 0x3f9   :  { %741 = vmatmul.bf16.gmra.mxu3 %v649_v0 }
 0x3fa   :  { %v714_v2 = vpop.f32.mrf.mxu3 }
 0x3fb   :  { %v767_v3 = vmul.f32 %v4041_v50, %v714_v2  ;;  %v748_v33 = vpack.c.bf16 %v714_v2, %v712_v59 }
 0x3fd   :  { %786 = vadd.xlane.f32.xlu0 %v767_v3 }
 0x402   :  { %v717_v4 = vpop.f32.mrf.mxu3 }
 0x403   :  { %v768_v40 = vmul.f32 %v4041_v50, %v717_v4 }
 0x405   :  { %788 = vadd.xlane.f32.xlu1 %v768_v40 }
 0x406   :  { %v781_v35 = vpop.xlane.xlu0 %780 }
 0x40a   :  { %v719_v55 = vpop.f32.mrf.mxu3 }
 0x40b   :  { %v769_v10 = vmul.f32 %v4041_v50, %v719_v55  ;;  %v749_v32 = vpack.c.bf16 %v719_v55, %v717_v4 }
 0x40d   :  { %790 = vadd.xlane.f32.xlu2 %v769_v10 }
 0x40e   :  { %v783_v36 = vpop.xlane.xlu1 %782 }
 0x412   :  { %v722_v5 = vpop.f32.mrf.mxu3 }
 0x413   :  { %v770_v9 = vmul.f32 %v4041_v50, %v722_v5 }
 0x415   :  { %792 = vadd.xlane.f32.xlu2 %v770_v9 }
 0x41a   :  { %v724_v6 = vpop.f32.mrf.mxu3 }
 0x41b   :  { %v750_v30 = vpack.c.bf16 %v724_v6, %v722_v5  ;;  %v771_v4 = vmul.f32 %v4041_v50, %v724_v6 }
 0x422   :  { %v4064_v51 = vpop.f32.mrf.mxu3 }
 0x423   :  { %v772_v5 = vmul.f32 %v4041_v50, %v4064_v51 }
 0x42a   :  { %v4066_v12 = vpop.f32.mrf.mxu3 }
 0x42b   :  { %v751_v29 = vpack.c.bf16 %v4066_v12, %v4064_v51  ;;  %v773_v10 = vmul.f32 %v4041_v50, %v4066_v12 }
 0x432   :  { %v4068_v13 = vpop.f32.mrf.mxu3 }
 0x43a   :  { %v734_v17 = vpop.f32.mrf.mxu3 }
 0x43b   :  { %v752_v23 = vpack.c.bf16 %v734_v17, %v4068_v13  ;;  %v775_v55 = vmul.f32 %v4041_v50, %v734_v17 }
 0x442   :  { %v4070_v18 = vpop.f32.mrf.mxu3 }
 0x44a   :  { %v4072_v19 = vpop.f32.mrf.mxu3 }
 0x44b   :  { %v753_v26 = vpack.c.bf16 %v4072_v19, %v4070_v18 }
 0x468   :  { %v785_v53 = vpop.xlane.xlu2 %784 }
 0x470   :  { %v787_v43 = vpop.xlane.xlu0 %786 }
 0x478   :  { %v789_v44 = vpop.xlane.xlu1 %788 }
 0x47c   :  { %v4074_v20 = vpop.f32.mrf.mxu3 }
 0x480   :  { %v791_v40 = vpop.xlane.xlu2 %790 }
 0x484   :  { %v4076_v22 = vpop.f32.mrf.mxu3 }
 0x485   :  { %v754_v24 = vpack.c.bf16 %v4076_v22, %v4074_v20 }
 0x487   :  { %812 = vmatpush.bf16.xpose.msra.mxu1 %v754_v24  ;;  %1026 = vmatpush.bf16.msra.mxu0 %v754_v24 }
 0x488   :  { %v793_v6 = vpop.xlane.xlu2 %792 }
 0x48b   :  { %1027 = vmatpush.bf16.msra.mxu0 %v753_v26 }
 0x48f   :  { %813 = vmatpush.bf16.xpose.msra.mxu1 %v753_v26  ;;  %1028 = vmatpush.bf16.msra.mxu0 %v752_v23  ;;  %v776_v26 = vmul.f32 %v4041_v50, %v4070_v18 }
 0x493   :  { %1029 = vmatpush.bf16.msra.mxu0 %v751_v29 }
 0x497   :  { %814 = vmatpush.bf16.xpose.msra.mxu1 %v752_v23  ;;  %1030 = vmatpush.bf16.msra.mxu0 %v750_v30  ;;  %v774_v23 = vmul.f32 %v4041_v50, %v4068_v13  ;;  %v778_v13 = vmul.f32 %v4041_v50, %v4074_v20 }
 0x49b   :  { %1031 = vmatpush.bf16.msra.mxu0 %v749_v32 }
 0x49f   :  { %815 = vmatpush.bf16.xpose.msra.mxu1 %v751_v29  ;;  %1032 = vmatpush.bf16.msra.mxu0 %v748_v33 }
 0x4a3   :  { %1033 = vmatpush.bf16.msra.mxu0 %v747_v25 }
 0x4a7   :  { %816 = vmatpush.bf16.xpose.msra.mxu1 %v750_v30  ;;  %v777_v30 = vmul.f32 %v4041_v50, %v4072_v19 }
 0x4af   :  { %817 = vmatpush.bf16.xpose.msra.mxu1 %v749_v32 }
 0x4b7   :  { %818 = vmatpush.bf16.xpose.msra.mxu1 %v748_v33 }
 0x4bf   :  { %819 = vmatpush.bf16.xpose.msra.mxu1 %v747_v25 }
 0x4c6   :  { %820 = vmatmul.bf16.vlgmr.msra.gmra.mxu1 %v2792_v34 }
 0x543   :  { %v821_v38 = vpop.f32.mrf.mxu1 }
 0x544   :  { %v4090_v39 = vperm.slane %v821_v38, 0 }
 0x546   :  { %v829_v15 = vadd.f32 %v4090_v39, %v787_v43  ;;  %v827_v27 = vadd.f32 %v4090_v39, %v783_v36  ;;  %v826_v54 = vadd.f32 %v4090_v39, %v781_v35  ;;  %v830_v58 = vadd.f32 %v4090_v39, %v789_v44 }
 0x547   :  { %v828_v56 = vadd.f32 %v4090_v39, %v785_v53  ;;  %v831_v9 = vadd.f32 %v4090_v39, %v791_v40  ;;  %v832_v12 = vadd.f32 %v4090_v39, %v793_v6 }
 0x548   :  { %v845_v7 = vmul.f32 0.2, %v829_v15  ;;  %v843_v46 = vmul.f32 0.2, %v827_v27  ;;  %v842_v52 = vmul.f32 0.2, %v826_v54 }
 0x549   :  { %v846_v63 = vmul.f32 0.2, %v830_v58  ;;  %v844_v0 = vmul.f32 0.2, %v828_v56  ;;  %v847_v24 = vmul.f32 0.2, %v831_v9 }
 0x54a   :  { %v4096_v21 = vmax.f32 %v829_v15, %v845_v7  ;;  %v859_v31 = vmax.f32 %v827_v27, %v843_v46  ;;  %v858_v59 = vmax.f32 %v826_v54, %v842_v52  ;;  %v848_v51 = vmul.f32 0.2, %v832_v12 }
 0x54b   :  { %v823_v62 = vpop.f32.mrf.mxu1  ;;  %v4100_v2 = vmax.f32 %v830_v58, %v846_v63  ;;  %v860_v3 = vmax.f32 %v828_v56, %v844_v0  ;;  %v4114_v17 = vmax.f32 %v831_v9, %v847_v24 }
 0x54c   :  { %880 = vmax.xlane.f32.xlu2 %v4096_v21  ;;  %876 = vmax.xlane.f32.xlu1 %v859_v31  ;;  %v4118_v29 = vmax.f32 %v832_v12, %v848_v51 }
 0x54d   :  { %874 = vmax.xlane.f32.xlu0 %v858_v59 }
 0x554   :  { %882 = vmax.xlane.f32.xlu2 %v4100_v2  ;;  %878 = vmax.xlane.f32.xlu1 %v860_v3 }
 0x555   :  { %794 = vadd.xlane.f32.xlu0 %v771_v4 }
 0x55c   :  { %802 = vadd.xlane.f32.xlu2 %v775_v55  ;;  %798 = vadd.xlane.f32.xlu1 %v773_v10 }
 0x55d   :  { %796 = vadd.xlane.f32.xlu0 %v772_v5 }
 0x564   :  { %804 = vadd.xlane.f32.xlu2 %v776_v26  ;;  %800 = vadd.xlane.f32.xlu1 %v774_v23 }
 0x565   :  { %884 = vmax.xlane.f32.xlu0 %v4114_v17 }
 0x56d   :  { %886 = vmax.xlane.f32.xlu0 %v4118_v29 }
 0x575   :  { %806 = vadd.xlane.f32.xlu0 %v777_v30 }
 0x57d   :  { %808 = vadd.xlane.f32.xlu0 %v778_v13 }
 0x5bf   :  { %v881_v18 = vpop.xlane.xlu2 %880  ;;  %v877_v32 = vpop.xlane.xlu1 %876 }
 0x5c0   :  { %v907_v33 = vsub.f32 %v859_v31, %v877_v32  ;;  %v875_v25 = vpop.xlane.xlu0 %874  ;;  %v909_v20 = vsub.f32 %v4096_v21, %v881_v18 }
 0x5c1   :  { %v906_v34 = vsub.f32 %v858_v59, %v875_v25 }
 0x5c2   :  { %v924_v35 = vmul.f32 1.442695, %v907_v33  ;;  %v928_v62 = vmul.f32 1.442695, %v909_v20 }
 0x5c3   :  { %v922_v36 = vmul.f32 1.442695, %v906_v34  ;;  %v779_v34 = vmul.f32 %v4041_v50, %v4076_v22 }
 0x5c4   :  { %3248 = vpow2.f32 %v924_v35 }
 0x5c5   :  { %3250 = vpow2.f32 %v922_v36 }
 0x5c7   :  { %v883_v38 = vpop.xlane.xlu2 %882  ;;  %v879_v43 = vpop.xlane.xlu1 %878 }
 0x5c8   :  { %v795_v15 = vpop.xlane.xlu0 %794  ;;  %v908_v19 = vsub.f32 %v860_v3, %v879_v43  ;;  %v910_v32 = vsub.f32 %v4100_v2, %v883_v38 }
 0x5c9   :  { %v833_v27 = vadd.f32 %v4090_v39, %v795_v15 }
 0x5ca   :  { %v3249_v54 = vpop.eup %3248  ;;  %v926_v58 = vmul.f32 1.442695, %v908_v19  ;;  %v930_v43 = vmul.f32 1.442695, %v910_v32 }
 0x5cb   :  { %v849_v44 = vmul.f32 0.2, %v833_v27  ;;  %v3251_v7 = vpop.eup %3250  ;;  %v4128_v46 = vmul.f32 %v3249_v54, %v3868_v45 }
 0x5cc   :  { %v4133_v53 = vmul.f32 %v3251_v7, %v3871_v47  ;;  %3252 = vpow2.f32 %v926_v58 }
 0x5cd   :  { %v4130_v52 = vmax.f32 %v833_v27, %v849_v44  ;;  %3254 = vpow2.f32 %v928_v62 }
 0x5ce   :  { %v1018_v56 = vpack.c.bf16 %v4128_v46, %v4133_v53 }
 0x5cf   :  { %888 = vmax.xlane.f32.xlu1 %v4130_v52  ;;  %v803_v31 = vpop.xlane.xlu2 %802  ;;  %v799_v59 = vpop.xlane.xlu1 %798 }
 0x5d0   :  { %v837_v63 = vadd.f32 %v4090_v39, %v803_v31  ;;  %v835_v21 = vadd.f32 %v4090_v39, %v799_v59  ;;  %v797_v0 = vpop.xlane.xlu0 %796  ;;  %1034 = vmatmul.bf16.vlgmr.msra.gmra.mxu0 %v1018_v56 }
 0x5d1   :  { %v834_v3 = vadd.f32 %v4090_v39, %v797_v0 }
 0x5d2   :  { %v851_v4 = vmul.f32 0.2, %v835_v21  ;;  %v853_v40 = vmul.f32 0.2, %v837_v63  ;;  %v3253_v6 = vpop.eup %3252 }
 0x5d3   :  { %v850_v55 = vmul.f32 0.2, %v834_v3  ;;  %v3255_v12 = vpop.eup %3254  ;;  %v4153_v18 = vmul.f32 %v3253_v6, %v3900_v11 }
 0x5d4   :  { %v4141_v10 = vmax.f32 %v835_v21, %v851_v4  ;;  %v4143_v5 = vmax.f32 %v837_v63, %v853_v40  ;;  %v957_v35 = vmul.f32 %v3255_v12, %v3903_v16  ;;  %v3005_v12 = vld [vmem:[%s4940_s3 + $0x70] sm:$0xff] }
 0x5d5   :  { %v4145_v9 = vmax.f32 %v834_v3, %v850_v55 }
 0x5d6   :  { %892 = vmax.xlane.f32.xlu2 %v4141_v10  ;;  %896 = vmax.xlane.f32.xlu0 %v4143_v5 }
 0x5d7   :  { %890 = vmax.xlane.f32.xlu1 %v4145_v9  ;;  %v801_v24 = vpop.xlane.xlu1 %800  ;;  %v805_v51 = vpop.xlane.xlu2 %804 }
 0x5d8   :  { %v836_v26 = vadd.f32 %v4090_v39, %v801_v24  ;;  %v885_v23 = vpop.xlane.xlu0 %884  ;;  %v838_v25 = vadd.f32 %v4090_v39, %v805_v51 }
 0x5d9   :  { %v911_v30 = vsub.f32 %v4114_v17, %v885_v23  ;;  %v1019_v17 = vpack.c.bf16 %v957_v35, %v4153_v18 }
 0x5da   :  { %v852_v13 = vmul.f32 0.2, %v836_v26  ;;  %v854_v27 = vmul.f32 0.2, %v838_v25 }
 0x5db   :  { %v932_v36 = vmul.f32 1.442695, %v911_v30 }
 0x5dc   :  { %v4156_v33 = vmax.f32 %v836_v26, %v852_v13  ;;  %v4164_v2 = vmax.f32 %v838_v25, %v854_v27 }
 0x5dd   :  { %3256 = vpow2.f32 %v932_v36 }
 0x5de   :  { %894 = vmax.xlane.f32.xlu2 %v4156_v33  ;;  %3258 = vpow2.f32 %v930_v43  ;;  %v3003_v43 = vld [vmem:[%s4940_s3 + $0x60] sm:$0xff] }
 0x5df   :  { %810 = vadd.xlane.f32.xlu1 %v779_v34 }
 0x5e0   :  { %v887_v15 = vpop.xlane.xlu0 %886  ;;  %1039 = vmatmul.bf16.gmra.mxu0 %v1019_v17 }
 0x5e1   :  { %v912_v62 = vsub.f32 %v4118_v29, %v887_v15 }
 0x5e3   :  { %v3257_v38 = vpop.eup %3256  ;;  %v934_v21 = vmul.f32 1.442695, %v912_v62 }
 0x5e4   :  { %v3259_v19 = vpop.eup %3258  ;;  %v4169_v44 = vmul.f32 %v3257_v38, %v3924_v48 }
 0x5e5   :  { %v958_v20 = vmul.f32 %v3259_v19, %v3927_v37  ;;  %3260 = vpow2.f32 %v934_v21 }
 0x5e7   :  { %898 = vmax.xlane.f32.xlu1 %v4164_v2  ;;  %v1020_v58 = vpack.c.bf16 %v4169_v44, %v958_v20 }
 0x5e8   :  { %v807_v50 = vpop.xlane.xlu0 %806 }
 0x5e9   :  { %v839_v22 = vadd.f32 %v4090_v39, %v807_v50 }
 0x5eb   :  { %v855_v54 = vmul.f32 0.2, %v839_v22  ;;  %v3261_v0 = vpop.eup %3260 }
 0x5ec   :  { %v960_v3 = vmul.f32 %v3261_v0, %v3947_v57 }
 0x5ed   :  { %v4171_v7 = vmax.f32 %v839_v22, %v855_v54 }
 0x5ef   :  { %900 = vmax.xlane.f32.xlu2 %v4171_v7 }
 0x5f0   :  { %v809_v31 = vpop.xlane.xlu0 %808  ;;  %1044 = vmatmul.bf16.gmra.mxu0 %v1020_v58 }
 0x5f1   :  { %v840_v59 = vadd.f32 %v4090_v39, %v809_v31  ;;  %v3001_v31 = vld [vmem:[%s4940_s3 + $0x50] sm:$0xff] }
 0x5f3   :  { %v856_v56 = vmul.f32 0.2, %v840_v59 }
 0x5f5   :  { %v4178_v63 = vmax.f32 %v840_v59, %v856_v56 }
 0x5f7   :  { %970 = vadd.xlane.f32.xlu2 %v4133_v53  ;;  %902 = vmax.xlane.f32.xlu0 %v4178_v63  ;;  %v3006_v53 = vld [vmem:[%s4940_s3 + $0x78] sm:$0xff] }
 0x5f8   :  { %1215 = vmatpush.bf16.msrb.mxu1 %v3006_v53 }
 0x5fc   :  { %1216 = vmatpush.bf16.msrb.mxu1 %v3005_v12 }
 0x5ff   :  { %976 = vadd.xlane.f32.xlu2 %v957_v35  ;;  %972 = vadd.xlane.f32.xlu0 %v4128_v46 }
 0x607   :  { %982 = vadd.xlane.f32.xlu2 %v960_v3  ;;  %978 = vadd.xlane.f32.xlu0 %v958_v20 }
 0x642   :  { %v889_v4 = vpop.xlane.xlu1 %888 }
 0x643   :  { %v913_v40 = vsub.f32 %v4130_v52, %v889_v4 }
 0x645   :  { %v936_v29 = vmul.f32 1.442695, %v913_v40 }
 0x647   :  { %3262 = vpow2.f32 %v936_v29 }
 0x649   :  { %v893_v55 = vpop.xlane.xlu2 %892  ;;  %v897_v27 = vpop.xlane.xlu0 %896 }
 0x64a   :  { %v915_v24 = vsub.f32 %v4141_v10, %v893_v55  ;;  %v891_v6 = vpop.xlane.xlu1 %890  ;;  %v3004_v10 = vld [vmem:[%s4940_s3 + $0x68] sm:$0xff]  ;;  %v917_v54 = vsub.f32 %v4143_v5, %v897_v27 }
 0x64b   :  { %v914_v46 = vsub.f32 %v4145_v9, %v891_v6  ;;  %1217 = vmatpush.bf16.msrb.mxu1 %v3004_v10 }
 0x64c   :  { %v940_v26 = vmul.f32 1.442695, %v915_v24  ;;  %v944_v56 = vmul.f32 1.442695, %v917_v54 }
 0x64d   :  { %v3263_v23 = vpop.eup %3262  ;;  %v938_v51 = vmul.f32 1.442695, %v914_v46 }
 0x64e   :  { %3264 = vpow2.f32 %v940_v26  ;;  %v961_v52 = vmul.f32 %v3263_v23, %v3955_v1  ;;  %v1035_v23 = vpop.f32.mrf.mxu0 }
 0x64f   :  { %3266 = vpow2.f32 %v938_v51  ;;  %1218 = vmatpush.bf16.msrb.mxu1 %v3003_v43  ;;  %v4229_v51 = vld [vmem:[#allocation5 + $0x1] ss:$0 sm:$0xff] }
 0x650   :  { %v1021_v30 = vpack.c.bf16 %v961_v52, %v960_v3  ;;  %984 = vadd.xlane.f32.xlu0 %v961_v52  ;;  %v2999_v3 = vld [vmem:[%s4940_s3 + $0x40] sm:$0xff] }
 0x651   :  { %v895_v13 = vpop.xlane.xlu2 %894 }
 0x652   :  { %v916_v9 = vsub.f32 %v4156_v33, %v895_v13  ;;  %v811_v32 = vpop.xlane.xlu1 %810  ;;  %1049 = vmatmul.bf16.gmra.mxu0 %v1021_v30 }
 0x653   :  { %v841_v25 = vadd.f32 %v4090_v39, %v811_v32  ;;  %v3002_v39 = vld [vmem:[%s4940_s3 + $0x58] sm:$0xff] }
 0x654   :  { %v3265_v34 = vpop.eup %3264  ;;  %v942_v35 = vmul.f32 1.442695, %v916_v9  ;;  %1219 = vmatpush.bf16.msrb.mxu1 %v3002_v39 }
 0x655   :  { %v963_v36 = vmul.f32 %v3265_v34, %v3965_v8  ;;  %v857_v17 = vmul.f32 0.2, %v841_v25  ;;  %v3267_v33 = vpop.eup %3266 }
 0x656   :  { %3268 = vpow2.f32 %v942_v35  ;;  %v962_v19 = vmul.f32 %v3267_v33, %v3981_v61  ;;  %v1037_v10 = vpop.f32.mrf.mxu0 }
 0x657   :  { %988 = vadd.xlane.f32.xlu2 %v963_v36  ;;  %v4203_v15 = vmax.f32 %v841_v25, %v857_v17 }
 0x658   :  { %1220 = vmatpush.bf16.msrb.mxu1 %v3001_v31  ;;  %v1022_v59 = vpack.c.bf16 %v963_v36, %v962_v19 }
 0x659   :  { %904 = vmax.xlane.f32.xlu1 %v4203_v15 }
 0x65a   :  { %v899_v38 = vpop.xlane.xlu1 %898 }
 0x65b   :  { %v918_v50 = vsub.f32 %v4164_v2, %v899_v38  ;;  %v3000_v2 = vld [vmem:[%s4940_s3 + $0x48] sm:$0xff] }
 0x65c   :  { %v3269_v22 = vpop.eup %3268  ;;  %1221 = vmatpush.bf16.msrb.mxu1 %v3000_v2 }
 0x65d   :  { %v946_v20 = vmul.f32 1.442695, %v918_v50  ;;  %v964_v58 = vmul.f32 %v3269_v22, %v3984_v28 }
 0x65e   :  { %v1040_v33 = vpop.f32.mrf.mxu0 }
 0x65f   :  { %3270 = vpow2.f32 %v946_v20  ;;  %990 = vadd.xlane.f32.xlu0 %v964_v58 }
 0x660   :  { %3272 = vpow2.f32 %v944_v56  ;;  %1222 = vmatpush.bf16.msrb.mxu1 %v2999_v3 }
 0x661   :  { %974 = vadd.xlane.f32.xlu1 %v4153_v18 }
 0x662   :  { %1054 = vmatmul.bf16.gmra.mxu0 %v1022_v59  ;;  %v901_v5 = vpop.xlane.xlu2 %900 }
 0x663   :  { %v919_v62 = vsub.f32 %v4171_v7, %v901_v5 }
 0x665   :  { %v3271_v21 = vpop.eup %3270  ;;  %v948_v0 = vmul.f32 1.442695, %v919_v62 }
 0x666   :  { %v966_v4 = vmul.f32 %v3271_v21, %v4003_v49  ;;  %v3273_v29 = vpop.eup %3272  ;;  %v1042_v39 = vpop.f32.mrf.mxu0 }
 0x667   :  { %3274 = vpow2.f32 %v948_v0  ;;  %v965_v24 = vmul.f32 %v3273_v29, %v4013_v41 }
 0x668   :  { %994 = vadd.xlane.f32.xlu2 %v966_v4 }
 0x669   :  { %980 = vadd.xlane.f32.xlu1 %v4169_v44  ;;  %v1023_v46 = vpack.c.bf16 %v965_v24, %v964_v58 }
 0x66a   :  { %v971_v18 = vpop.xlane.xlu2 %970  ;;  %v903_v40 = vpop.xlane.xlu0 %902 }
 0x66b   :  { %v1002_v55 = vmax.f32 %v971_v18, 1e-30  ;;  %v920_v53 = vsub.f32 %v4178_v63, %v903_v40 }
 0x66d   :  { %v3275_v7 = vpop.eup %3274  ;;  %3276 = vrcp.f32 %v1002_v55  ;;  %v950_v26 = vmul.f32 1.442695, %v920_v53 }
 0x66e   :  { %v967_v6 = vmul.f32 %v3275_v7, %v4011_v60  ;;  %v1045_v22 = vpop.f32.mrf.mxu0 }
 0x66f   :  { %3278 = vpow2.f32 %v950_v26 }
 0x670   :  { %996 = vadd.xlane.f32.xlu0 %v967_v6  ;;  %v1024_v35 = vpack.c.bf16 %v967_v6, %v966_v4 }
 0x671   :  { %986 = vadd.xlane.f32.xlu1 %v962_v19 }
 0x672   :  { %1059 = vmatmul.bf16.gmra.mxu0 %v1023_v46  ;;  %v973_v12 = vpop.xlane.xlu0 %972  ;;  %v977_v27 = vpop.xlane.xlu2 %976 }
 0x673   :  { %v1003_v44 = vmax.f32 %v973_v12, 1e-30  ;;  %v3277_v52 = vpop.eup %3276  ;;  %v1005_v38 = vmax.f32 %v977_v27, 1e-30 }
 0x674   :  { %v1091_v30 = vmul.f32 %v3277_v52, %v1035_v23 }
 0x675   :  { %3280 = vrcp.f32 %v1003_v44  ;;  %v3279_v63 = vpop.eup %3278 }
 0x676   :  { %v1110_v9 = vadd.f32 %v4229_v51, %v1091_v30  ;;  %v968_v34 = vmul.f32 %v3279_v63, %v4023_v14  ;;  %v1047_v56 = vpop.f32.mrf.mxu0 }
 0x678   :  { %3282 = vtanh.f32 %v1110_v9 }
 0x679   :  { %992 = vadd.xlane.f32.xlu1 %v965_v24 }
 0x67a   :  { %v979_v62 = vpop.xlane.xlu0 %978  ;;  %v983_v52 = vpop.xlane.xlu2 %982 }
 0x67b   :  { %v3281_v13 = vpop.eup %3280  ;;  %v1006_v0 = vmax.f32 %v979_v62, 1e-30 }
 0x67c   :  { %v1092_v32 = vmul.f32 %v3281_v13, %v1037_v10  ;;  %v1008_v10 = vmax.f32 %v983_v52, 1e-30 }
 0x67e   :  { %v1111_v25 = vadd.f32 %v4229_v51, %v1092_v32  ;;  %v3283_v36 = vpop.eup %3282 }
 0x680   :  { %3284 = vtanh.f32 %v1111_v25 }
 0x681   :  { %998 = vadd.xlane.f32.xlu1 %v968_v34  ;;  %3286 = vrcp.f32 %v1005_v38 }
 0x682   :  { %1064 = vmatmul.bf16.gmra.mxu0 %v1024_v35 }
 0x686   :  { %v3285_v17 = vpop.eup %3284 }
 0x687   :  { %v1159_v43 = vpack.c.bf16 %v3285_v17, %v3283_v36  ;;  %v3287_v31 = vpop.eup %3286 }
 0x688   :  { %v1094_v5 = vmul.f32 %v3287_v31, %v1042_v39 }
 0x689   :  { %1223 = vmatmul.bf16.vlgmr.msrb.gmra.mxu1 %v1159_v43 }
 0x68a   :  { %v1113_v18 = vadd.f32 %v4229_v51, %v1094_v5 }
 0x6c3   :  { %v985_v44 = vpop.xlane.xlu0 %984 }
 0x6c4   :  { %v1009_v63 = vmax.f32 %v985_v44, 1e-30 }
 0x6ca   :  { %v989_v27 = vpop.xlane.xlu2 %988 }
 0x6cc   :  { %v905_v50 = vpop.xlane.xlu1 %904 }
 0x6cd   :  { %v921_v19 = vsub.f32 %v4203_v15, %v905_v50 }
 0x6cf   :  { %v952_v54 = vmul.f32 1.442695, %v921_v19  ;;  %v1050_v29 = vpop.f32.mrf.mxu0  ;;  %v1011_v19 = vmax.f32 %v989_v27, 1e-30 }
 0x6d1   :  { %3288 = vpow2.f32 %v952_v54  ;;  %v4245_v54 = vld [vmem:[%s4942_s5 + $0x2] ss:$0 sm:$0xff] }
 0x6d4   :  { %v975_v20 = vpop.xlane.xlu1 %974 }
 0x6d5   :  { %v1004_v58 = vmax.f32 %v975_v20, 1e-30 }
 0x6d7   :  { %v3289_v59 = vpop.eup %3288  ;;  %3290 = vrcp.f32 %v1004_v58  ;;  %v1052_v26 = vpop.f32.mrf.mxu0 }
 0x6d8   :  { %v969_v2 = vmul.f32 %v3289_v59, %v4029_v42 }
 0x6da   :  { %1000 = vadd.xlane.f32.xlu2 %v969_v2  ;;  %v1025_v21 = vpack.c.bf16 %v969_v2, %v968_v34 }
 0x6dc   :  { %v981_v3 = vpop.xlane.xlu1 %980  ;;  %1069 = vmatmul.bf16.gmra.mxu0 %v1025_v21 }
 0x6dd   :  { %v3291_v4 = vpop.eup %3290  ;;  %v1007_v15 = vmax.f32 %v981_v3, 1e-30 }
 0x6de   :  { %v1093_v40 = vmul.f32 %v3291_v4, %v1040_v33  ;;  %v991_v4 = vpop.xlane.xlu0 %990 }
 0x6df   :  { %3292 = vrcp.f32 %v1007_v15  ;;  %v1055_v9 = vpop.f32.mrf.mxu0 }
 0x6e0   :  { %3294 = vrcp.f32 %v1006_v0  ;;  %v1112_v55 = vadd.f32 %v4229_v51, %v1093_v40 }
 0x6e1   :  { %3296 = vtanh.f32 %v1113_v18 }
 0x6e2   :  { %3298 = vtanh.f32 %v1112_v55 }
 0x6e4   :  { %v987_v36 = vpop.xlane.xlu1 %986 }
 0x6e5   :  { %v3293_v7 = vpop.eup %3292  ;;  %v1010_v39 = vmax.f32 %v987_v36, 1e-30 }
 0x6e6   :  { %v3295_v53 = vpop.eup %3294  ;;  %v1096_v46 = vmul.f32 %v3293_v7, %v1047_v56  ;;  %v997_v44 = vpop.xlane.xlu0 %996 }
 0x6e7   :  { %v3297_v24 = vpop.eup %3296  ;;  %v1095_v12 = vmul.f32 %v3295_v53, %v1045_v22  ;;  %v1057_v50 = vpop.f32.mrf.mxu0 }
 0x6e8   :  { %v3299_v6 = vpop.eup %3298  ;;  %v1115_v30 = vadd.f32 %v4229_v51, %v1096_v46 }
 0x6e9   :  { %v1160_v23 = vpack.c.bf16 %v3297_v24, %v3299_v6  ;;  %v1114_v13 = vadd.f32 %v4229_v51, %v1095_v12 }
 0x6ea   :  { %3300 = vtanh.f32 %v1115_v30 }
 0x6eb   :  { %1228 = vmatmul.bf16.gmra.mxu1 %v1160_v23  ;;  %3302 = vrcp.f32 %v1009_v63  ;;  %v995_v63 = vpop.xlane.xlu2 %994 }
 0x6ec   :  { %3304 = vtanh.f32 %v1114_v13  ;;  %v993_v3 = vpop.xlane.xlu1 %992 }
 0x6ed   :  { %3306 = vrcp.f32 %v1008_v10  ;;  %v1013_v18 = vmax.f32 %v993_v3, 1e-30  ;;  %v1015_v10 = vmax.f32 %v997_v44, 1e-30 }
 0x6ee   :  { %3308 = vrcp.f32 %v1010_v39 }
 0x6ef   :  { %v1060_v31 = vpop.f32.mrf.mxu0 }
 0x6f0   :  { %v3301_v32 = vpop.eup %3300 }
 0x6f1   :  { %v3303_v25 = vpop.eup %3302 }
 0x6f2   :  { %v3305_v34 = vpop.eup %3304  ;;  %v1098_v35 = vmul.f32 %v3303_v25, %v1052_v26 }
 0x6f3   :  { %v3307_v17 = vpop.eup %3306  ;;  %v1161_v43 = vpack.c.bf16 %v3301_v32, %v3305_v34  ;;  %v1014_v32 = vmax.f32 %v995_v63, 1e-30 }
 0x6f4   :  { %v1097_v33 = vmul.f32 %v3307_v17, %v1050_v29  ;;  %v1117_v38 = vadd.f32 %v4229_v51, %v1098_v35  ;;  %v3309_v20 = vpop.eup %3308  ;;  %v1012_v29 = vmax.f32 %v991_v4, 1e-30 }
 0x6f5   :  { %v1099_v2 = vmul.f32 %v3309_v20, %v1055_v9  ;;  %v999_v20 = vpop.xlane.xlu1 %998 }
 0x6f6   :  { %v1116_v22 = vadd.f32 %v4229_v51, %v1097_v33  ;;  %3310 = vtanh.f32 %v1117_v38 }
 0x6f7   :  { %v1118_v15 = vadd.f32 %v4229_v51, %v1099_v2  ;;  %v1062_v53 = vpop.f32.mrf.mxu0 }
 0x6f8   :  { %3312 = vtanh.f32 %v1116_v22 }
 0x6f9   :  { %3314 = vrcp.f32 %v1011_v19 }
 0x6fa   :  { %3316 = vtanh.f32 %v1118_v15 }
 0x6fb   :  { %1233 = vmatmul.bf16.gmra.mxu1 %v1161_v43  ;;  %3318 = vrcp.f32 %v1013_v18 }
 0x6fc   :  { %v3311_v58 = vpop.eup %3310 }
 0x6fe   :  { %v3313_v56 = vpop.eup %3312 }
 0x6ff   :  { %v3315_v62 = vpop.eup %3314  ;;  %v1162_v21 = vpack.c.bf16 %v3311_v58, %v3313_v56  ;;  %v1065_v30 = vpop.f32.mrf.mxu0  ;;  %v1016_v58 = vmax.f32 %v999_v20, 1e-30 }
 0x700   :  { %v1100_v0 = vmul.f32 %v3315_v62, %v1057_v50  ;;  %v3317_v24 = vpop.eup %3316 }
 0x701   :  { %v3319_v6 = vpop.eup %3318 }
 0x702   :  { %v1119_v40 = vadd.f32 %v4229_v51, %v1100_v0  ;;  %v1102_v26 = vmul.f32 %v3319_v6, %v1062_v53 }
 0x704   :  { %3320 = vtanh.f32 %v1119_v40  ;;  %v1121_v13 = vadd.f32 %v4229_v51, %v1102_v26 }
 0x705   :  { %3322 = vrcp.f32 %v1012_v29 }
 0x706   :  { %v4247_v59 = vpop.f32.mrf.mxu1  ;;  %3324 = vtanh.f32 %v1121_v13 }
 0x707   :  { %v1281_v5 = vmul.f32 %v4245_v54, %v4247_v59  ;;  %3326 = vrcp.f32 %v1015_v10  ;;  %v1067_v25 = vpop.f32.mrf.mxu0 }
 0x709   :  { %1297 = vadd.xlane.f32.xlu0 %v1281_v5 }
 0x70a   :  { %v3321_v46 = vpop.eup %3320 }
 0x70b   :  { %1238 = vmatmul.bf16.gmra.mxu1 %v1162_v21  ;;  %v3323_v23 = vpop.eup %3322  ;;  %v1163_v12 = vpack.c.bf16 %v3321_v46, %v3317_v24 }
 0x70c   :  { %v1101_v52 = vmul.f32 %v3323_v23, %v1060_v31  ;;  %v3325_v34 = vpop.eup %3324 }
 0x70d   :  { %v3327_v35 = vpop.eup %3326 }
 0x70e   :  { %v4253_v55 = vpop.f32.mrf.mxu1  ;;  %v1120_v9 = vadd.f32 %v4229_v51, %v1101_v52  ;;  %v1104_v17 = vmul.f32 %v3327_v35, %v1067_v25 }
 0x70f   :  { %v1282_v7 = vmul.f32 %v4245_v54, %v4253_v55 }
 0x710   :  { %3328 = vtanh.f32 %v1120_v9  ;;  %v1123_v27 = vadd.f32 %v4229_v51, %v1104_v17 }
 0x711   :  { %1299 = vadd.xlane.f32.xlu1 %v1282_v7  ;;  %3330 = vrcp.f32 %v1014_v32 }
 0x712   :  { %3332 = vtanh.f32 %v1123_v27 }
 0x716   :  { %v3329_v36 = vpop.eup %3328 }
 0x717   :  { %v3331_v43 = vpop.eup %3330  ;;  %v1164_v33 = vpack.c.bf16 %v3325_v34, %v3329_v36 }
 0x718   :  { %v1103_v39 = vmul.f32 %v3331_v43, %v1065_v30  ;;  %v3333_v50 = vpop.eup %3332 }
 0x71a   :  { %v1122_v38 = vadd.f32 %v4229_v51, %v1103_v39 }
 0x71b   :  { %1243 = vmatmul.bf16.gmra.mxu1 %v1163_v12 }
 0x71c   :  { %3334 = vtanh.f32 %v1122_v38  ;;  %v1264_v38 = vpack.c.bf16 %v4253_v55, %v4247_v59 }
 0x71d   :  { %3336 = vrcp.f32 %v1016_v58 }
 0x722   :  { %v3335_v22 = vpop.eup %3334 }
 0x723   :  { %v1165_v19 = vpack.c.bf16 %v3333_v50, %v3335_v22  ;;  %v3337_v5 = vpop.eup %3336  ;;  %v2842_v50 = vld [vmem:[%s4941_s4 + $0x2] sm:$0x1] }
 0x72b   :  { %1248 = vmatmul.bf16.gmra.mxu1 %v1164_v33 }
 0x73b   :  { %1253 = vmatmul.bf16.gmra.mxu1 %v1165_v19 }
 0x74d   :  { %v1001_v31 = vpop.xlane.xlu2 %1000 }
 0x74e   :  { %v1017_v56 = vmax.f32 %v1001_v31, 1e-30 }
 0x750   :  { %3338 = vrcp.f32 %v1017_v56 }
 0x756   :  { %v3339_v21 = vpop.eup %3338 }
 0x759   :  { %v1070_v2 = vpop.f32.mrf.mxu0 }
 0x75a   :  { %v1105_v62 = vmul.f32 %v3337_v5, %v1070_v2 }
 0x75c   :  { %v1124_v0 = vadd.f32 %v4229_v51, %v1105_v62 }
 0x75e   :  { %3340 = vtanh.f32 %v1124_v0 }
 0x761   :  { %v1072_v3 = vpop.f32.mrf.mxu0 }
 0x762   :  { %v1106_v4 = vmul.f32 %v3339_v21, %v1072_v3 }
 0x764   :  { %v1125_v15 = vadd.f32 %v4229_v51, %v1106_v4  ;;  %v3341_v29 = vpop.eup %3340 }
 0x766   :  { %3342 = vtanh.f32 %v1125_v15 }
 0x768   :  { %v1229_v18 = vpop.f32.mrf.mxu1 }
 0x769   :  { %v1283_v40 = vmul.f32 %v4245_v54, %v1229_v18 }
 0x76b   :  { %1301 = vadd.xlane.f32.xlu2 %v1283_v40 }
 0x76c   :  { %v3343_v7 = vpop.eup %3342 }
 0x76d   :  { %v1166_v53 = vpack.c.bf16 %v3343_v7, %v3341_v29 }
 0x76f   :  { %1258 = vmatmul.bf16.gmra.mxu1 %v1166_v53 }
 0x770   :  { %v1231_v24 = vpop.f32.mrf.mxu1 }
 0x771   :  { %v1284_v6 = vmul.f32 %v4245_v54, %v1231_v24  ;;  %v1265_v27 = vpack.c.bf16 %v1231_v24, %v1229_v18 }
 0x773   :  { %1303 = vadd.xlane.f32.xlu0 %v1284_v6 }
 0x778   :  { %v1234_v46 = vpop.f32.mrf.mxu1 }
 0x779   :  { %v1285_v26 = vmul.f32 %v4245_v54, %v1234_v46 }
 0x77b   :  { %1305 = vadd.xlane.f32.xlu1 %v1285_v26 }
 0x77c   :  { %v1298_v22 = vpop.xlane.xlu0 %1297 }
 0x780   :  { %v1236_v23 = vpop.f32.mrf.mxu1 }
 0x781   :  { %v1286_v51 = vmul.f32 %v4245_v54, %v1236_v23  ;;  %v1266_v39 = vpack.c.bf16 %v1236_v23, %v1234_v46 }
 0x783   :  { %1307 = vadd.xlane.f32.xlu2 %v1286_v51 }
 0x784   :  { %v1300_v19 = vpop.xlane.xlu1 %1299 }
 0x788   :  { %v1239_v12 = vpop.f32.mrf.mxu1 }
 0x789   :  { %v1287_v44 = vmul.f32 %v4245_v54, %v1239_v12 }
 0x78b   :  { %1309 = vadd.xlane.f32.xlu2 %v1287_v44 }
 0x790   :  { %v1241_v52 = vpop.f32.mrf.mxu1 }
 0x791   :  { %v1267_v33 = vpack.c.bf16 %v1241_v52, %v1239_v12  ;;  %v1288_v46 = vmul.f32 %v4245_v54, %v1241_v52 }
 0x798   :  { %v4268_v30 = vpop.f32.mrf.mxu1 }
 0x799   :  { %v1289_v12 = vmul.f32 %v4245_v54, %v4268_v30 }
 0x7a0   :  { %v4270_v63 = vpop.f32.mrf.mxu1 }
 0x7a1   :  { %v1268_v43 = vpack.c.bf16 %v4270_v63, %v4268_v30  ;;  %v1290_v51 = vmul.f32 %v4245_v54, %v4270_v63 }
 0x7a8   :  { %v4272_v13 = vpop.f32.mrf.mxu1 }
 0x7b0   :  { %v1251_v10 = vpop.f32.mrf.mxu1 }
 0x7b1   :  { %v1269_v17 = vpack.c.bf16 %v1251_v10, %v4272_v13  ;;  %v1292_v23 = vmul.f32 %v4245_v54, %v1251_v10 }
 0x7b8   :  { %v4274_v9 = vpop.f32.mrf.mxu1 }
 0x7c0   :  { %v4276_v32 = vpop.f32.mrf.mxu1 }
 0x7c1   :  { %v1270_v36 = vpack.c.bf16 %v4276_v32, %v4274_v9 }
 0x7de   :  { %v1302_v0 = vpop.xlane.xlu2 %1301 }
 0x7e6   :  { %v1304_v31 = vpop.xlane.xlu0 %1303 }
 0x7ec   :  { %v4278_v25 = vpop.f32.mrf.mxu1 }
 0x7ee   :  { %v1306_v2 = vpop.xlane.xlu1 %1305 }
 0x7f4   :  { %v4280_v34 = vpop.f32.mrf.mxu1 }
 0x7f5   :  { %v1271_v35 = vpack.c.bf16 %v4280_v34, %v4278_v25 }
 0x7f6   :  { %v1308_v26 = vpop.xlane.xlu2 %1307 }
 0x7f7   :  { %1329 = vmatpush.bf16.xpose.msrb.mxu2 %v1271_v35  ;;  %1543 = vmatpush.bf16.msrb.mxu3 %v1271_v35 }
 0x7fb   :  { %1544 = vmatpush.bf16.msrb.mxu3 %v1270_v36 }
 0x7fe   :  { %v1310_v52 = vpop.xlane.xlu2 %1309 }
 0x7ff   :  { %1330 = vmatpush.bf16.xpose.msrb.mxu2 %v1270_v36  ;;  %1545 = vmatpush.bf16.msrb.mxu3 %v1269_v17  ;;  %v1293_v36 = vmul.f32 %v4245_v54, %v4274_v9 }
 0x803   :  { %1546 = vmatpush.bf16.msrb.mxu3 %v1268_v43 }
 0x807   :  { %1331 = vmatpush.bf16.xpose.msrb.mxu2 %v1269_v17  ;;  %1547 = vmatpush.bf16.msrb.mxu3 %v1267_v33  ;;  %v1291_v17 = vmul.f32 %v4245_v54, %v4272_v13  ;;  %v1295_v13 = vmul.f32 %v4245_v54, %v4278_v25 }
 0x80b   :  { %1548 = vmatpush.bf16.msrb.mxu3 %v1266_v39 }
 0x80f   :  { %1332 = vmatpush.bf16.xpose.msrb.mxu2 %v1268_v43  ;;  %1549 = vmatpush.bf16.msrb.mxu3 %v1265_v27 }
 0x813   :  { %1550 = vmatpush.bf16.msrb.mxu3 %v1264_v38 }
 0x817   :  { %1333 = vmatpush.bf16.xpose.msrb.mxu2 %v1267_v33  ;;  %v1294_v33 = vmul.f32 %v4245_v54, %v4276_v32 }
 0x81f   :  { %1334 = vmatpush.bf16.xpose.msrb.mxu2 %v1266_v39 }
 0x827   :  { %1335 = vmatpush.bf16.xpose.msrb.mxu2 %v1265_v27 }
 0x82f   :  { %1336 = vmatpush.bf16.xpose.msrb.mxu2 %v1264_v38 }
 0x836   :  { %1337 = vmatmul.bf16.vlgmr.msrb.gmra.mxu2 %v2842_v50 }
 0x8b9   :  { %v1338_v20 = vpop.f32.mrf.mxu2 }
 0x8ba   :  { %v4294_v58 = vperm.slane %v1338_v20, 0 }
 0x8bc   :  { %v1346_v56 = vadd.f32 %v4294_v58, %v1304_v31  ;;  %v1344_v59 = vadd.f32 %v4294_v58, %v1300_v19  ;;  %v1343_v55 = vadd.f32 %v4294_v58, %v1298_v22  ;;  %v1347_v3 = vadd.f32 %v4294_v58, %v1306_v2 }
 0x8bd   :  { %v1345_v40 = vadd.f32 %v4294_v58, %v1302_v0  ;;  %v1348_v44 = vadd.f32 %v4294_v58, %v1308_v26  ;;  %v1349_v63 = vadd.f32 %v4294_v58, %v1310_v52 }
 0x8be   :  { %v1362_v5 = vmul.f32 0.2, %v1346_v56  ;;  %v1360_v62 = vmul.f32 0.2, %v1344_v59  ;;  %v1359_v21 = vmul.f32 0.2, %v1343_v55 }
 0x8bf   :  { %v1363_v7 = vmul.f32 0.2, %v1347_v3  ;;  %v1361_v53 = vmul.f32 0.2, %v1345_v40  ;;  %v1364_v35 = vmul.f32 0.2, %v1348_v44 }
 0x8c0   :  { %v4300_v4 = vmax.f32 %v1346_v56, %v1362_v5  ;;  %v1376_v15 = vmax.f32 %v1344_v59, %v1360_v62  ;;  %v1375_v18 = vmax.f32 %v1343_v55, %v1359_v21  ;;  %v1365_v30 = vmul.f32 0.2, %v1349_v63 }
 0x8c1   :  { %v1340_v29 = vpop.f32.mrf.mxu2  ;;  %v4304_v24 = vmax.f32 %v1347_v3, %v1363_v7  ;;  %v1377_v6 = vmax.f32 %v1345_v40, %v1361_v53  ;;  %v4318_v10 = vmax.f32 %v1348_v44, %v1364_v35 }
 0x8c2   :  { %1397 = vmax.xlane.f32.xlu2 %v4300_v4  ;;  %1393 = vmax.xlane.f32.xlu1 %v1376_v15  ;;  %v4322_v43 = vmax.f32 %v1349_v63, %v1365_v30 }
 0x8c3   :  { %1391 = vmax.xlane.f32.xlu0 %v1375_v18 }
 0x8ca   :  { %1399 = vmax.xlane.f32.xlu2 %v4304_v24  ;;  %1395 = vmax.xlane.f32.xlu1 %v1377_v6 }
 0x8cb   :  { %1311 = vadd.xlane.f32.xlu0 %v1288_v46 }
 0x8d2   :  { %1319 = vadd.xlane.f32.xlu2 %v1292_v23  ;;  %1315 = vadd.xlane.f32.xlu1 %v1290_v51 }
 0x8d3   :  { %1313 = vadd.xlane.f32.xlu0 %v1289_v12 }
 0x8da   :  { %1321 = vadd.xlane.f32.xlu2 %v1293_v36  ;;  %1317 = vadd.xlane.f32.xlu1 %v1291_v17 }
 0x8db   :  { %1401 = vmax.xlane.f32.xlu0 %v4318_v10 }
 0x8e3   :  { %1403 = vmax.xlane.f32.xlu0 %v4322_v43 }
 0x8eb   :  { %1323 = vadd.xlane.f32.xlu0 %v1294_v33 }
 0x8f3   :  { %1325 = vadd.xlane.f32.xlu0 %v1295_v13 }
 0x935   :  { %v1398_v9 = vpop.xlane.xlu2 %1397  ;;  %v1394_v39 = vpop.xlane.xlu1 %1393 }
 0x936   :  { %v1424_v27 = vsub.f32 %v1376_v15, %v1394_v39  ;;  %v1392_v38 = vpop.xlane.xlu0 %1391  ;;  %v1426_v25 = vsub.f32 %v4300_v4, %v1398_v9 }
 0x937   :  { %v1423_v50 = vsub.f32 %v1375_v18, %v1392_v38 }
 0x938   :  { %v1441_v22 = vmul.f32 1.442695, %v1424_v27  ;;  %v1445_v29 = vmul.f32 1.442695, %v1426_v25 }
 0x939   :  { %v1439_v19 = vmul.f32 1.442695, %v1423_v50  ;;  %v1296_v50 = vmul.f32 %v4245_v54, %v4280_v34 }
 0x93a   :  { %3344 = vpow2.f32 %v1441_v22 }
 0x93b   :  { %3346 = vpow2.f32 %v1439_v19 }
 0x93d   :  { %v1400_v20 = vpop.xlane.xlu2 %1399  ;;  %v1396_v31 = vpop.xlane.xlu1 %1395 }
 0x93e   :  { %v1312_v56 = vpop.xlane.xlu0 %1311  ;;  %v1425_v32 = vsub.f32 %v1377_v6, %v1396_v31  ;;  %v1427_v39 = vsub.f32 %v4304_v24, %v1400_v20 }
 0x93f   :  { %v1350_v59 = vadd.f32 %v4294_v58, %v1312_v56 }
 0x940   :  { %v3345_v55 = vpop.eup %3344  ;;  %v1443_v3 = vmul.f32 1.442695, %v1425_v32  ;;  %v1447_v31 = vmul.f32 1.442695, %v1427_v39 }
 0x941   :  { %v1366_v2 = vmul.f32 0.2, %v1350_v59  ;;  %v3347_v5 = vpop.eup %3346  ;;  %v4332_v62 = vmul.f32 %v3345_v55, %v3868_v45 }
 0x942   :  { %v4337_v0 = vmul.f32 %v3347_v5, %v3871_v47  ;;  %3348 = vpow2.f32 %v1443_v3 }
 0x943   :  { %v4334_v21 = vmax.f32 %v1350_v59, %v1366_v2  ;;  %3350 = vpow2.f32 %v1445_v29 }
 0x944   :  { %v1535_v40 = vpack.c.bf16 %v4332_v62, %v4337_v0 }
 0x945   :  { %1405 = vmax.xlane.f32.xlu1 %v4334_v21  ;;  %v1320_v15 = vpop.xlane.xlu2 %1319  ;;  %v1316_v18 = vpop.xlane.xlu1 %1315 }
 0x946   :  { %v1354_v7 = vadd.f32 %v4294_v58, %v1320_v15  ;;  %v1352_v4 = vadd.f32 %v4294_v58, %v1316_v18  ;;  %v1314_v53 = vpop.xlane.xlu0 %1313  ;;  %1551 = vmatmul.bf16.vlgmr.msrb.gmra.mxu3 %v1535_v40 }
 0x947   :  { %v1351_v6 = vadd.f32 %v4294_v58, %v1314_v53 }
 0x948   :  { %v1370_v46 = vmul.f32 0.2, %v1354_v7  ;;  %v1368_v26 = vmul.f32 0.2, %v1352_v4  ;;  %v3349_v52 = vpop.eup %3348 }
 0x949   :  { %v1367_v23 = vmul.f32 0.2, %v1351_v6  ;;  %v3351_v63 = vpop.eup %3350  ;;  %v4357_v9 = vmul.f32 %v3349_v52, %v3900_v11 }
 0x94a   :  { %v4345_v51 = vmax.f32 %v1352_v4, %v1368_v26  ;;  %v4347_v12 = vmax.f32 %v1354_v7, %v1370_v46  ;;  %v1474_v22 = vmul.f32 %v3351_v63, %v3903_v16  ;;  %v3013_v63 = vld [vmem:[%s4940_s3 + $0xb0] sm:$0xff] }
 0x94b   :  { %v4349_v44 = vmax.f32 %v1351_v6, %v1367_v23 }
 0x94c   :  { %1409 = vmax.xlane.f32.xlu2 %v4345_v51  ;;  %1413 = vmax.xlane.f32.xlu0 %v4347_v12 }
 0x94d   :  { %1407 = vmax.xlane.f32.xlu1 %v4349_v44  ;;  %v1318_v35 = vpop.xlane.xlu1 %1317  ;;  %v1322_v30 = vpop.xlane.xlu2 %1321 }
 0x94e   :  { %v1353_v36 = vadd.f32 %v4294_v58, %v1318_v35  ;;  %v1402_v17 = vpop.xlane.xlu0 %1401  ;;  %v1355_v38 = vadd.f32 %v4294_v58, %v1322_v30 }
 0x94f   :  { %v1428_v13 = vsub.f32 %v4318_v10, %v1402_v17  ;;  %v1536_v10 = vpack.c.bf16 %v1474_v22, %v4357_v9 }
 0x950   :  { %v1369_v33 = vmul.f32 0.2, %v1353_v36  ;;  %v1371_v59 = vmul.f32 0.2, %v1355_v38 }
 0x951   :  { %v1449_v19 = vmul.f32 1.442695, %v1428_v13 }
 0x952   :  { %v4360_v27 = vmax.f32 %v1353_v36, %v1369_v33  ;;  %v4368_v24 = vmax.f32 %v1355_v38, %v1371_v59 }
 0x953   :  { %3352 = vpow2.f32 %v1449_v19 }
 0x954   :  { %1411 = vmax.xlane.f32.xlu2 %v4360_v27  ;;  %3354 = vpow2.f32 %v1447_v31  ;;  %v3011_v31 = vld [vmem:[%s4940_s3 + $0xa0] sm:$0xff] }
 0x955   :  { %1327 = vadd.xlane.f32.xlu1 %v1296_v50 }
 0x956   :  { %v1404_v56 = vpop.xlane.xlu0 %1403  ;;  %1556 = vmatmul.bf16.gmra.mxu3 %v1536_v10 }
 0x957   :  { %v1429_v29 = vsub.f32 %v4322_v43, %v1404_v56 }
 0x959   :  { %v3353_v20 = vpop.eup %3352  ;;  %v1451_v4 = vmul.f32 1.442695, %v1429_v29 }
 0x95a   :  { %v3355_v32 = vpop.eup %3354  ;;  %v4373_v2 = vmul.f32 %v3353_v20, %v3924_v48 }
 0x95b   :  { %v1475_v25 = vmul.f32 %v3355_v32, %v3927_v37  ;;  %3356 = vpow2.f32 %v1451_v4 }
 0x95d   :  { %1415 = vmax.xlane.f32.xlu1 %v4368_v24  ;;  %v1537_v3 = vpack.c.bf16 %v4373_v2, %v1475_v25 }
 0x95e   :  { %v1324_v54 = vpop.xlane.xlu0 %1323 }
 0x95f   :  { %v1356_v34 = vadd.f32 %v4294_v58, %v1324_v54 }
 0x961   :  { %v1372_v55 = vmul.f32 0.2, %v1356_v34  ;;  %v3357_v53 = vpop.eup %3356 }
 0x962   :  { %v1477_v6 = vmul.f32 %v3357_v53, %v3947_v57 }
 0x963   :  { %v4375_v5 = vmax.f32 %v1356_v34, %v1372_v55 }
 0x965   :  { %1417 = vmax.xlane.f32.xlu2 %v4375_v5 }
 0x966   :  { %v1326_v15 = vpop.xlane.xlu0 %1325  ;;  %1561 = vmatmul.bf16.gmra.mxu3 %v1537_v3 }
 0x967   :  { %v1357_v18 = vadd.f32 %v4294_v58, %v1326_v15  ;;  %v3009_v15 = vld [vmem:[%s4940_s3 + $0x90] sm:$0xff] }
 0x969   :  { %v1373_v40 = vmul.f32 0.2, %v1357_v18 }
 0x96b   :  { %v4382_v7 = vmax.f32 %v1357_v18, %v1373_v40 }
 0x96d   :  { %1487 = vadd.xlane.f32.xlu2 %v4337_v0  ;;  %1419 = vmax.xlane.f32.xlu0 %v4382_v7  ;;  %v3014_v0 = vld [vmem:[%s4940_s3 + $0xb8] sm:$0xff] }
 0x96e   :  { %1732 = vmatpush.bf16.msra.mxu2 %v3014_v0 }
 0x972   :  { %1733 = vmatpush.bf16.msra.mxu2 %v3013_v63 }
 0x975   :  { %1493 = vadd.xlane.f32.xlu2 %v1474_v22  ;;  %1489 = vadd.xlane.f32.xlu0 %v4332_v62 }
 0x97d   :  { %1499 = vadd.xlane.f32.xlu2 %v1477_v6  ;;  %1495 = vadd.xlane.f32.xlu0 %v1475_v25 }
 0x9b8   :  { %v1406_v46 = vpop.xlane.xlu1 %1405 }
 0x9b9   :  { %v1430_v26 = vsub.f32 %v4334_v21, %v1406_v46 }
 0x9bb   :  { %v1453_v43 = vmul.f32 1.442695, %v1430_v26 }
 0x9bd   :  { %3358 = vpow2.f32 %v1453_v43 }
 0x9bf   :  { %v1410_v23 = vpop.xlane.xlu2 %1409  ;;  %v1414_v59 = vpop.xlane.xlu0 %1413 }
 0x9c0   :  { %v1432_v35 = vsub.f32 %v4345_v51, %v1410_v23  ;;  %v1408_v52 = vpop.xlane.xlu1 %1407  ;;  %v3012_v51 = vld [vmem:[%s4940_s3 + $0xa8] sm:$0xff]  ;;  %v1434_v55 = vsub.f32 %v4347_v12, %v1414_v59 }
 0x9c1   :  { %v1431_v62 = vsub.f32 %v4349_v44, %v1408_v52  ;;  %1734 = vmatpush.bf16.msra.mxu2 %v3012_v51 }
 0x9c2   :  { %v1457_v36 = vmul.f32 1.442695, %v1432_v35  ;;  %v1461_v40 = vmul.f32 1.442695, %v1434_v55 }
 0x9c3   :  { %v3359_v17 = vpop.eup %3358  ;;  %v1455_v30 = vmul.f32 1.442695, %v1431_v62 }
 0x9c4   :  { %3360 = vpow2.f32 %v1457_v36  ;;  %v1478_v21 = vmul.f32 %v3359_v17, %v3955_v1 }
 0x9c5   :  { %3362 = vpow2.f32 %v1455_v30  ;;  %1735 = vmatpush.bf16.msra.mxu2 %v3011_v31  ;;  %v4433_v30 = vld [vmem:[#allocation5 + $0x2] ss:$0 sm:$0xff] }
 0x9c6   :  { %1501 = vadd.xlane.f32.xlu0 %v1478_v21  ;;  %v1538_v33 = vpack.c.bf16 %v1478_v21, %v1477_v6  ;;  %v3007_v6 = vld [vmem:[%s4940_s3 + $0x80] sm:$0xff] }
 0x9c7   :  { %v1412_v13 = vpop.xlane.xlu2 %1411 }
 0x9c8   :  { %v1433_v44 = vsub.f32 %v4360_v27, %v1412_v13  ;;  %v1328_v39 = vpop.xlane.xlu1 %1327  ;;  %1566 = vmatmul.bf16.gmra.mxu3 %v1538_v33 }
 0x9c9   :  { %v1358_v38 = vadd.f32 %v4294_v58, %v1328_v39  ;;  %v3010_v58 = vld [vmem:[%s4940_s3 + $0x98] sm:$0xff]  ;;  %v1552_v17 = vpop.f32.mrf.mxu3 }
 0x9ca   :  { %v3361_v50 = vpop.eup %3360  ;;  %v1459_v22 = vmul.f32 1.442695, %v1433_v44  ;;  %1736 = vmatpush.bf16.msra.mxu2 %v3010_v58 }
 0x9cb   :  { %v1374_v19 = vmul.f32 0.2, %v1358_v38  ;;  %v1480_v10 = vmul.f32 %v3361_v50, %v3965_v8  ;;  %v3363_v27 = vpop.eup %3362 }
 0x9cc   :  { %3364 = vpow2.f32 %v1459_v22  ;;  %v1479_v32 = vmul.f32 %v3363_v27, %v3981_v61 }
 0x9cd   :  { %1505 = vadd.xlane.f32.xlu2 %v1480_v10  ;;  %v4407_v56 = vmax.f32 %v1358_v38, %v1374_v19 }
 0x9ce   :  { %1737 = vmatpush.bf16.msra.mxu2 %v3009_v15  ;;  %v1539_v18 = vpack.c.bf16 %v1480_v10, %v1479_v32 }
 0x9cf   :  { %1421 = vmax.xlane.f32.xlu1 %v4407_v56 }
 0x9d0   :  { %v1416_v20 = vpop.xlane.xlu1 %1415 }
 0x9d1   :  { %v1435_v54 = vsub.f32 %v4368_v24, %v1416_v20  ;;  %v3008_v24 = vld [vmem:[%s4940_s3 + $0x88] sm:$0xff]  ;;  %v1554_v51 = vpop.f32.mrf.mxu3 }
 0x9d2   :  { %v3365_v34 = vpop.eup %3364  ;;  %1738 = vmatpush.bf16.msra.mxu2 %v3008_v24 }
 0x9d3   :  { %v1463_v25 = vmul.f32 1.442695, %v1435_v54  ;;  %v1481_v3 = vmul.f32 %v3365_v34, %v3984_v28 }
 0x9d5   :  { %3366 = vpow2.f32 %v1463_v25  ;;  %1507 = vadd.xlane.f32.xlu0 %v1481_v3 }
 0x9d6   :  { %3368 = vpow2.f32 %v1461_v40  ;;  %1739 = vmatpush.bf16.msra.mxu2 %v3007_v6 }
 0x9d7   :  { %1491 = vadd.xlane.f32.xlu1 %v4357_v9 }
 0x9d8   :  { %1571 = vmatmul.bf16.gmra.mxu3 %v1539_v18  ;;  %v1418_v12 = vpop.xlane.xlu2 %1417 }
 0x9d9   :  { %v1436_v29 = vsub.f32 %v4375_v5, %v1418_v12  ;;  %v1557_v27 = vpop.f32.mrf.mxu3 }
 0x9db   :  { %v3367_v4 = vpop.eup %3366  ;;  %v1465_v53 = vmul.f32 1.442695, %v1436_v29 }
 0x9dc   :  { %v1483_v46 = vmul.f32 %v3367_v4, %v4003_v49  ;;  %v3369_v43 = vpop.eup %3368 }
 0x9dd   :  { %3370 = vpow2.f32 %v1465_v53  ;;  %v1482_v35 = vmul.f32 %v3369_v43, %v4013_v41 }
 0x9de   :  { %1511 = vadd.xlane.f32.xlu2 %v1483_v46 }
 0x9df   :  { %1497 = vadd.xlane.f32.xlu1 %v4373_v2  ;;  %v1540_v62 = vpack.c.bf16 %v1482_v35, %v1481_v3 }
 0x9e0   :  { %v1488_v9 = vpop.xlane.xlu2 %1487  ;;  %v1420_v26 = vpop.xlane.xlu0 %1419 }
 0x9e1   :  { %v1519_v23 = vmax.f32 %v1488_v9, 1e-30  ;;  %v1437_v0 = vsub.f32 %v4382_v7, %v1420_v26  ;;  %v1559_v58 = vpop.f32.mrf.mxu3 }
 0x9e3   :  { %v3371_v5 = vpop.eup %3370  ;;  %3372 = vrcp.f32 %v1519_v23  ;;  %v1467_v36 = vmul.f32 1.442695, %v1437_v0 }
 0x9e4   :  { %v1484_v52 = vmul.f32 %v3371_v5, %v4011_v60 }
 0x9e5   :  { %3374 = vpow2.f32 %v1467_v36 }
 0x9e6   :  { %1513 = vadd.xlane.f32.xlu0 %v1484_v52  ;;  %v1541_v22 = vpack.c.bf16 %v1484_v52, %v1483_v46 }
 0x9e7   :  { %1503 = vadd.xlane.f32.xlu1 %v1479_v32 }
 0x9e8   :  { %1576 = vmatmul.bf16.gmra.mxu3 %v1540_v62  ;;  %v1490_v63 = vpop.xlane.xlu0 %1489  ;;  %v1494_v59 = vpop.xlane.xlu2 %1493 }
 0x9e9   :  { %v1520_v2 = vmax.f32 %v1490_v63, 1e-30  ;;  %v3373_v21 = vpop.eup %3372  ;;  %v1522_v20 = vmax.f32 %v1494_v59, 1e-30  ;;  %v1562_v32 = vpop.f32.mrf.mxu3 }
 0x9ea   :  { %v1608_v33 = vmul.f32 %v3373_v21, %v1552_v17 }
 0x9eb   :  { %3376 = vrcp.f32 %v1520_v2  ;;  %v3375_v7 = vpop.eup %3374 }
 0x9ec   :  { %v1627_v44 = vadd.f32 %v4433_v30, %v1608_v33  ;;  %v1485_v50 = vmul.f32 %v3375_v7, %v4023_v14 }
 0x9ee   :  { %3378 = vtanh.f32 %v1627_v44 }
 0x9ef   :  { %1509 = vadd.xlane.f32.xlu1 %v1482_v35 }
 0x9f0   :  { %v1496_v29 = vpop.xlane.xlu0 %1495  ;;  %v1500_v21 = vpop.xlane.xlu2 %1499 }
 0x9f1   :  { %v3377_v13 = vpop.eup %3376  ;;  %v1564_v40 = vpop.f32.mrf.mxu3 }
 0x9f2   :  { %v1609_v39 = vmul.f32 %v3377_v13, %v1554_v51  ;;  %v1525_v51 = vmax.f32 %v1500_v21, 1e-30 }
 0x9f4   :  { %v1628_v38 = vadd.f32 %v4433_v30, %v1609_v39  ;;  %v3379_v19 = vpop.eup %3378 }
 0x9f6   :  { %3380 = vtanh.f32 %v1628_v38 }
 0x9f7   :  { %1515 = vadd.xlane.f32.xlu1 %v1485_v50  ;;  %3382 = vrcp.f32 %v1522_v20 }
 0x9f8   :  { %1581 = vmatmul.bf16.gmra.mxu3 %v1541_v22 }
 0x9fc   :  { %v3381_v10 = vpop.eup %3380 }
 0x9fd   :  { %v1676_v31 = vpack.c.bf16 %v3381_v10, %v3379_v19  ;;  %v3383_v15 = vpop.eup %3382 }
 0x9fe   :  { %v1611_v12 = vmul.f32 %v3383_v15, %v1559_v58 }
 0x9ff   :  { %1740 = vmatmul.bf16.vlgmr.msra.gmra.mxu2 %v1676_v31 }
 0xa00   :  { %v1630_v26 = vadd.f32 %v4433_v30, %v1611_v12 }
 0xa39   :  { %v1502_v2 = vpop.xlane.xlu0 %1501 }
 0xa3a   :  { %v1526_v7 = vmax.f32 %v1502_v2, 1e-30 }
 0xa42   :  { %v1422_v54 = vpop.xlane.xlu1 %1421 }
 0xa43   :  { %v1438_v34 = vsub.f32 %v4407_v56, %v1422_v54  ;;  %v1523_v56 = vmax.f32 %v1496_v29, 1e-30  ;;  %v4449_v29 = vld [vmem:[%s4942_s5 + $0x3] ss:$0 sm:$0xff] }
 0xa45   :  { %v1469_v55 = vmul.f32 1.442695, %v1438_v34 }
 0xa47   :  { %3384 = vpow2.f32 %v1469_v55 }
 0xa4a   :  { %v1492_v25 = vpop.xlane.xlu1 %1491 }
 0xa4b   :  { %v1521_v3 = vmax.f32 %v1492_v25, 1e-30  ;;  %v1567_v43 = vpop.f32.mrf.mxu3 }
 0xa4d   :  { %v3385_v18 = vpop.eup %3384  ;;  %3386 = vrcp.f32 %v1521_v3 }
 0xa4e   :  { %v1486_v24 = vmul.f32 %v3385_v18, %v4029_v42 }
 0xa50   :  { %1517 = vadd.xlane.f32.xlu2 %v1486_v24  ;;  %v1542_v4 = vpack.c.bf16 %v1486_v24, %v1485_v50 }
 0xa52   :  { %v1498_v53 = vpop.xlane.xlu1 %1497  ;;  %1586 = vmatmul.bf16.gmra.mxu3 %v1542_v4 }
 0xa53   :  { %v3387_v6 = vpop.eup %3386  ;;  %v1524_v46 = vmax.f32 %v1498_v53, 1e-30  ;;  %v1569_v36 = vpop.f32.mrf.mxu3 }
 0xa54   :  { %v1610_v9 = vmul.f32 %v3387_v6, %v1557_v27  ;;  %v1506_v27 = vpop.xlane.xlu2 %1505  ;;  %v1508_v6 = vpop.xlane.xlu0 %1507 }
 0xa55   :  { %3388 = vrcp.f32 %v1524_v46  ;;  %v1528_v54 = vmax.f32 %v1506_v27, 1e-30 }
 0xa56   :  { %v1629_v23 = vadd.f32 %v4433_v30, %v1610_v9  ;;  %3390 = vrcp.f32 %v1523_v56 }
 0xa57   :  { %3392 = vtanh.f32 %v1630_v26 }
 0xa58   :  { %3394 = vtanh.f32 %v1629_v23 }
 0xa5a   :  { %v1504_v50 = vpop.xlane.xlu1 %1503 }
 0xa5b   :  { %v3389_v5 = vpop.eup %3388  ;;  %v1572_v44 = vpop.f32.mrf.mxu3  ;;  %v1527_v59 = vmax.f32 %v1504_v50, 1e-30 }
 0xa5c   :  { %v3391_v0 = vpop.eup %3390  ;;  %v1613_v62 = vmul.f32 %v3389_v5, %v1564_v40  ;;  %v1514_v2 = vpop.xlane.xlu0 %1513 }
 0xa5d   :  { %v3393_v35 = vpop.eup %3392  ;;  %v1612_v63 = vmul.f32 %v3391_v0, %v1562_v32 }
 0xa5e   :  { %v3395_v52 = vpop.eup %3394  ;;  %v1632_v33 = vadd.f32 %v4433_v30, %v1613_v62 }
 0xa5f   :  { %v1677_v17 = vpack.c.bf16 %v3393_v35, %v3395_v52  ;;  %v1631_v13 = vadd.f32 %v4433_v30, %v1612_v63 }
 0xa60   :  { %3396 = vtanh.f32 %v1632_v33 }
 0xa61   :  { %1745 = vmatmul.bf16.gmra.mxu2 %v1677_v17  ;;  %3398 = vrcp.f32 %v1526_v7  ;;  %v1512_v7 = vpop.xlane.xlu2 %1511 }
 0xa62   :  { %3400 = vtanh.f32 %v1631_v13  ;;  %v1510_v4 = vpop.xlane.xlu1 %1509 }
 0xa63   :  { %3402 = vrcp.f32 %v1525_v51  ;;  %v1574_v34 = vpop.f32.mrf.mxu3  ;;  %v1530_v9 = vmax.f32 %v1510_v4, 1e-30  ;;  %v1532_v51 = vmax.f32 %v1514_v2, 1e-30 }
 0xa64   :  { %3404 = vrcp.f32 %v1527_v59 }
 0xa66   :  { %v3397_v39 = vpop.eup %3396 }
 0xa67   :  { %v3399_v38 = vpop.eup %3398 }
 0xa68   :  { %v3401_v22 = vpop.eup %3400  ;;  %v1615_v19 = vmul.f32 %v3399_v38, %v1569_v36 }
 0xa69   :  { %v3403_v10 = vpop.eup %3402  ;;  %v1678_v31 = vpack.c.bf16 %v3397_v39, %v3401_v22  ;;  %v1531_v39 = vmax.f32 %v1512_v7, 1e-30 }
 0xa6a   :  { %v1614_v58 = vmul.f32 %v3403_v10, %v1567_v43  ;;  %v1634_v20 = vadd.f32 %v4433_v30, %v1615_v19  ;;  %v3405_v55 = vpop.eup %3404  ;;  %v1529_v43 = vmax.f32 %v1508_v6, 1e-30 }
 0xa6b   :  { %v1616_v15 = vmul.f32 %v3405_v55, %v1572_v44  ;;  %v1577_v18 = vpop.f32.mrf.mxu3  ;;  %v1516_v55 = vpop.xlane.xlu1 %1515 }
 0xa6c   :  { %v1633_v32 = vadd.f32 %v4433_v30, %v1614_v58  ;;  %3406 = vtanh.f32 %v1634_v20 }
 0xa6d   :  { %3408 = vrcp.f32 %v1528_v54  ;;  %v1635_v53 = vadd.f32 %v4433_v30, %v1616_v15 }
 0xa6e   :  { %3410 = vtanh.f32 %v1633_v32 }
 0xa6f   :  { %3412 = vtanh.f32 %v1635_v53 }
 0xa71   :  { %1750 = vmatmul.bf16.gmra.mxu2 %v1678_v31 }
 0xa72   :  { %v3407_v25 = vpop.eup %3406 }
 0xa73   :  { %v3409_v3 = vpop.eup %3408  ;;  %v1579_v23 = vpop.f32.mrf.mxu3 }
 0xa74   :  { %v3411_v40 = vpop.eup %3410  ;;  %v1617_v24 = vmul.f32 %v3409_v3, %v1574_v34 }
 0xa75   :  { %v1679_v12 = vpack.c.bf16 %v3407_v25, %v3411_v40  ;;  %v3413_v0 = vpop.eup %3412  ;;  %v1533_v25 = vmax.f32 %v1516_v55, 1e-30 }
 0xa76   :  { %v1636_v56 = vadd.f32 %v4433_v30, %v1617_v24 }
 0xa78   :  { %3414 = vtanh.f32 %v1636_v56 }
 0xa79   :  { %3416 = vrcp.f32 %v1530_v9 }
 0xa7a   :  { %3418 = vrcp.f32 %v1529_v43 }
 0xa7b   :  { %v1582_v33 = vpop.f32.mrf.mxu3 }
 0xa7e   :  { %v3415_v52 = vpop.eup %3414 }
 0xa7f   :  { %v3417_v62 = vpop.eup %3416  ;;  %v1680_v63 = vpack.c.bf16 %v3415_v52, %v3413_v0 }
 0xa80   :  { %v1619_v36 = vmul.f32 %v3417_v62, %v1579_v23  ;;  %v3419_v17 = vpop.eup %3418 }
 0xa81   :  { %1755 = vmatmul.bf16.gmra.mxu2 %v1679_v12  ;;  %v1618_v21 = vmul.f32 %v3419_v17, %v1577_v18 }
 0xa82   :  { %v4453_v46 = vpop.f32.mrf.mxu2  ;;  %v1638_v13 = vadd.f32 %v4433_v30, %v1619_v36 }
 0xa83   :  { %v1798_v26 = vmul.f32 %v4449_v29, %v4453_v46  ;;  %v1637_v44 = vadd.f32 %v4433_v30, %v1618_v21  ;;  %v1584_v38 = vpop.f32.mrf.mxu3 }
 0xa84   :  { %3420 = vtanh.f32 %v1638_v13 }
 0xa85   :  { %1814 = vadd.xlane.f32.xlu0 %v1798_v26  ;;  %3422 = vrcp.f32 %v1532_v51 }
 0xa86   :  { %3424 = vtanh.f32 %v1637_v44 }
 0xa87   :  { %3426 = vrcp.f32 %v1531_v39 }
 0xa8a   :  { %v4457_v5 = vpop.f32.mrf.mxu2  ;;  %v3421_v50 = vpop.eup %3420 }
 0xa8b   :  { %v1799_v35 = vmul.f32 %v4449_v29, %v4457_v5  ;;  %v3423_v22 = vpop.eup %3422 }
 0xa8c   :  { %v3425_v19 = vpop.eup %3424  ;;  %v1621_v10 = vmul.f32 %v3423_v22, %v1584_v38 }
 0xa8d   :  { %1816 = vadd.xlane.f32.xlu1 %v1799_v35  ;;  %v3427_v31 = vpop.eup %3426  ;;  %v1681_v27 = vpack.c.bf16 %v3421_v50, %v3425_v19 }
 0xa8e   :  { %v1620_v58 = vmul.f32 %v3427_v31, %v1582_v33  ;;  %v1640_v59 = vadd.f32 %v4433_v30, %v1621_v10 }
 0xa90   :  { %v1639_v20 = vadd.f32 %v4433_v30, %v1620_v58  ;;  %3428 = vtanh.f32 %v1640_v59 }
 0xa91   :  { %1760 = vmatmul.bf16.gmra.mxu2 %v1680_v63 }
 0xa92   :  { %3430 = vtanh.f32 %v1639_v20  ;;  %v1781_v20 = vpack.c.bf16 %v4457_v5, %v4453_v46 }
 0xa93   :  { %3432 = vrcp.f32 %v1533_v25 }
 0xa96   :  { %v3429_v54 = vpop.eup %3428 }
 0xa98   :  { %v3431_v34 = vpop.eup %3430 }
 0xa99   :  { %v1682_v32 = vpack.c.bf16 %v3429_v54, %v3431_v34  ;;  %v3433_v40 = vpop.eup %3432  ;;  %v2892_v54 = vld [vmem:[%s4941_s4 + $0x3] sm:$0x1] }
 0xaa1   :  { %1765 = vmatmul.bf16.gmra.mxu2 %v1681_v27 }
 0xab1   :  { %1770 = vmatmul.bf16.gmra.mxu2 %v1682_v32 }
 0xac3   :  { %v1518_v3 = vpop.xlane.xlu2 %1517 }
 0xac4   :  { %v1534_v15 = vmax.f32 %v1518_v3, 1e-30 }
 0xac6   :  { %3434 = vrcp.f32 %v1534_v15 }
 0xacc   :  { %v3435_v12 = vpop.eup %3434 }
 0xad5   :  { %v1587_v18 = vpop.f32.mrf.mxu3 }
 0xad6   :  { %v1622_v24 = vmul.f32 %v3433_v40, %v1587_v18 }
 0xad8   :  { %v1641_v4 = vadd.f32 %v4433_v30, %v1622_v24 }
 0xada   :  { %3436 = vtanh.f32 %v1641_v4 }
 0xadd   :  { %v1589_v53 = vpop.f32.mrf.mxu3 }
 0xade   :  { %v1623_v6 = vmul.f32 %v3435_v12, %v1589_v53 }
 0xae0   :  { %v1642_v56 = vadd.f32 %v4433_v30, %v1623_v6  ;;  %v3437_v43 = vpop.eup %3436 }
 0xae2   :  { %3438 = vtanh.f32 %v1642_v56 }
 0xae4   :  { %v1746_v9 = vpop.f32.mrf.mxu2 }
 0xae5   :  { %v1800_v26 = vmul.f32 %v4449_v29, %v1746_v9 }
 0xae7   :  { %1818 = vadd.xlane.f32.xlu2 %v1800_v26 }
 0xae8   :  { %v3439_v23 = vpop.eup %3438 }
 0xae9   :  { %v1683_v0 = vpack.c.bf16 %v3439_v23, %v3437_v43 }
 0xaeb   :  { %1775 = vmatmul.bf16.gmra.mxu2 %v1683_v0 }
 0xaec   :  { %v1748_v35 = vpop.f32.mrf.mxu2 }
 0xaed   :  { %v1782_v52 = vpack.c.bf16 %v1748_v35, %v1746_v9  ;;  %v1801_v62 = vmul.f32 %v4449_v29, %v1748_v35 }
 0xaef   :  { %1820 = vadd.xlane.f32.xlu0 %v1801_v62 }
 0xaf4   :  { %v1751_v36 = vpop.f32.mrf.mxu2 }
 0xaf5   :  { %v1802_v17 = vmul.f32 %v4449_v29, %v1751_v36 }
 0xaf7   :  { %1822 = vadd.xlane.f32.xlu1 %v1802_v17 }
 0xaf8   :  { %v1815_v34 = vpop.xlane.xlu0 %1814 }
 0xafc   :  { %v1753_v30 = vpop.f32.mrf.mxu2 }
 0xafd   :  { %v1783_v63 = vpack.c.bf16 %v1753_v30, %v1751_v36  ;;  %v1803_v2 = vmul.f32 %v4449_v29, %v1753_v30 }
 0xaff   :  { %1824 = vadd.xlane.f32.xlu2 %v1803_v2 }
 0xb00   :  { %v1817_v32 = vpop.xlane.xlu1 %1816 }
 0xb04   :  { %v1756_v21 = vpop.f32.mrf.mxu2 }
 0xb05   :  { %v1804_v33 = vmul.f32 %v4449_v29, %v1756_v21 }
 0xb07   :  { %1826 = vadd.xlane.f32.xlu2 %v1804_v33 }
 0xb0c   :  { %v1758_v7 = vpop.f32.mrf.mxu2 }
 0xb0d   :  { %v1784_v13 = vpack.c.bf16 %v1758_v7, %v1756_v21  ;;  %v1805_v62 = vmul.f32 %v4449_v29, %v1758_v7 }
 0xb14   :  { %v4472_v51 = vpop.f32.mrf.mxu2 }
 0xb1c   :  { %v1763_v44 = vpop.f32.mrf.mxu2 }
 0xb1d   :  { %v1785_v59 = vpack.c.bf16 %v1763_v44, %v4472_v51  ;;  %v1807_v17 = vmul.f32 %v4449_v29, %v1763_v44 }
 0xb24   :  { %v4474_v39 = vpop.f32.mrf.mxu2 }
 0xb25   :  { %v1808_v33 = vmul.f32 %v4449_v29, %v4474_v39 }
 0xb2c   :  { %v1768_v38 = vpop.f32.mrf.mxu2 }
 0xb2d   :  { %v1786_v58 = vpack.c.bf16 %v1768_v38, %v4474_v39  ;;  %v1809_v30 = vmul.f32 %v4449_v29, %v1768_v38 }
 0xb34   :  { %v4476_v50 = vpop.f32.mrf.mxu2 }
 0xb35   :  { %v1810_v7 = vmul.f32 %v4449_v29, %v4476_v50 }
 0xb3c   :  { %v4478_v22 = vpop.f32.mrf.mxu2 }
 0xb3d   :  { %v1787_v27 = vpack.c.bf16 %v4478_v22, %v4476_v50  ;;  %v1811_v39 = vmul.f32 %v4449_v29, %v4478_v22 }
 0xb5a   :  { %v1819_v4 = vpop.xlane.xlu2 %1818 }
 0xb62   :  { %v1821_v3 = vpop.xlane.xlu0 %1820 }
 0xb6a   :  { %v1823_v18 = vpop.xlane.xlu1 %1822 }
 0xb6e   :  { %v4480_v19 = vpop.f32.mrf.mxu2 }
 0xb6f   :  { %v1812_v50 = vmul.f32 %v4449_v29, %v4480_v19 }
 0xb72   :  { %v1825_v36 = vpop.xlane.xlu2 %1824 }
 0xb76   :  { %v4482_v10 = vpop.f32.mrf.mxu2 }
 0xb77   :  { %v1788_v31 = vpack.c.bf16 %v4482_v10, %v4480_v19 }
 0xb79   :  { %1846 = vmatpush.bf16.xpose.msrb.mxu0 %v1788_v31  ;;  %2060 = vmatpush.bf16.msra.mxu1 %v1788_v31 }
 0xb7d   :  { %2061 = vmatpush.bf16.msra.mxu1 %v1787_v27 }
 0xb81   :  { %1847 = vmatpush.bf16.xpose.msrb.mxu0 %v1787_v27  ;;  %2062 = vmatpush.bf16.msra.mxu1 %v1786_v58 }
 0xb85   :  { %2063 = vmatpush.bf16.msra.mxu1 %v1785_v59 }
 0xb89   :  { %1848 = vmatpush.bf16.xpose.msrb.mxu0 %v1786_v58  ;;  %2064 = vmatpush.bf16.msra.mxu1 %v1784_v13 }
 0xb8d   :  { %2065 = vmatpush.bf16.msra.mxu1 %v1783_v63 }
 0xb91   :  { %1849 = vmatpush.bf16.xpose.msrb.mxu0 %v1785_v59  ;;  %2066 = vmatpush.bf16.msra.mxu1 %v1782_v52 }
 0xb95   :  { %2067 = vmatpush.bf16.msra.mxu1 %v1781_v20 }
 0xb99   :  { %1850 = vmatpush.bf16.xpose.msrb.mxu0 %v1784_v13  ;;  %v1827_v13 = vpop.xlane.xlu2 %1826 }
 0xba1   :  { %1851 = vmatpush.bf16.xpose.msrb.mxu0 %v1783_v63  ;;  %v1806_v63 = vmul.f32 %v4449_v29, %v4472_v51 }
 0xba9   :  { %1852 = vmatpush.bf16.xpose.msrb.mxu0 %v1782_v52 }
 0xbb1   :  { %1853 = vmatpush.bf16.xpose.msrb.mxu0 %v1781_v20 }
 0xbb8   :  { %1854 = vmatmul.bf16.vlgmr.msrb.gmra.mxu0 %v2892_v54 }
 0xc35   :  { %v1855_v55 = vpop.f32.mrf.mxu0 }
 0xc36   :  { %v4495_v25 = vperm.slane %v1855_v55, 0 }
 0xc38   :  { %v1863_v15 = vadd.f32 %v4495_v25, %v1821_v3  ;;  %v1861_v46 = vadd.f32 %v4495_v25, %v1817_v32  ;;  %v1860_v5 = vadd.f32 %v4495_v25, %v1815_v34  ;;  %v1864_v53 = vadd.f32 %v4495_v25, %v1823_v18 }
 0xc39   :  { %v1862_v26 = vadd.f32 %v4495_v25, %v1819_v4  ;;  %v1865_v2 = vadd.f32 %v4495_v25, %v1825_v36  ;;  %v1866_v44 = vadd.f32 %v4495_v25, %v1827_v13 }
 0xc3a   :  { %v1879_v40 = vmul.f32 0.2, %v1863_v15  ;;  %v1877_v24 = vmul.f32 0.2, %v1861_v46  ;;  %v1876_v12 = vmul.f32 0.2, %v1860_v5 }
 0xc3b   :  { %v1880_v23 = vmul.f32 0.2, %v1864_v53  ;;  %v1878_v0 = vmul.f32 0.2, %v1862_v26  ;;  %v1881_v21 = vmul.f32 0.2, %v1865_v2 }
 0xc3c   :  { %v4501_v6 = vmax.f32 %v1863_v15, %v1879_v40  ;;  %v1893_v56 = vmax.f32 %v1861_v46, %v1877_v24  ;;  %v1892_v9 = vmax.f32 %v1860_v5, %v1876_v12  ;;  %v1882_v51 = vmul.f32 0.2, %v1866_v44 }
 0xc3d   :  { %v1857_v43 = vpop.f32.mrf.mxu0  ;;  %v4505_v35 = vmax.f32 %v1864_v53, %v1880_v23  ;;  %v1894_v52 = vmax.f32 %v1862_v26, %v1878_v0  ;;  %v4518_v31 = vmax.f32 %v1865_v2, %v1881_v21 }
 0xc3e   :  { %1914 = vmax.xlane.f32.xlu2 %v4501_v6  ;;  %1910 = vmax.xlane.f32.xlu1 %v1893_v56  ;;  %v4522_v38 = vmax.f32 %v1866_v44, %v1882_v51 }
 0xc3f   :  { %1908 = vmax.xlane.f32.xlu0 %v1892_v9 }
 0xc46   :  { %1916 = vmax.xlane.f32.xlu2 %v4505_v35  ;;  %1912 = vmax.xlane.f32.xlu1 %v1894_v52 }
 0xc47   :  { %1828 = vadd.xlane.f32.xlu0 %v1805_v62 }
 0xc4e   :  { %1836 = vadd.xlane.f32.xlu2 %v1809_v30  ;;  %1832 = vadd.xlane.f32.xlu1 %v1807_v17 }
 0xc4f   :  { %1830 = vadd.xlane.f32.xlu0 %v1806_v63 }
 0xc56   :  { %1838 = vadd.xlane.f32.xlu2 %v1810_v7  ;;  %1834 = vadd.xlane.f32.xlu1 %v1808_v33 }
 0xc57   :  { %1918 = vmax.xlane.f32.xlu0 %v4518_v31 }
 0xc5f   :  { %1920 = vmax.xlane.f32.xlu0 %v4522_v38 }
 0xc67   :  { %1840 = vadd.xlane.f32.xlu0 %v1811_v39 }
 0xc6f   :  { %1842 = vadd.xlane.f32.xlu0 %v1812_v50 }
 0xcb1   :  { %v1915_v27 = vpop.xlane.xlu2 %1914  ;;  %v1911_v58 = vpop.xlane.xlu1 %1910 }
 0xcb2   :  { %v1941_v59 = vsub.f32 %v1893_v56, %v1911_v58  ;;  %v1909_v20 = vpop.xlane.xlu0 %1908  ;;  %v1943_v19 = vsub.f32 %v4501_v6, %v1915_v27  ;;  %v1813_v58 = vmul.f32 %v4449_v29, %v4482_v10 }
 0xcb3   :  { %v1940_v54 = vsub.f32 %v1892_v9, %v1909_v20 }
 0xcb4   :  { %v1958_v34 = vmul.f32 1.442695, %v1941_v59  ;;  %v1962_v43 = vmul.f32 1.442695, %v1943_v19 }
 0xcb5   :  { %v1956_v32 = vmul.f32 1.442695, %v1940_v54 }
 0xcb6   :  { %3440 = vpow2.f32 %v1958_v34 }
 0xcb7   :  { %3442 = vpow2.f32 %v1956_v32 }
 0xcb9   :  { %v1917_v55 = vpop.xlane.xlu2 %1916  ;;  %v1913_v3 = vpop.xlane.xlu1 %1912 }
 0xcba   :  { %v1829_v15 = vpop.xlane.xlu0 %1828  ;;  %v1942_v22 = vsub.f32 %v1894_v52, %v1913_v3  ;;  %v1944_v50 = vsub.f32 %v4505_v35, %v1917_v55 }
 0xcbb   :  { %v1867_v46 = vadd.f32 %v4495_v25, %v1829_v15 }
 0xcbc   :  { %v3441_v5 = vpop.eup %3440  ;;  %v1960_v53 = vmul.f32 1.442695, %v1942_v22 }
 0xcbd   :  { %v1883_v18 = vmul.f32 0.2, %v1867_v46  ;;  %v3443_v40 = vpop.eup %3442  ;;  %v4532_v24 = vmul.f32 %v3441_v5, %v3868_v45 }
 0xcbe   :  { %v4535_v12 = vmul.f32 %v3443_v40, %v3871_v47  ;;  %3444 = vpow2.f32 %v1960_v53 }
 0xcbf   :  { %v4537_v4 = vmax.f32 %v1867_v46, %v1883_v18  ;;  %3446 = vpow2.f32 %v1962_v43 }
 0xcc0   :  { %v2052_v26 = vpack.c.bf16 %v4532_v24, %v4535_v12 }
 0xcc1   :  { %1922 = vmax.xlane.f32.xlu1 %v4537_v4  ;;  %v1837_v56 = vpop.xlane.xlu2 %1836  ;;  %v1833_v9 = vpop.xlane.xlu1 %1832 }
 0xcc2   :  { %v1871_v23 = vadd.f32 %v4495_v25, %v1837_v56  ;;  %v1869_v6 = vadd.f32 %v4495_v25, %v1833_v9  ;;  %v1831_v45 = vpop.xlane.xlu0 %1830  ;;  %2068 = vmatmul.bf16.vlgmr.msra.gmra.mxu1 %v2052_v26 }
 0xcc3   :  { %v1868_v47 = vadd.f32 %v4495_v25, %v1831_v45 }
 0xcc4   :  { %v1887_v0 = vmul.f32 0.2, %v1871_v23  ;;  %v1885_v52 = vmul.f32 0.2, %v1869_v6  ;;  %v3445_v2 = vpop.eup %3444 }
 0xcc5   :  { %v1884_v62 = vmul.f32 0.2, %v1868_v47  ;;  %v3447_v7 = vpop.eup %3446  ;;  %v4551_v39 = vmul.f32 %v3445_v2, %v3900_v11 }
 0xcc6   :  { %v4545_v36 = vmax.f32 %v1871_v23, %v1887_v0  ;;  %v1901_v17 = vmax.f32 %v1869_v6, %v1885_v52  ;;  %v4560_v20 = vmul.f32 %v3447_v7, %v3903_v16 }
 0xcc7   :  { %v1900_v30 = vmax.f32 %v1868_v47, %v1884_v62 }
 0xcc8   :  { %1926 = vmax.xlane.f32.xlu2 %v1901_v17  ;;  %1930 = vmax.xlane.f32.xlu0 %v4545_v36  ;;  %v2053_v11 = vpack.c.bf16 %v4560_v20, %v4551_v39 }
 0xcc9   :  { %1924 = vmax.xlane.f32.xlu1 %v1900_v30  ;;  %v1835_v63 = vpop.xlane.xlu1 %1834  ;;  %v1839_v13 = vpop.xlane.xlu2 %1838 }
 0xcca   :  { %v1870_v21 = vadd.f32 %v4495_v25, %v1835_v63  ;;  %v1919_v33 = vpop.xlane.xlu0 %1918  ;;  %v1872_v59 = vadd.f32 %v4495_v25, %v1839_v13 }
 0xccb   :  { %v1945_v51 = vsub.f32 %v4518_v31, %v1919_v33  ;;  %v1964_v31 = vmul.f32 1.442695, %v1944_v50 }
 0xccc   :  { %v1886_v44 = vmul.f32 0.2, %v1870_v21  ;;  %v1888_v35 = vmul.f32 0.2, %v1872_v59 }
 0xccd   :  { %v1966_v54 = vmul.f32 1.442695, %v1945_v51 }
 0xcce   :  { %v4554_v27 = vmax.f32 %v1870_v21, %v1886_v44  ;;  %v1904_v32 = vmax.f32 %v1872_v59, %v1888_v35 }
 0xccf   :  { %3448 = vpow2.f32 %v1966_v54 }
 0xcd0   :  { %1928 = vmax.xlane.f32.xlu2 %v4554_v27  ;;  %3450 = vpow2.f32 %v1964_v31 }
 0xcd1   :  { %1844 = vadd.xlane.f32.xlu1 %v1813_v58 }
 0xcd2   :  { %v1921_v34 = vpop.xlane.xlu0 %1920  ;;  %2073 = vmatmul.bf16.gmra.mxu1 %v2053_v11 }
 0xcd5   :  { %v3449_v29 = vpop.eup %3448 }
 0xcd6   :  { %v3451_v55 = vpop.eup %3450  ;;  %v4567_v15 = vmul.f32 %v3449_v29, %v3924_v48  ;;  %v1946_v48 = vsub.f32 %v4522_v38, %v1921_v34 }
 0xcd7   :  { %v4572_v22 = vmul.f32 %v3451_v55, %v3927_v37 }
 0xcd8   :  { %v1968_v56 = vmul.f32 1.442695, %v1946_v48 }
 0xcd9   :  { %1932 = vmax.xlane.f32.xlu1 %v1904_v32  ;;  %v2054_v5 = vpack.c.bf16 %v4567_v15, %v4572_v22 }
 0xcda   :  { %v1841_v10 = vpop.xlane.xlu0 %1840  ;;  %3452 = vpow2.f32 %v1968_v56  ;;  %v3110_v56 = vld [vmem:[%s4945_s8 + $0x8] sm:$0xff]  }
 0xcdb   :  { %v1873_v16 = vadd.f32 %v4495_v25, %v1841_v10 }
 0xcdd   :  { %v1889_v3 = vmul.f32 0.2, %v1873_v16 }
 0xcdf   :  { %v4569_v46 = vmax.f32 %v1873_v16, %v1889_v3 }
 0xce0   :  { %v3453_v45 = vpop.eup %3452 }
 0xce1   :  { %1934 = vmax.xlane.f32.xlu2 %v4569_v46  ;;  %v1994_v62 = vmul.f32 %v3453_v45, %v3947_v57 }
 0xce2   :  { %v1843_v18 = vpop.xlane.xlu0 %1842  ;;  %2078 = vmatmul.bf16.gmra.mxu1 %v2054_v5 }
 0xce3   :  { %v1874_v40 = vadd.f32 %v4495_v25, %v1843_v18 }
 0xce5   :  { %v1890_v19 = vmul.f32 0.2, %v1874_v40 }
 0xce7   :  { %v1906_v53 = vmax.f32 %v1874_v40, %v1890_v19 }
 0xce9   :  { %1936 = vmax.xlane.f32.xlu0 %v1906_v53 }
 0xd34   :  { %v1923_v9 = vpop.xlane.xlu1 %1922 }
 0xd35   :  { %v1947_v26 = vsub.f32 %v4537_v4, %v1923_v9 }
 0xd37   :  { %v1970_v37 = vmul.f32 1.442695, %v1947_v26 }
 0xd39   :  { %3454 = vpow2.f32 %v1970_v37  ;;  %v3078_v37 = vunpack.c.h.bf16 %v3110_v56 }
 0xd3b   :  { %v1927_v43 = vpop.xlane.xlu2 %1926  ;;  %v1931_v44 = vpop.xlane.xlu0 %1930  ;;  %vm2240_vm5 = vcmp.gt.f32.partialorder %v3078_v37, 0.0 }
 0xd3c   :  { %v1949_v23 = vsub.f32 %v1901_v17, %v1927_v43  ;;  %v1925_v6 = vpop.xlane.xlu1 %1924  ;;  %v3652_v43 = vmov 1  }
 0xd3d   :  { %v1948_v47 = vsub.f32 %v1900_v30, %v1925_v6 }
 0xd3e   :  { %v1974_v52 = vmul.f32 1.442695, %v1949_v23 }
 0xd3f   :  { %v3455_v0 = vpop.eup %3454  ;;  %v1972_v2 = vmul.f32 1.442695, %v1948_v47  ;;  %v3113_v47 = vld [vmem:[%s4945_s8 + $0x20] sm:$0xff]  }
 0xd40   :  { %v1995_v63 = vmul.f32 %v3455_v0, %v3955_v1  ;;  %3456 = vpow2.f32 %v1974_v52  ;;  %v4640_v52 = vpop.f32.mrf.mxu1 }
 0xd41   :  { %3458 = vpow2.f32 %v1972_v2 }
 0xd42   :  { %v2055_v38 = vpack.c.bf16 %v1995_v63, %v1994_v62 }
 0xd43   :  { %v1929_v13 = vpop.xlane.xlu2 %1928 }
 0xd44   :  { %v1845_v21 = vpop.xlane.xlu1 %1844  ;;  %2083 = vmatmul.bf16.gmra.mxu1 %v2055_v38  ;;  %v1950_v1 = vsub.f32 %v4554_v27, %v1929_v13  ;;  %v3114_v13 = vld [vmem:[%s4945_s8 + $0x28] sm:$0xff]  }
 0xd45   :  { %v1875_v4 = vadd.f32 %v4495_v25, %v1845_v21  ;;  %v1951_v25 = vsub.f32 %v4545_v36, %v1931_v44 }
 0xd46   :  { %v3457_v17 = vpop.eup %3456  ;;  %v1976_v54 = vmul.f32 1.442695, %v1950_v1  ;;  %v3093_v1 = vunpack.c.l.bf16 %v3114_v13 }
 0xd47   :  { %v1891_v33 = vmul.f32 0.2, %v1875_v4  ;;  %v3459_v30 = vpop.eup %3458  ;;  %v4589_v58 = vmul.f32 %v3457_v17, %v3965_v8  ;;  %v1978_v31 = vmul.f32 1.442695, %v1951_v25  ;;  %v3089_v17 = vunpack.c.l.bf16 %v3113_v47 }
 0xd48   :  { %v1996_v50 = vmul.f32 %v3459_v30, %v3981_v61  ;;  %vm2247_vm10 = vcmp.gt.f32.partialorder %v3093_v1, 0.0 }
 0xd49   :  { %v4583_v7 = vmax.f32 %v1875_v4, %v1891_v33  ;;  %v4649_v33 = vpop.f32.mrf.mxu1  ;;  %vm2245_vm9 = vcmp.gt.f32.partialorder %v3089_v17, 0.0 }
 0xd4a   :  { %v2056_v11 = vpack.c.bf16 %v4589_v58, %v1996_v50 }
 0xd4b   :  { %1938 = vmax.xlane.f32.xlu1 %v4583_v7 }
 0xd4c   :  { %v1933_v57 = vpop.xlane.xlu1 %1932 }
 0xd4d   :  { %v1952_v51 = vsub.f32 %v1904_v32, %v1933_v57 }
 0xd4f   :  { %v1980_v59 = vmul.f32 1.442695, %v1952_v51 }
 0xd51   :  { %3460 = vpow2.f32 %v1980_v59  ;;  %v4659_v51 = vpop.f32.mrf.mxu1 }
 0xd52   :  { %3462 = vpow2.f32 %v1976_v54 }
 0xd53   :  { %3464 = vpow2.f32 %v1978_v31  ;;  %v3094_v31 = vunpack.c.h.bf16 %v3114_v13 }
 0xd54   :  { %2088 = vmatmul.bf16.gmra.mxu1 %v2056_v11  ;;  %v1935_v35 = vpop.xlane.xlu2 %1934  ;;  %v3116_v11 = vld [vmem:[%s4945_s8 + $0x38] sm:$0xff]  }
 0xd55   :  { %v1953_v29 = vsub.f32 %v4569_v46, %v1935_v35  ;;  %v3102_v35 = vunpack.c.h.bf16 %v3116_v11  ;;  %vm2248_vm12 = vcmp.gt.f32.partialorder %v3094_v31, 0.0 }
 0xd57   :  { %v3461_v34 = vpop.eup %3460  ;;  %v1982_v3 = vmul.f32 1.442695, %v1953_v29  ;;  %vm2252_vm13 = vcmp.gt.f32.partialorder %v3102_v35, 0.0 }
 0xd58   :  { %v2000_v27 = vmul.f32 %v3461_v34, %v4003_v49  ;;  %v3463_v61 = vpop.eup %3462 }
 0xd59   :  { %v3465_v8 = vpop.eup %3464  ;;  %v4596_v10 = vmul.f32 %v3463_v61, %v3984_v28  ;;  %v3651_v28 = vmov 0   ;;  %v4671_v54 = vpop.f32.mrf.mxu1 }
 0xd5a   :  { %2028 = vadd.xlane.f32.xlu1 %v2000_v27  ;;  %v1999_v55 = vmul.f32 %v3465_v8, %v4013_v41  ;;  %3129 = vset.pattern.permute.xlu2 %v3651_v28  ;;  %v2256_v23 = vsel %vm2240_vm5, 1, %v3651_v28  ;;  %v2261_v44 = vsel %vm2245_vm9, 1, %v3651_v28 }
 0xd5b   :  { %3128 = vset.pattern.permute.xlu1 %v3651_v28  ;;  %3127 = vset.pattern.permute.xlu0 %v3651_v28 }
 0xd5c   :  { %v1937_v32 = vpop.xlane.xlu0 %1936  ;;  %v2057_v5 = vpack.c.bf16 %v1999_v55, %v4596_v10 }
 0xd5d   :  { %v1954_v36 = vsub.f32 %v1906_v53, %v1937_v32  ;;  %v4688_v32 = vsel %vm2248_vm12, 1, %v3651_v28 }
 0xd5f   :  { %v1984_v16 = vmul.f32 1.442695, %v1954_v36  ;;  %v3101_v36 = vunpack.c.l.bf16 %v3116_v11 }
 0xd61   :  { %3466 = vpow2.f32 %v1984_v16  ;;  %v4690_v8 = vpop.f32.mrf.mxu1  ;;  %vm2251_vm14 = vcmp.gt.f32.partialorder %v3101_v36, 0.0 }
 0xd62   :  { %2026 = vadd.xlane.f32.xlu1 %v1999_v55  ;;  %3468 = vpow2.f32 %v1982_v3 }
 0xd64   :  { %2093 = vmatmul.bf16.gmra.mxu1 %v2057_v5  ;;  %v2267_v5 = vsel %vm2251_vm14, 1, %v3651_v28 }
 0xd67   :  { %v3467_v49 = vpop.eup %3466 }
 0xd68   :  { %v4601_v18 = vmul.f32 %v3467_v49, %v4023_v14  ;;  %v3469_v46 = vpop.eup %3468  ;;  %v3072_v14 = vld [vmem:[%s4945_s8] sm:$0xff]  }
 0xd69   :  { %v2001_v41 = vmul.f32 %v3469_v46, %v4011_v60  ;;  %v3074_v19 = vunpack.c.h.bf16 %v3072_v14  ;;  %v3111_v60 = vld [vmem:[%s4945_s8 + $0x10] sm:$0xff]   ;;  %v3073_v0 = vunpack.c.l.bf16 %v3072_v14  ;;  %v2081_v16 = vpop.f32.mrf.mxu1  ;;  %v4711_v14 = vld [vmem:[#allocation5 + $0x3] ss:$0 sm:$0xff] }
 0xd6a   :  { %2016 = vadd.xlane.f32.xlu1 %v1994_v62  ;;  %2032 = vadd.xlane.f32.xlu2 %v4601_v18  ;;  %v3081_v53 = vunpack.c.l.bf16 %v3111_v60  ;;  %v3082_v6 = vunpack.c.h.bf16 %v3111_v60  ;;  %v3090_v62 = vunpack.c.h.bf16 %v3113_v47 }
 0xd6b   :  { %v2058_v40 = vpack.c.bf16 %v2001_v41, %v2000_v27  ;;  %vm2238_vm1 = vcmp.gt.f32.partialorder %v3074_v19, 0.0  ;;  %vm2237_vm7 = vcmp.gt.f32.partialorder %v3073_v0, 0.0 }
 0xd6c   :  { %vm2241_vm2 = vcmp.gt.f32.partialorder %v3081_v53, 0.0  ;;  %vm2242_vm6 = vcmp.gt.f32.partialorder %v3082_v6, 0.0  ;;  %vm2246_vm8 = vcmp.gt.f32.partialorder %v3090_v62, 0.0  ;;  %v4644_v38 = vsel %vm2237_vm7, 1, %v3651_v28 }
 0xd6d   :  { %v2257_v48 = vsel %vm2241_vm2, 1, %v3651_v28  ;;  %v2258_v45 = vsel %vm2242_vm6, 1, %v3651_v28  ;;  %v2262_v4 = vsel %vm2246_vm8, 1, %v3651_v28 }
 0xd72   :  { %2014 = vadd.xlane.f32.xlu1 %v4567_v15  ;;  %2030 = vadd.xlane.f32.xlu2 %v2001_v41  ;;  %v2254_v15 = vsel %vm2238_vm1, 1, %v3651_v28 }
 0xd74   :  { %2098 = vmatmul.bf16.gmra.mxu1 %v2058_v40 }
 0xd7a   :  { %2004 = vadd.xlane.f32.xlu1 %v4535_v12  ;;  %2020 = vadd.xlane.f32.xlu2 %v1996_v50  ;;  %v4622_v12 = vld [vmem:[%s4945_s8 + $0x18] sm:$0xff]   ;;  %v3115_v50 = vld [vmem:[%s4945_s8 + $0x30] sm:$0xff]  }
 0xd7b   :  { %v3098_v59 = vunpack.c.h.bf16 %v3115_v50  ;;  %v3097_v55 = vunpack.c.l.bf16 %v3115_v50 }
 0xd7d   :  { %vm2250_vm11 = vcmp.gt.f32.partialorder %v3098_v59, 0.0  ;;  %vm2249_vm15 = vcmp.gt.f32.partialorder %v3097_v55, 0.0 }
 0xd7e   :  { %v4679_v34 = vsel %vm2250_vm11, 1, %v3651_v28 }
 0xd82   :  { %2018 = vadd.xlane.f32.xlu2 %v1995_v63 }
 0xd8a   :  { %2008 = vadd.xlane.f32.xlu2 %v4551_v39  ;;  %v3085_v39 = vunpack.c.l.bf16 %v4622_v12 }
 0xd8c   :  { %vm2243_vm3 = vcmp.gt.f32.partialorder %v3085_v39, 0.0 }
 0xd8d   :  { %v2259_v9 = vsel %vm2243_vm3, 1, %v3651_v28 }
 0xd92   :  { %2006 = vadd.xlane.f32.xlu2 %v4532_v24  ;;  %v3077_v24 = vunpack.c.l.bf16 %v3110_v56 }
 0xd93   :  { %2273 = vperm.xlu1 %3128, %v2254_v15  }
 0xd94   :  { %vm2239_vm4 = vcmp.gt.f32.partialorder %v3077_v24, 0.0 }
 0xd95   :  { %v4631_v26 = vsel %vm2239_vm4, 1, %v3651_v28 }
 0xd9b   :  { %2282 = vperm.xlu1 %3128, %v2257_v48  }
 0xda3   :  { %2288 = vperm.xlu1 %3128, %v2259_v9  }
 0xdaa   :  { %2276 = vperm.xlu2 %3129, %v4631_v26  }
 0xdab   :  { %3131 = vset.pattern.permute.xlu1 %v3652_v43 }
 0xdac   :  { %2374 = vperm.xlu1 %3131, %v2254_v15  }
 0xdb2   :  { %2279 = vperm.xlu2 %3129, %v2256_v23  }
 0xdb4   :  { %2383 = vperm.xlu1 %3131, %v2257_v48  }
 0xdba   :  { %2285 = vperm.xlu2 %3129, %v2258_v45  }
 0xdbc   :  { %2389 = vperm.xlu1 %3131, %v2259_v9   ;;  %v3086_v9 = vunpack.c.h.bf16 %v4622_v12 }
 0xdbe   :  { %v1939_v63 = vpop.xlane.xlu1 %1938  ;;  %vm2244_vm0 = vcmp.gt.f32.partialorder %v3086_v9, 0.0 }
 0xdbf   :  { %v1955_v2 = vsub.f32 %v4583_v7, %v1939_v63  ;;  %v2260_v47 = vsel %vm2244_vm0, 1, %v3651_v28 }
 0xdc1   :  { %v1986_v21 = vmul.f32 1.442695, %v1955_v2  ;;  %v2084_v46 = vpop.f32.mrf.mxu1 }
 0xdc2   :  { %3130 = vset.pattern.permute.xlu2 %v3652_v43 }
 0xdc3   :  { %3470 = vpow2.f32 %v1986_v21  ;;  %2371 = vperm.xlu2 %3130, %v4644_v38  }
 0xdc4   :  { %3133 = vset.pattern.permute.xlu1 %v3651_v28 }
 0xdc5   :  { %2297 = vperm.xlu1 %3133, %v2262_v4  }
 0xdc9   :  { %v3471_v7 = vpop.eup %3470  ;;  %v2086_v48 = vpop.f32.mrf.mxu1 }
 0xdca   :  { %v2003_v30 = vmul.f32 %v3471_v7, %v4029_v42  ;;  %v4665_v42 = vsel %vm2247_vm10, 1, %v3651_v28 }
 0xdcb   :  { %2380 = vperm.xlu2 %3130, %v2256_v23  }
 0xdcc   :  { %2034 = vadd.xlane.f32.xlu0 %v2003_v30  ;;  %v2059_v57 = vpack.c.bf16 %v2003_v30, %v4601_v18  ;;  %v4707_v18 = vsel %vm2249_vm15, 1, %v3651_v28 }
 0xdcd   :  { %3135 = vset.pattern.permute.xlu1 %v3652_v43  ;;  %v4668_v25 = vpop.xlane.xlu1 %2028 }
 0xdce   :  { %2395 = vperm.xlu1 %3135, %v2261_v44   ;;  %2103 = vmatmul.bf16.gmra.mxu1 %v2059_v57 }
 0xdd1   :  { %v4735_v57 = vpop.f32.mrf.mxu1 }
 0xdd3   :  { %2386 = vperm.xlu2 %3130, %v2258_v45  }
 0xdd4   :  { %2024 = vadd.xlane.f32.xlu0 %v4596_v10 }
 0xdd5   :  { %v4684_v61 = vpop.xlane.xlu1 %2026 }
 0xdd6   :  { %2401 = vperm.xlu1 %3135, %v4665_v42  }
 0xdd9   :  { %v4753_v31 = vpop.f32.mrf.mxu1 }
 0xddb   :  { %3132 = vset.pattern.permute.xlu2 %v3651_v28 }
 0xddc   :  { %2022 = vadd.xlane.f32.xlu0 %v4589_v58  ;;  %2294 = vperm.xlu2 %3132, %v2261_v44   ;;  %v4694_v58 = vsel %vm2252_vm13, 1, %v3651_v28 }
 0xddd   :  { %v4681_v27 = vpop.xlane.xlu2 %2032  ;;  %v2017_v10 = vpop.xlane.xlu1 %2016 }
 0xdde   :  { %3138 = vset.pattern.permute.xlu1 %v3651_v28  ;;  %v2042_v3 = vmax.f32 %v2017_v10, 1e-30 }
 0xddf   :  { %2309 = vperm.xlu1 %3138, %v4679_v34  }
 0xde0   :  { %3472 = vrcp.f32 %v2042_v3 }
 0xde4   :  { %2012 = vadd.xlane.f32.xlu0 %v4572_v22  ;;  %2303 = vperm.xlu2 %3132, %v4688_v32  }
 0xde5   :  { %v4697_v29 = vpop.xlane.xlu2 %2030  ;;  %v2015_v49 = vpop.xlane.xlu1 %2014 }
 0xde6   :  { %v3473_v40 = vpop.eup %3472  ;;  %v2041_v23 = vmax.f32 %v2015_v49, 1e-30 }
 0xde7   :  { %2315 = vperm.xlu1 %3138, %v4694_v58   ;;  %v2131_v19 = vmul.f32 %v3473_v40, %v2084_v46 }
 0xde9   :  { %v2150_v39 = vadd.f32 %v4711_v14, %v2131_v19 }
 0xdec   :  { %2010 = vadd.xlane.f32.xlu0 %v4560_v20  ;;  %3136 = vset.pattern.permute.xlu2 %v3652_v43 }
 0xded   :  { %v4702_v22 = vpop.xlane.xlu2 %2020  ;;  %2398 = vperm.xlu2 %3136, %v2262_v4   ;;  %v4713_v60 = vpop.xlane.xlu1 %2004 }
 0xdef   :  { %3140 = vset.pattern.permute.xlu1 %v3652_v43 }
 0xdf0   :  { %2413 = vperm.xlu1 %3140, %v2267_v5  }
 0xdf5   :  { %v2019_v20 = vpop.xlane.xlu2 %2018  ;;  %3137 = vset.pattern.permute.xlu2 %v3651_v28 }
 0xdf6   :  { %v2043_v41 = vmax.f32 %v2019_v20, 1e-30  ;;  %2306 = vperm.xlu2 %3137, %v4707_v18  }
 0xdf8   :  { %3474 = vrcp.f32 %v2043_v41 }
 0xdfd   :  { %v2009_v15 = vpop.xlane.xlu2 %2008 }
 0xdfe   :  { %v3475_v53 = vpop.eup %3474  ;;  %v2038_v56 = vmax.f32 %v2009_v15, 1e-30  ;;  %2312 = vperm.xlu2 %3137, %v2267_v5   ;;  %v2049_v15 = vmax.f32 %v4697_v29, 1e-30  ;;  %v2044_v29 = vmax.f32 %v4702_v22, 1e-30 }
 0xdff   :  { %v2132_v24 = vmul.f32 %v3475_v53, %v2086_v48  ;;  %v2048_v53 = vmax.f32 %v4668_v25, 1e-30 }
 0xe00   :  { %3476 = vrcp.f32 %v2038_v56  ;;  %2270 = vperm.xlu0 %3127, %v4644_v38  }
 0xe01   :  { %v2151_v37 = vadd.f32 %v4711_v14, %v2132_v24  ;;  %3478 = vtanh.f32 %v2150_v39  ;;  %v2047_v24 = vmax.f32 %v4684_v61, 1e-30 }
 0xe03   :  { %3480 = vtanh.f32 %v2151_v37 }
 0xe04   :  { %3482 = vrcp.f32 %v2041_v23 }
 0xe05   :  { %v2274_v6 = vpop.permute.xlu1 %2273  ;;  %v2007_v45 = vpop.xlane.xlu2 %2006 }
 0xe06   :  { %v3477_v0 = vpop.eup %3476  ;;  %v2037_v62 = vmax.f32 %v2007_v45, 1e-30  ;;  %3139 = vset.pattern.permute.xlu2 %v3652_v43  ;;  %vm2318_vm3 = vcmp.eq.s32.totalorder %v2274_v6, 1 }
 0xe07   :  { %v2127_v12 = vmul.f32 %v3477_v0, %v4659_v51  ;;  %2410 = vperm.xlu2 %3139, %v4679_v34   ;;  %v4723_v63 = vpop.eup %3478 }
 0xe08   :  { %3484 = vrcp.f32 %v2037_v62  ;;  %2291 = vperm.xlu0 %3127, %v2260_v47  }
 0xe09   :  { %v4725_v2 = vpop.eup %3480  ;;  %v2146_v38 = vadd.f32 %v4711_v14, %v2127_v12 }
 0xe0a   :  { %v2179_v21 = vpack.c.bf16 %v4725_v2, %v4723_v63  ;;  %v3483_v4 = vpop.eup %3482 }
 0xe0b   :  { %3486 = vtanh.f32 %v2146_v38  ;;  %v2130_v44 = vmul.f32 %v3483_v4, %v2081_v16 }
 0xe0d   :  { %v4730_v17 = vpop.permute.xlu1 %2282  ;;  %v2277_v7 = vpop.permute.xlu2 %2276  ;;  %v2149_v50 = vadd.f32 %v4711_v14, %v2130_v44 }
 0xe0e   :  { %v3485_v13 = vpop.eup %3484  ;;  %vm2319_vm1 = vcmp.eq.s32.totalorder %v2277_v7, 1  ;;  %vm2321_vm9 = vcmp.eq.s32.totalorder %v4730_v17, 1 }
 0xe0f   :  { %v2126_v30 = vmul.f32 %v3485_v13, %v4649_v33  ;;  %3141 = vset.pattern.permute.xlu2 %v3651_v28 }
 0xe10   :  { %2300 = vperm.xlu0 %3127, %v4665_v42  }
 0xe11   :  { %v2145_v1 = vadd.f32 %v4711_v14, %v2126_v30  ;;  %v4738_v51 = vpop.eup %3486 }
 0xe12   :  { %v4744_v33 = vsel %vm2319_vm1, %v4738_v51, -1e+30 }
 0xe13   :  { %3488 = vtanh.f32 %v2145_v1 }
 0xe14   :  { %3490 = vtanh.f32 %v2149_v50  ;;  %v2036_v50 = vmax.f32 %v4713_v60, 1e-30 }
 0xe15   :  { %v2289_v59 = vpop.permute.xlu1 %2288  ;;  %v4741_v11 = vpop.permute.xlu2 %2279 }
 0xe16   :  { %vm2323_vm2 = vcmp.eq.s32.totalorder %v2289_v59, 1  ;;  %vm2320_vm14 = vcmp.eq.s32.totalorder %v4741_v11, 1 }
 0xe17   :  { %v4747_v28 = vsel %vm2323_vm2, %v4723_v63, -1e+30 }
 0xe18   :  { %v2351_v42 = vmax.f32 %v4744_v33, %v4747_v28  ;;  %3134 = vset.pattern.permute.xlu0 %v3652_v43 }
 0xe19   :  { %2377 = vperm.xlu0 %3134, %v4631_v26   ;;  %v4755_v34 = vpop.eup %3488  ;;  %v2094_v26 = vpop.f32.mrf.mxu1 }
 0xe1a   :  { %v4757_v36 = vpop.eup %3490  ;;  %v4760_v10 = vsel %vm2318_vm3, %v4755_v34, -1e+30 }
 0xe1d   :  { %v2286_v35 = vpop.permute.xlu2 %2285 }
 0xe1e   :  { %vm2322_vm4 = vcmp.eq.s32.totalorder %v2286_v35, 1  ;;  %v4771_v5 = vpop.permute.xlu1 %2374 }
 0xe1f   :  { %v4763_v16 = vsel %vm2322_vm4, %v4757_v36, -1e+30  ;;  %vm2419_vm6 = vcmp.eq.s32.totalorder %v4771_v5, 1 }
 0xe20   :  { %v2350_v43 = vmax.f32 %v4760_v10, %v4763_v16  ;;  %v2435_v5 = vsel %vm2419_vm6, %v4755_v34, -1e+30 }
 0xe21   :  { %2392 = vperm.xlu0 %3134, %v2260_v47   ;;  %v2096_v3 = vpop.f32.mrf.mxu1 }
 0xe25   :  { %v4768_v55 = vpop.permute.xlu2 %2371 }
 0xe26   :  { %v4776_v41 = vpop.permute.xlu1 %2383 }
 0xe29   :  { %2404 = vperm.xlu0 %3134, %v4688_v32   ;;  %v2099_v46 = vpop.f32.mrf.mxu1  ;;  %v2050_v32 = vmax.f32 %v4681_v27, 1e-30 }
 0xe2b   :  { %3492 = vrcp.f32 %v2050_v32 }
 0xe2c   :  { %3494 = vrcp.f32 %v2049_v15 }
 0xe2d   :  { %v4773_v49 = vpop.permute.xlu2 %2380  ;;  %3496 = vrcp.f32 %v2048_v53 }
 0xe2e   :  { %v4783_v56 = vpop.permute.xlu1 %2389 }
 0xe2f   :  { %vm2424_vm4 = vcmp.eq.s32.totalorder %v4783_v56, 1 }
 0xe31   :  { %2407 = vperm.xlu0 %3134, %v4707_v18   ;;  %v2101_v19 = vpop.f32.mrf.mxu1  ;;  %v3493_v27 = vpop.eup %3492 }
 0xe32   :  { %v3495_v23 = vpop.eup %3494 }
 0xe33   :  { %v3497_v45 = vpop.eup %3496  ;;  %v2138_v47 = vmul.f32 %v3495_v23, %v2101_v19 }
 0xe34   :  { %v2137_v61 = vmul.f32 %v3497_v45, %v2099_v46 }
 0xe35   :  { %v4778_v40 = vpop.permute.xlu2 %2386  ;;  %v2157_v13 = vadd.f32 %v4711_v14, %v2138_v47 }
 0xe36   :  { %v2156_v19 = vadd.f32 %v4711_v14, %v2137_v61  ;;  %vm2423_vm5 = vcmp.eq.s32.totalorder %v4778_v40, 1 }
 0xe37   :  { %v2298_v12 = vpop.permute.xlu1 %2297  ;;  %v2439_v40 = vsel %vm2423_vm5, %v4757_v36, -1e+30 }
 0xe38   :  { %vm2326_vm7 = vcmp.eq.s32.totalorder %v2298_v12, 1  ;;  %v2451_v47 = vmax.f32 %v2435_v5, %v2439_v40 }
 0xe39   :  { %2416 = vperm.xlu0 %3134, %v4694_v58  }
 0xe3d   :  { %v4785_v9 = vpop.permute.xlu2 %2294 }
 0xe3e   :  { %vm2325_vm10 = vcmp.eq.s32.totalorder %v4785_v9, 1 }
 0xe3f   :  { %v2035_v20 = vpop.xlane.xlu0 %2034 }
 0xe40   :  { %v2051_v48 = vmax.f32 %v2035_v20, 1e-30 }
 0xe42   :  { %3498 = vrcp.f32 %v2051_v48  ;;  %v4804_v48 = vpop.permute.xlu1 %2395 }
 0xe45   :  { %v4791_v22 = vpop.permute.xlu2 %2303 }
 0xe46   :  { %vm2328_vm0 = vcmp.eq.s32.totalorder %v4791_v22, 1 }
 0xe47   :  { %v2025_v18 = vpop.xlane.xlu0 %2024 }
 0xe48   :  { %v2046_v39 = vmax.f32 %v2025_v18, 1e-30  ;;  %v3499_v0 = vpop.eup %3498 }
 0xe4a   :  { %3500 = vrcp.f32 %v2046_v39 }
 0xe4b   :  { %v2104_v58 = vpop.f32.mrf.mxu1  ;;  %3502 = vrcp.f32 %v2047_v24 }
 0xe4c   :  { %v2139_v37 = vmul.f32 %v3493_v27, %v2104_v58 }
 0xe4e   :  { %v2158_v38 = vadd.f32 %v4711_v14, %v2139_v37 }
 0xe4f   :  { %v2023_v25 = vpop.xlane.xlu0 %2022 }
 0xe50   :  { %v2045_v6 = vmax.f32 %v2023_v25, 1e-30  ;;  %v3501_v62 = vpop.eup %3500 }
 0xe51   :  { %v2135_v30 = vmul.f32 %v3501_v62, %v2094_v26  ;;  %v3503_v1 = vpop.eup %3502 }
 0xe52   :  { %3504 = vrcp.f32 %v2045_v6  ;;  %v2136_v20 = vmul.f32 %v3503_v1, %v2096_v3 }
 0xe53   :  { %3506 = vrcp.f32 %v2044_v29  ;;  %v2106_v4 = vpop.f32.mrf.mxu1  ;;  %v2154_v53 = vadd.f32 %v4711_v14, %v2135_v30  ;;  %v2399_v29 = vpop.permute.xlu2 %2398 }
 0xe54   :  { %v2140_v7 = vmul.f32 %v3499_v0, %v2106_v4  ;;  %3508 = vtanh.f32 %v2158_v38  ;;  %v2155_v60 = vadd.f32 %v4711_v14, %v2136_v20  ;;  %vm2427_vm8 = vcmp.eq.s32.totalorder %v2399_v29, 1  ;;  %v4832_v30 = vpop.permute.xlu1 %2401 }
 0xe55   :  { %vm2428_vm5 = vcmp.eq.s32.totalorder %v4832_v30, 1  ;;  %v3017_v30 = vld [vmem:[#allocation7 + $0x10] sm:$0xff] }
 0xe56   :  { %v2159_v44 = vadd.f32 %v4711_v14, %v2140_v7 }
 0xe57   :  { %v2013_v59 = vpop.xlane.xlu0 %2012 }
 0xe58   :  { %v3505_v35 = vpop.eup %3504  ;;  %3510 = vtanh.f32 %v2159_v44  ;;  %v2040_v32 = vmax.f32 %v2013_v59, 1e-30 }
 0xe59   :  { %v3507_v46 = vpop.eup %3506  ;;  %3512 = vtanh.f32 %v2157_v13  ;;  %v2134_v15 = vmul.f32 %v3505_v35, %v4753_v31 }
 0xe5a   :  { %3514 = vrcp.f32 %v2040_v32  ;;  %v2133_v18 = vmul.f32 %v3507_v46, %v4735_v57  ;;  %v4801_v3 = vpop.eup %3508 }
 0xe5b   :  { %3516 = vrcp.f32 %v2036_v50  ;;  %v2153_v26 = vadd.f32 %v4711_v14, %v2134_v15 }
 0xe5c   :  { %3518 = vtanh.f32 %v2156_v19  ;;  %v2152_v27 = vadd.f32 %v4711_v14, %v2133_v18  ;;  %v2310_v35 = vpop.permute.xlu1 %2309 }
 0xe5d   :  { %3520 = vtanh.f32 %v2153_v26  ;;  %vm2330_vm12 = vcmp.eq.s32.totalorder %v2310_v35, 1  ;;  %v3019_v35 = vld [vmem:[#allocation7 + $0x20] sm:$0xff] }
 0xe5e   :  { %v4806_v39 = vpop.eup %3510  ;;  %3522 = vtanh.f32 %v2154_v53 }
 0xe5f   :  { %v4808_v31 = vpop.eup %3512  ;;  %v2011_v58 = vpop.xlane.xlu0 %2010  ;;  %v2183_v24 = vpack.c.bf16 %v4806_v39, %v4801_v3  ;;  %3524 = vtanh.f32 %v2155_v60 }
 0xe60   :  { %v3515_v57 = vpop.eup %3514  ;;  %v2039_v37 = vmax.f32 %v2011_v58, 1e-30  ;;  %v2346_v26 = vsel %vm2330_vm12, %v4808_v31, -1e+30 }
 0xe61   :  { %v3517_v25 = vpop.eup %3516  ;;  %2185 = vmatpush.bf16.msra.mxu3 %v2183_v24  ;;  %v2129_v6 = vmul.f32 %v3515_v57, %v4690_v8 }
 0xe62   :  { %v4815_v23 = vpop.eup %3518  ;;  %3526 = vrcp.f32 %v2039_v37  ;;  %v2125_v12 = vmul.f32 %v3517_v25, %v4640_v52  ;;  %v2184_v37 = vld [vmem:[%s4944_s7] sm:$0x1] }
 0xe63   :  { %v3521_v45 = vpop.eup %3520  ;;  %v2182_v0 = vpack.c.bf16 %v4808_v31, %v4815_v23  ;;  %3528 = vtanh.f32 %v2152_v27  ;;  %v2148_v13 = vadd.f32 %v4711_v14, %v2129_v6 }
 0xe64   :  { %v4821_v62 = vpop.eup %3522  ;;  %v2342_v38 = vsel %vm2326_vm7, %v3521_v45, -1e+30  ;;  %v2443_v4 = vsel %vm2427_vm8, %v3521_v45, -1e+30  ;;  %v2144_v50 = vadd.f32 %v4711_v14, %v2125_v12  ;;  %v2316_v25 = vpop.permute.xlu1 %2315  ;;  %vm2422_vm8 = vcmp.eq.s32.totalorder %v4776_v41, 1 }
 0xe65   :  { %v2354_v61 = vmax.f32 %v2350_v43, %v2342_v38  ;;  %v4827_v7 = vmax.f32 %v2451_v47, %v2443_v4  ;;  %2186 = vmatpush.bf16.msra.mxu3 %v2182_v0  ;;  %v4829_v8 = vpop.eup %3524  ;;  %3530 = vtanh.f32 %v2148_v13  ;;  %vm2332_vm1 = vcmp.eq.s32.totalorder %v2316_v25, 1  ;;  %v2198_v13 = vld [vmem:[%s4946_s9] sm:$0x3] }
 0xe66   :  { %v2181_v44 = vpack.c.bf16 %v4829_v8, %v4821_v62  ;;  %3532 = vtanh.f32 %v2144_v50  ;;  %v2344_v5 = vsel %vm2328_vm0, %v4829_v8, -1e+30  ;;  %v2348_v22 = vsel %vm2332_vm1, %v4806_v39, -1e+30  ;;  %2201 = vperm.xlu2 %3141, %v2198_v13  }
 0xe67   :  { %v2358_v60 = vmax.f32 %v2354_v61, %v2346_v26  ;;  %v3021_v61 = vld [vmem:[#allocation7 + $0x30] sm:$0xff]  ;;  %v2440_v50 = vsel %vm2424_vm4, %v4723_v63, -1e+30  ;;  %v3030_v26 = vld [vmem:[#allocation7 + $0x78] sm:$0xff]  ;;  %vm2471_vm1 = vcmask 1040384  }
 0xe68   :  { %v3527_v1 = vpop.eup %3526  ;;  %2620 = vmatpush.bf16.msrb.mxu2 %v3030_v26 }
 0xe69   :  { %v2128_v52 = vmul.f32 %v3527_v1, %v4671_v54  ;;  %2187 = vmatpush.bf16.msra.mxu3 %v2181_v44  ;;  %v4838_v10 = vpop.eup %3528  ;;  %v2307_v54 = vpop.permute.xlu2 %2306 }
 0xe6a   :  { %v2180_v43 = vpack.c.bf16 %v3521_v45, %v4838_v10  ;;  %vm2329_vm13 = vcmp.eq.s32.totalorder %v2307_v54, 1  ;;  %v3022_v45 = vld [vmem:[#allocation7 + $0x38] sm:$0xff] }
 0xe6b   :  { %v2147_v16 = vadd.f32 %v4711_v14, %v2128_v52  ;;  %v4842_v59 = vpop.eup %3530  ;;  %2607 = vmatpush.bf16.msra.mxu0 %v3022_v45  ;;  %v3024_v45 = vld [vmem:[#allocation7 + $0x48] sm:$0xff] }
 0xe6c   :  { %v4848_v19 = vpop.eup %3532  ;;  %v2178_v14 = vpack.c.bf16 %v4757_v36, %v4842_v59  ;;  %v2337_v46 = vsel %vm2321_vm9, %v4842_v59, -1e+30  ;;  %v2345_v36 = vsel %vm2329_vm13, %v4815_v23, -1e+30  ;;  %v2414_v1 = vpop.permute.xlu1 %2413  ;;  %vm2418_vm9 = vcmp.eq.s32.totalorder %v4768_v55, 1 }
 0xe6d   :  { %2188 = vmatpush.bf16.msra.mxu3 %v2180_v43  ;;  %3534 = vtanh.f32 %v2147_v16  ;;  %v2176_v57 = vpack.c.bf16 %v4755_v34, %v4848_v19  ;;  %vm2432_vm7 = vcmp.eq.s32.totalorder %v2414_v1, 1  ;;  %v2444_v43 = vsel %vm2428_vm5, %v4821_v62, -1e+30 }
 0xe6e   :  { %v2448_v56 = vsel %vm2432_vm7, %v4801_v3, -1e+30 }
 0xe6f   :  { %2608 = vmatpush.bf16.msra.mxu0 %v3021_v61  ;;  %v3023_v61 = vld [vmem:[#allocation7 + $0x40] sm:$0xff] }
 0xe71   :  { %2189 = vmatpush.bf16.msra.mxu3 %v2179_v21  ;;  %v2341_v21 = vsel %vm2325_vm10, %v4838_v10, -1e+30  ;;  %v2313_v11 = vpop.permute.xlu2 %2312  ;;  %vm2426_vm10 = vcmp.eq.s32.totalorder %v4804_v48, 1 }
 0xe72   :  { %v2271_v20 = vpop.permute.xlu0 %2270  ;;  %vm2331_vm2 = vcmp.eq.s32.totalorder %v2313_v11, 1 }
 0xe73   :  { %vm2317_vm11 = vcmp.eq.s32.totalorder %v2271_v20, 1  ;;  %v4853_v32 = vpop.eup %3534  ;;  %v2347_v38 = vsel %vm2331_vm2, %v4801_v3, -1e+30  ;;  %v2434_v3 = vsel %vm2418_vm9, %v4848_v19, -1e+30  ;;  %vm2716_vm2 = vcmask 58368  }
 0xe74   :  { %v2333_v17 = vsel %vm2317_vm11, %v4848_v19, -1e+30  ;;  %v2177_v9 = vpack.c.bf16 %v4853_v32, %v4738_v51  ;;  %v2336_v27 = vsel %vm2320_vm14, %v4853_v32, -1e+30  ;;  %vm2421_vm14 = vcmp.eq.s32.totalorder %v4773_v49, 1 }
 0xe75   :  { %v2349_v15 = vmax.f32 %v2333_v17, %v2337_v46  ;;  %2190 = vmatpush.bf16.msra.mxu3 %v2178_v14  ;;  %v3018_v46 = vld [vmem:[#allocation7 + $0x18] sm:$0xff] }
 0xe77   :  { %v2353_v53 = vmax.f32 %v2349_v15, %v2341_v21  ;;  %v3015_v15 = vld [vmem:[#allocation7] sm:$0xff] }
 0xe79   :  { %v2357_v18 = vmax.f32 %v2353_v53, %v2345_v36  ;;  %2191 = vmatpush.bf16.msra.mxu3 %v2177_v9  ;;  %v2411_v17 = vpop.permute.xlu2 %2410  ;;  %v2442_v53 = vsel %vm2426_vm10, %v4838_v10, -1e+30  ;;  %v3029_v36 = vld [vmem:[#allocation7 + $0x70] sm:$0xff] }
 0xe7a   :  { %v2292_v58 = vpop.permute.xlu0 %2291  ;;  %vm2431_vm11 = vcmp.eq.s32.totalorder %v2411_v17, 1  ;;  %2621 = vmatpush.bf16.msrb.mxu2 %v3029_v36 }
 0xe7b   :  { %v2361_v24 = vmax.f32 %v2357_v18, %v2358_v60  ;;  %vm2324_vm15 = vcmp.eq.s32.totalorder %v2292_v58, 1  ;;  %v2447_v41 = vsel %vm2431_vm11, %v4808_v31, -1e+30  ;;  %v2437_v31 = vsel %vm2421_vm14, %v4853_v32, -1e+30  ;;  %v3028_v58 = vld [vmem:[#allocation7 + $0x68] sm:$0xff] }
 0xe7c   :  { %v2340_v40 = vsel %vm2324_vm15, %v4725_v2, -1e+30  ;;  %v2459_v48 = vmax.f32 %v4827_v7, %v2447_v41  ;;  %v3027_v7 = vld [vmem:[#allocation7 + $0x60] sm:$0xff] }
 0xe7d   :  { %v2352_v29 = vmax.f32 %v2336_v27, %v2340_v40  ;;  %2192 = vmatpush.bf16.msra.mxu3 %v2176_v57 }
 0xe7e   :  { %2622 = vmatpush.bf16.msrb.mxu2 %v3028_v58 }
 0xe7f   :  { %v2356_v34 = vmax.f32 %v2352_v29, %v2344_v5 }
 0xe80   :  { %2193 = vmatmul.bf16.vlgmr.msra.gmra.mxu3 %v2184_v37 }
 0xe81   :  { %v2360_v4 = vmax.f32 %v2356_v34, %v2348_v22 }
 0xe82   :  { %v2301_v6 = vpop.permute.xlu0 %2300  ;;  %2623 = vmatpush.bf16.msrb.mxu2 %v3027_v7 }
 0xe83   :  { %vm2327_vm3 = vcmp.eq.s32.totalorder %v2301_v6, 1 }
 0xe84   :  { %v2343_v47 = vsel %vm2327_vm3, %v4821_v62, -1e+30  ;;  %v2438_v62 = vsel %vm2422_vm8, %v4842_v59, -1e+30 }
 0xe85   :  { %v2355_v0 = vmax.f32 %v2351_v42, %v2343_v47  ;;  %v3020_v42 = vld [vmem:[#allocation7 + $0x28] sm:$0xff]  ;;  %v2450_v21 = vmax.f32 %v2434_v3, %v2438_v62  ;;  %v3151_v3 = vld [vmem:[%s4950_s13] ss:$0 sm:$0xff] }
 0xe86   :  { %2609 = vmatpush.bf16.msra.mxu0 %v3020_v42  ;;  %v3038_v42 = vld [vmem:[%s4949_s12 + $0x38] sm:$0xff] }
 0xe87   :  { %v2359_v12 = vmax.f32 %v2355_v0, %v2347_v38  ;;  %v2454_v55 = vmax.f32 %v2450_v21, %v2442_v53  ;;  %2703 = vmatpush.bf16.msrb.mxu3 %v3038_v42 }
 0xe89   :  { %v2362_v44 = vmax.f32 %v2359_v12, %v2360_v4 }
 0xe8a   :  { %2610 = vmatpush.bf16.msra.mxu0 %v3019_v35 }
 0xe8b   :  { %v2363_v33 = vmax.f32 %v2361_v24, %v2362_v44  ;;  %v2378_v28 = vpop.permute.xlu0 %2377 }
 0xe8c   :  { %vm2420_vm6 = vcmp.eq.s32.totalorder %v2378_v28, 1 }
 0xe8d   :  { %v2436_v52 = vsel %vm2420_vm6, %v4738_v51, -1e+30  ;;  %v3016_v51 = vld [vmem:[#allocation7 + $0x8] sm:$0xff]  ;;  %v2364_v24 = vrot.slane %v2363_v33, 4 }
 0xe8e   :  { %v2452_v16 = vmax.f32 %v2436_v52, %v2440_v50  ;;  %2611 = vmatpush.bf16.msra.mxu0 %v3018_v46  ;;  %v3037_v50 = vld [vmem:[%s4949_s12 + $0x30] sm:$0xff]  ;;  %v3036_v52 = vld [vmem:[%s4949_s12 + $0x28] sm:$0xff]  ;;  %v3150_v46 = vld [vmem:[%s4948_s11] ss:$0 sm:$0xff]  ;;  %s3653_s11 = smov [#allocation8]  }
 0xe8f   :  { %v2365_v40 = vmax.f32 %v2363_v33, %v2364_v24  ;;  %2704 = vmatpush.bf16.msrb.mxu3 %v3037_v50 }
 0xe90   :  { %v2456_v54 = vmax.f32 %v2452_v16, %v2444_v43  ;;  %v3035_v16 = vld [vmem:[%s4949_s12 + $0x20] sm:$0xff]  ;;  %v3034_v43 = vld [vmem:[%s4949_s12 + $0x18] sm:$0xff] }
 0xe91   :  { %v2366_v11 = vrot.slane %v2365_v40, 2 }
 0xe92   :  { %v2460_v20 = vmax.f32 %v2456_v54, %v2448_v56  ;;  %2612 = vmatpush.bf16.msra.mxu0 %v3017_v30  ;;  %v3033_v56 = vld [vmem:[%s4949_s12 + $0x10] sm:$0xff] }
 0xe93   :  { %v2393_v14 = vpop.permute.xlu0 %2392  ;;  %v2367_v5 = vmax.f32 %v2365_v40, %v2366_v11  ;;  %2705 = vmatpush.bf16.msrb.mxu3 %v3036_v52 }
 0xe94   :  { %vm2425_vm12 = vcmp.eq.s32.totalorder %v2393_v14, 1  ;;  %v3031_v14 = vld [vmem:[%s4949_s12] sm:$0xff] }
 0xe95   :  { %v2441_v60 = vsel %vm2425_vm12, %v4725_v2, -1e+30  ;;  %v3026_v2 = vld [vmem:[#allocation7 + $0x58] sm:$0xff]  ;;  %v2368_v47 = vrot.slane %v2367_v5, 1 }
 0xe96   :  { %2613 = vmatpush.bf16.msra.mxu0 %v3016_v51  ;;  %v2453_v57 = vmax.f32 %v2437_v31, %v2441_v60  ;;  %2624 = vmatpush.bf16.msrb.mxu2 %v3026_v2 }
 0xe97   :  { %v2369_v22 = vmax.f32 %v2367_v5, %v2368_v47  ;;  %2706 = vmatpush.bf16.msrb.mxu3 %v3035_v16 }
 0xe9a   :  { %2614 = vmatpush.bf16.msra.mxu0 %v3015_v15 }
 0xe9b   :  { %v2405_v63 = vpop.permute.xlu0 %2404  ;;  %2707 = vmatpush.bf16.msrb.mxu3 %v3034_v43 }
 0xe9c   :  { %vm2429_vm15 = vcmp.eq.s32.totalorder %v2405_v63, 1 }
 0xe9d   :  { %v2445_v18 = vsel %vm2429_vm15, %v4829_v8, -1e+30  ;;  %v3025_v8 = vld [vmem:[#allocation7 + $0x50] sm:$0xff] }
 0xe9e   :  { %v2457_v27 = vmax.f32 %v2453_v57, %v2445_v18  ;;  %2625 = vmatpush.bf16.msrb.mxu2 %v3025_v8 }
 0xe9f   :  { %2708 = vmatpush.bf16.msrb.mxu3 %v3033_v56 }
 0xea2   :  { %2626 = vmatpush.bf16.msrb.mxu2 %v3024_v45 }
 0xea3   :  { %v2408_v9 = vpop.permute.xlu0 %2407 }
 0xea4   :  { %vm2430_vm13 = vcmp.eq.s32.totalorder %v2408_v9, 1 }
 0xea5   :  { %v2446_v59 = vsel %vm2430_vm13, %v4815_v23, -1e+30 }
 0xea6   :  { %v2458_v19 = vmax.f32 %v2454_v55, %v2446_v59  ;;  %2627 = vmatpush.bf16.msrb.mxu2 %v3023_v61 }
 0xea8   :  { %v2462_v10 = vmax.f32 %v2458_v19, %v2459_v48 }
 0xeab   :  { %v2417_v23 = vpop.permute.xlu0 %2416 }
 0xeac   :  { %vm2433_vm0 = vcmp.eq.s32.totalorder %v2417_v23, 1 }
 0xead   :  { %v2449_v49 = vsel %vm2433_vm0, %v4806_v39, -1e+30 }
 0xeae   :  { %v2461_v29 = vmax.f32 %v2457_v27, %v2449_v49 }
 0xeb0   :  { %v2463_v37 = vmax.f32 %v2460_v20, %v2461_v29  ;;  %v3032_v20 = vld [vmem:[%s4949_s12 + $0x8] sm:$0xff]  ;;  %s2735_s12 = sshll.u32 %s3653_s11, 4  ;;  %s2736_s12 = int_to_ptr.vmem [resolvable:$true] %s2735_s12 }
 0xeb1   :  { %2709 = vmatpush.bf16.msrb.mxu3 %v3032_v20 }
 0xeb2   :  { %v2464_v32 = vmax.f32 %v2462_v10, %v2463_v37 }
 0xeb4   :  { %v2465_v25 = vrot.slane %v2464_v32, 4 }
 0xeb5   :  { %2710 = vmatpush.bf16.msrb.mxu3 %v3031_v14 }
 0xeb6   :  { %v2466_v6 = vmax.f32 %v2464_v32, %v2465_v25 }
 0xeb8   :  { %v2467_v34 = vrot.slane %v2466_v6, 2 }
 0xeba   :  { %v2468_v0 = vmax.f32 %v2466_v6, %v2467_v34 }
 0xebc   :  { %v2469_v39 = vrot.slane %v2468_v0, 1 }
 0xebe   :  { %v2470_v38 = vmax.f32 %v2468_v0, %v2469_v39 }
 0xec0   :  { %v2472_v4 = vsel %vm2471_vm1, %v2369_v22, %v2470_v38  ;;  %v2202_v13 = vpop.permute.xlu2 %2201 }
 0xec1   :  { %v2473_v12 = vpack.c.bf16 %v2472_v4, %v2472_v4 }
 0xec3   :  { %2615 = vmatmul.bf16.vlgmr.msra.gmra.mxu0 %v2473_v12 }
 0xf03   :  { %v2194_v44 = vpop.f32.mrf.mxu3 }
 0xf04   :  { %v2204_v1 = vmul.f32 %v2202_v13, %v2194_v44 }
 0xf06   :  { %v2474_v33 = vpack.c.bf16 %v2204_v1, %v2204_v1 }
 0xf08   :  { %2628 = vmatmul.bf16.vlgmr.msrb.gmra.mxu2 %v2474_v33 }
 0xf0b   :  { %v2196_v28 = vpop.f32.mrf.mxu3 }
 0xf40   :  { %v2616_v35 = vpop.f32.mrf.mxu0 }
 0xf41   :  { %v2617_v30 = vadd.f32 %v3150_v46, %v2616_v35 }
 0xf48   :  { %v2618_v54 = vpop.f32.mrf.mxu0 }
 0xf8b   :  { %v2629_v63 = vpop.f32.mrf.mxu2 }
 0xf8c   :  { %v2630_v51 = vadd.f32 %v2629_v63, %v2617_v30 }
 0xf8e   :  { %3536 = vtanh.f32 %v2630_v51 }
 0xf93   :  { %v2631_v17 = vpop.f32.mrf.mxu2 }
 0xf94   :  { %v3537_v62 = vpop.eup %3536 }
 0xf95   :  { %v2634_v15 = vpack.c.bf16 %v3537_v62, %v3537_v62 }
 0xf97   :  { %2711 = vmatmul.bf16.vlgmr.msrb.gmra.mxu3 %v2634_v15 }
0x101a   :  { %v2712_v21 = vpop.f32.mrf.mxu3 }
0x101b   :  { %v2713_v53 = vadd.f32 %v3151_v3, %v2712_v21 }
0x101d   :  { %v2717_v41 = vsel %vm2716_vm2, %v2713_v53, -inf }
0x101e   :  { %2718 = vmax.xlane.f32.xlu1 %v2717_v41 }
0x1022   :  { %v2714_v9 = vpop.f32.mrf.mxu3 }
0x1091   :  { %v2719_v26 = vpop.xlane.xlu1 %2718 }
0x1092   :  { %v2720_v55 = vsub.f32 %v2713_v53, %v2719_v26 }
0x1094   :  { %v2721_v59 = vmul.f32 1.442695, %v2720_v55 }
0x1096   :  { %3538 = vpow2.f32 %v2721_v59 }
0x109c   :  { %v3539_v36 = vpop.eup %3538 }
0x109d   :  { %v2723_v48 = vsel %vm2716_vm2, %v3539_v36, 0.0 }
0x109e   :  { %2724 = vadd.xlane.f32.xlu0 %v2723_v48 }
0x1111   :  { %v2725_v19 = vpop.xlane.xlu0 %2724 }
0x1112   :  { %3540 = vlog2.f32 %v2725_v19 }
0x1118   :  { %v3541_v60 = vpop.eup %3540 }
0x1119   :  { %v2727_v10 = vmul.f32 0.6931472, %v3541_v60 }
0x111b   :  { %v2728_v31 = vsub.f32 %v2720_v55, %v2727_v10 }
0x111d   :  { %2729 = vst.msk [vmem:[#allocation8] sm:$0x3] %vm2716_vm2, %v2728_v31 }
0x111e   :  { %2740 = dma.vmem_to_hbm [thread:$0]  %s2736_s12, 32, %s2738_s15, [#allocation4]  }
0x111f   :  { %3642 = dma.done.wait [#allocation4], 32  }
0x1120   :  { %3643 = vsyncadd [#allocation4], 4294967264 }
0x1121   :  { %2745 = vsyncpa [#allocation3], 1 }
0x1122   :  { %2746 = vsyncpa [#allocation6], 1 }
0x1123   :  { %2747 = vsyncpa [#allocation4], 1 }

</bundles_post_ra>
